<compile_context>
chip_gen: v7x
topology: tpu7x:2x2x1
jax: 0.10.0
libtpu: 0.0.40
codegen_flags: <defaults>
</compile_context>

<pallas_src>
import functools

import jax
import jax.numpy as jnp
from jax.experimental import pallas as pl
from jax.experimental.pallas import tpu as pltpu


# ----------------------------- in-kernel helpers -----------------------------

def _layernorm(x, g, b, eps=1e-5):
    # torch.nn.LayerNorm semantics: biased variance, eps inside rsqrt.
    mu = jnp.mean(x, axis=-1, keepdims=True)
    xc = x - mu
    var = jnp.mean(xc * xc, axis=-1, keepdims=True)
    return xc * jax.lax.rsqrt(var + eps) * g + b


def _softmax_row(dots):
    dots = dots - jnp.max(dots, axis=-1, keepdims=True)
    e = jnp.exp(dots)
    inv = pl.reciprocal(jnp.sum(e, axis=-1, keepdims=True), approx=True)
    return e * inv


def _erf(x):
    # Abramowitz & Stegun 7.1.26 (|err| < 1.5e-7); only VPU/EUP-friendly ops.
    a1, a2, a3, a4, a5 = 0.254829592, -0.284496736, 1.421413741, -1.453152027, 1.061405429
    p = 0.3275911
    ax = jnp.abs(x)
    t = 1.0 / (1.0 + p * ax)
    poly = ((((a5 * t + a4) * t + a3) * t + a2) * t + a1) * t
    y = 1.0 - poly * jnp.exp(-ax * ax)
    return jnp.where(x >= 0.0, y, -y)


def _gelu_exact(x):
    # torch.nn.GELU() default: exact erf formulation.
    return 0.5 * x * (1.0 + _erf(x * 0.7071067811865476))


# ----------------------------- Pallas kernels -----------------------------

def _encoder_layer_kernel(x_ref, a_g_ref, a_b_ref, wqkv_ref, wout_ref, bout_ref,
                          f_g_ref, f_b_ref, w1_ref, b1_ref, w2_ref, b2_ref,
                          n_g_ref, n_b_ref, o_ref, *, heads, dim_head,
                          apply_final_norm):
    # One batch element per grid step. Full PreNorm self-attention block + PreNorm
    # feed-forward block (+ optional final LayerNorm) fused in a single kernel.
    scale = float(dim_head) ** -0.5
    hd = heads * dim_head
    x = x_ref[0]                                                        # (N, D)

    # ---- self-attention (PreNorm fused) ----
    xn = _layernorm(x, a_g_ref[...], a_b_ref[...])
    qkv = jnp.dot(xn, wqkv_ref[...], preferred_element_type=jnp.float32)  # (N, 3*H*dh)
    head_outs = []
    for h in range(heads):
        q = qkv[:, h * dim_head:(h + 1) * dim_head] * scale
        k = qkv[:, hd + h * dim_head: hd + (h + 1) * dim_head]
        v = qkv[:, 2 * hd + h * dim_head: 2 * hd + (h + 1) * dim_head]
        dots = jax.lax.dot_general(q, k, (((1,), (1,)), ((), ())),
                                   preferred_element_type=jnp.float32)    # (N, N)
        attn = _softmax_row(dots)
        head_outs.append(jnp.dot(attn, v, preferred_element_type=jnp.float32))
    o_cat = jnp.concatenate(head_outs, axis=-1)                            # (N, H*dh)
    x = x + jnp.dot(o_cat, wout_ref[...],
                    preferred_element_type=jnp.float32) + bout_ref[...]

    # ---- feed-forward (PreNorm fused, exact-erf GELU in-kernel) ----
    xn2 = _layernorm(x, f_g_ref[...], f_b_ref[...])
    h1 = jnp.dot(xn2, w1_ref[...], preferred_element_type=jnp.float32) + b1_ref[...]
    h1 = _gelu_exact(h1)
    x = x + jnp.dot(h1, w2_ref[...], preferred_element_type=jnp.float32) + b2_ref[...]

    if apply_final_norm:
        x = _layernorm(x, n_g_ref[...], n_b_ref[...])
    o_ref[0] = x


def _cross_attn_block_kernel(cls_ref, ctx_ref, pin_w_ref, pin_b_ref, ln_g_ref,
                             ln_b_ref, wq_ref, wkv_ref, wout_ref, bout_ref,
                             pout_w_ref, pout_b_ref, o_ref, *attn_refs,
                             heads, dim_head):
    # ProjectInOut(PreNorm(Attention(..., kv_include_self=True))) + residual,
    # fully fused per batch element.  kv row 0 = LN(project_in(cls)) built in-kernel
    # (no XLA concatenate / HBM kv_src); patch context rows stay un-normalized,
    # matching CrossViT PreNorm semantics.
    a_ref = attn_refs[0] if attn_refs else None
    scale = float(dim_head) ** -0.5
    hd = heads * dim_head

    cls_raw = cls_ref[0]                                                 # (1, d_cls)
    ctx = ctx_ref[0]                                                     # (m, d_ctx)
    xn = _layernorm(jnp.dot(cls_raw, pin_w_ref[...],
                            preferred_element_type=jnp.float32) + pin_b_ref[...],
                    ln_g_ref[...], ln_b_ref[...])                        # (1, d_ctx)
    kv = jnp.concatenate([xn, ctx], axis=0)                              # (1+m, d_ctx)

    q_all = jnp.dot(xn, wq_ref[...], preferred_element_type=jnp.float32) * scale  # (1, H*dh)
    kv_all = jnp.dot(kv, wkv_ref[...], preferred_element_type=jnp.float32)        # (1+m, 2*H*dh)

    head_outs = []
    for h in range(heads):
        q = q_all[:, h * dim_head:(h + 1) * dim_head]
        k = kv_all[:, h * dim_head:(h + 1) * dim_head]
        v = kv_all[:, hd + h * dim_head: hd + (h + 1) * dim_head]
        dots = jax.lax.dot_general(q, k, (((1,), (1,)), ((), ())),
                                   preferred_element_type=jnp.float32)   # (1, 1+m)
        attn = _softmax_row(dots)
        if a_ref is not None:
            a_ref[0, h] = attn
        head_outs.append(jnp.dot(attn, v, preferred_element_type=jnp.float32))
    o_cat = jnp.concatenate(head_outs, axis=-1)                           # (1, H*dh)
    attn_out = (jnp.dot(o_cat, wout_ref[...], preferred_element_type=jnp.float32)
                + bout_ref[...])                                          # (1, d_ctx)
    o_ref[0] = (jnp.dot(attn_out, pout_w_ref[...], preferred_element_type=jnp.float32)
                + pout_b_ref[...] + cls_raw)                              # (1, d_cls)


# ----------------------------- kernel wrappers -----------------------------

def encoder_layer(attn_p, ff_p, norm_g, norm_b, x, heads, dim_head, apply_final_norm):
    B, N, D = x.shape
    hd = heads * dim_head
    hp = ff_p["w1"].shape[1]
    kernel = functools.partial(_encoder_layer_kernel, heads=heads, dim_head=dim_head,
                               apply_final_norm=apply_final_norm)
    return pl.pallas_call(
        kernel,
        out_shape=jax.ShapeDtypeStruct((B, N, D), jnp.float32),
        grid=(B,),
        in_specs=[
            pl.BlockSpec((1, N, D), lambda i: (i, 0, 0)),     # x
            pl.BlockSpec((1, D), lambda i: (0, 0)),           # attn LN gamma
            pl.BlockSpec((1, D), lambda i: (0, 0)),           # attn LN beta
            pl.BlockSpec((D, 3 * hd), lambda i: (0, 0)),      # fused Wqkv
            pl.BlockSpec((hd, D), lambda i: (0, 0)),          # fused Wout
            pl.BlockSpec((1, D), lambda i: (0, 0)),           # bout
            pl.BlockSpec((1, D), lambda i: (0, 0)),           # ff LN gamma
            pl.BlockSpec((1, D), lambda i: (0, 0)),           # ff LN beta
            pl.BlockSpec((D, hp), lambda i: (0, 0)),          # W1 (hidden padded to 128)
            pl.BlockSpec((1, hp), lambda i: (0, 0)),          # b1
            pl.BlockSpec((hp, D), lambda i: (0, 0)),          # W2
            pl.BlockSpec((1, D), lambda i: (0, 0)),           # b2
            pl.BlockSpec((1, D), lambda i: (0, 0)),           # final norm gamma
            pl.BlockSpec((1, D), lambda i: (0, 0)),           # final norm beta
        ],
        out_specs=pl.BlockSpec((1, N, D), lambda i: (i, 0, 0)),
        compiler_params=pltpu.CompilerParams(dimension_semantics=("parallel",)),
    )(x, attn_p["ln_g"], attn_p["ln_b"], attn_p["wqkv"], attn_p["wout"], attn_p["bout"],
      ff_p["ln_g"], ff_p["ln_b"], ff_p["w1"], ff_p["b1"], ff_p["w2"], ff_p["b2"],
      norm_g, norm_b)


def cross_attention_block(p, cls_tok, patch_ctx, heads, dim_head, emit_attn):
    B, _, d_cls = cls_tok.shape
    m, d_ctx = patch_ctx.shape[1], patch_ctx.shape[2]
    hd = heads * dim_head
    mk = m + 1
    kernel = functools.partial(_cross_attn_block_kernel, heads=heads, dim_head=dim_head)

    out_shape = [jax.ShapeDtypeStruct((B, 1, d_cls), jnp.float32)]
    out_specs = [pl.BlockSpec((1, 1, d_cls), lambda i: (i, 0, 0))]
    if emit_attn:
        out_shape.append(jax.ShapeDtypeStruct((B, heads, 1, mk), jnp.float32))
        out_specs.append(pl.BlockSpec((1, heads, 1, mk), lambda i: (i, 0, 0, 0)))

    outs = pl.pallas_call(
        kernel,
        out_shape=tuple(out_shape),
        grid=(B,),
        in_specs=[
            pl.BlockSpec((1, 1, d_cls), lambda i: (i, 0, 0)),   # raw cls token
            pl.BlockSpec((1, m, d_ctx), lambda i: (i, 0, 0)),   # patch context
            pl.BlockSpec((d_cls, d_ctx), lambda i: (0, 0)),     # project_in W
            pl.BlockSpec((1, d_ctx), lambda i: (0, 0)),         # project_in b
            pl.BlockSpec((1, d_ctx), lambda i: (0, 0)),         # LN gamma
            pl.BlockSpec((1, d_ctx), lambda i: (0, 0)),         # LN beta
            pl.BlockSpec((d_ctx, hd), lambda i: (0, 0)),        # fused Wq
            pl.BlockSpec((d_ctx, 2 * hd), lambda i: (0, 0)),    # fused Wkv
            pl.BlockSpec((hd, d_ctx), lambda i: (0, 0)),        # fused Wout
            pl.BlockSpec((1, d_ctx), lambda i: (0, 0)),         # bout
            pl.BlockSpec((d_ctx, d_cls), lambda i: (0, 0)),     # project_out W
            pl.BlockSpec((1, d_cls), lambda i: (0, 0)),         # project_out b
        ],
        out_specs=tuple(out_specs),
        compiler_params=pltpu.CompilerParams(dimension_semantics=("parallel",)),
    )(cls_tok, patch_ctx, p["pin_w"], p["pin_b"], p["ln_g"], p["ln_b"],
      p["wq"], p["wkv"], p["wout"], p["bout"], p["pout_w"], p["pout_b"])

    if emit_attn:
        return outs[0], outs[1]
    return outs[0], None


# ----------------------------- module forwards -----------------------------

def transformer_fwd(p, x):
    heads, dim_head = p["heads"], p["dim_head"]
    n_layers = len(p["layers"])
    for idx, layer in enumerate(p["layers"]):
        x = encoder_layer(layer["attn"], layer["ff"], p["norm_g"], p["norm_b"],
                          x, heads, dim_head, apply_final_norm=(idx == n_layers - 1))
    return x


def cross_transformer_fwd(p, sm_tokens, lg_tokens):
    heads, dim_head = p["heads"], p["dim_head"]
    sm_cls, sm_patch = sm_tokens[:, :1], sm_tokens[:, 1:]
    lg_cls, lg_patch = lg_tokens[:, :1], lg_tokens[:, 1:]
    sm_attn = lg_attn = None
    n_layers = len(p["layers"])
    for idx, layer in enumerate(p["layers"]):
        emit = idx == n_layers - 1    # only the last layer's attention map is used
        sm_cls, a_sm = cross_attention_block(layer["sm"], sm_cls, lg_patch,
                                             heads, dim_head, emit)
        lg_cls, a_lg = cross_attention_block(layer["lg"], lg_cls, sm_patch,
                                             heads, dim_head, emit)
        if emit:
            sm_attn, lg_attn = a_sm, a_lg
    sm_tokens = jnp.concatenate([sm_cls, sm_patch], axis=1)
    lg_tokens = jnp.concatenate([lg_cls, lg_patch], axis=1)
    return sm_tokens, lg_tokens, sm_attn, lg_attn


def multi_scale_encoder_fwd(p, sm_tokens, lg_tokens):
    sm_attn = lg_attn = None
    for layer in p["layers"]:
        sm_tokens = transformer_fwd(layer["sm_enc"], sm_tokens)
        lg_tokens = transformer_fwd(layer["lg_enc"], lg_tokens)
        sm_tokens, lg_tokens, sm_attn, lg_attn = cross_transformer_fwd(
            layer["cross"], sm_tokens, lg_tokens)
    return sm_tokens, lg_tokens, sm_attn, lg_attn


# ----------------------------- deterministic init -----------------------------
# Weights are stored pre-transposed (in_dim, out_dim), pre-fused across heads
# (Wqkv, Wkv, Wout stacks), and the MLP hidden dim is zero-padded to a multiple
# of 128 (bit-identical: GELU(0)=0, zero rows contribute 0).

def _round_up(x, m):
    return ((x + m - 1) // m) * m


def _wmat(key, din, dout):
    return jax.random.normal(key, (din, dout), jnp.float32) * 0.02


def init_attention_block(key, dim, heads, dim_head):
    k1, k2 = jax.random.split(key)
    hd = heads * dim_head
    return {
        "ln_g": jnp.ones((1, dim), jnp.float32),
        "ln_b": jnp.zeros((1, dim), jnp.float32),
        "wqkv": _wmat(k1, dim, 3 * hd),
        "wout": _wmat(k2, hd, dim),
        "bout": jnp.zeros((1, dim), jnp.float32),
    }


def init_ff_block(key, dim, hidden):
    k1, k2 = jax.random.split(key)
    hp = _round_up(hidden, 128)
    w1 = jnp.zeros((dim, hp), jnp.float32).at[:, :hidden].set(_wmat(k1, dim, hidden))
    w2 = jnp.zeros((hp, dim), jnp.float32).at[:hidden, :].set(_wmat(k2, hidden, dim))
    return {
        "ln_g": jnp.ones((1, dim), jnp.float32),
        "ln_b": jnp.zeros((1, dim), jnp.float32),
        "w1": w1, "b1": jnp.zeros((1, hp), jnp.float32),
        "w2": w2, "b2": jnp.zeros((1, dim), jnp.float32),
    }


def init_transformer(key, dim, depth, heads, dim_head, mlp_dim):
    layers = []
    for k in jax.random.split(key, depth):
        ka, kf = jax.random.split(k)
        layers.append({
            "attn": init_attention_block(ka, dim, heads, dim_head),
            "ff": init_ff_block(kf, dim, mlp_dim),
        })
    return {
        "layers": layers,
        "norm_g": jnp.ones((1, dim), jnp.float32),
        "norm_b": jnp.zeros((1, dim), jnp.float32),
        "heads": heads, "dim_head": dim_head,
    }


def init_cross_block(key, d_cls, d_ctx, heads, dim_head):
    ks = jax.random.split(key, 5)
    hd = heads * dim_head
    return {
        "pin_w": _wmat(ks[0], d_cls, d_ctx), "pin_b": jnp.zeros((1, d_ctx), jnp.float32),
        "ln_g": jnp.ones((1, d_ctx), jnp.float32), "ln_b": jnp.zeros((1, d_ctx), jnp.float32),
        "wq": _wmat(ks[1], d_ctx, hd),
        "wkv": _wmat(ks[2], d_ctx, 2 * hd),
        "wout": _wmat(ks[3], hd, d_ctx),
        "bout": jnp.zeros((1, d_ctx), jnp.float32),
        "pout_w": _wmat(ks[4], d_ctx, d_cls), "pout_b": jnp.zeros((1, d_cls), jnp.float32),
    }


def init_cross_transformer(key, sm_dim, lg_dim, depth, heads, dim_head):
    layers = []
    for k in jax.random.split(key, depth):
        k_sm, k_lg = jax.random.split(k)
        layers.append({
            "sm": init_cross_block(k_sm, sm_dim, lg_dim, heads, dim_head),
            "lg": init_cross_block(k_lg, lg_dim, sm_dim, heads, dim_head),
        })
    return {"layers": layers, "heads": heads, "dim_head": dim_head}


def init_multi_scale_encoder(key, *, depth, sm_dim, lg_dim, sm_enc_params,
                             lg_enc_params, cross_attn_heads, cross_attn_depth,
                             cross_attn_dim_head=64):
    layers = []
    for k in jax.random.split(key, depth):
        k_sm, k_lg, k_x = jax.random.split(k, 3)
        layers.append({
            "sm_enc": init_transformer(k_sm, sm_dim, **sm_enc_params),
            "lg_enc": init_transformer(k_lg, lg_dim, **lg_enc_params),
            "cross": init_cross_transformer(
                k_x, sm_dim, lg_dim, cross_attn_depth, cross_attn_heads, cross_attn_dim_head),
        })
    return {"layers": layers}


# ----------------------------- main -----------------------------

if __name__ == "__main__":
    key = jax.random.PRNGKey(0)
    k_params, k_sm, k_lg = jax.random.split(key, 3)

    B = 2
    sm_dim, lg_dim = 32, 64
    sm_n, lg_n = 9, 5                      # 1 CLS token + patch tokens each

    sm_enc_params = dict(depth=1, heads=2, dim_head=16, mlp_dim=64)
    lg_enc_params = dict(depth=1, heads=2, dim_head=16, mlp_dim=64)

    params = init_multi_scale_encoder(
        k_params,
        depth=1,
        sm_dim=sm_dim,
        lg_dim=lg_dim,
        sm_enc_params=sm_enc_params,
        lg_enc_params=lg_enc_params,
        cross_attn_heads=2,
        cross_attn_depth=1,
        cross_attn_dim_head=16,
    )

    sm_tokens = jax.random.normal(k_sm, (B, sm_n, sm_dim), jnp.float32)
    lg_tokens = jax.random.normal(k_lg, (B, lg_n, lg_dim), jnp.float32)

    fwd = jax.jit(lambda s, l: multi_scale_encoder_fwd(params, s, l))
    sm_out, lg_out, sm_attn, lg_attn = fwd(sm_tokens, lg_tokens)
    jax.block_until_ready((sm_out, lg_out, sm_attn, lg_attn))

    assert sm_out.shape == (B, sm_n, sm_dim)
    assert lg_out.shape == (B, lg_n, lg_dim)
    assert sm_attn.shape == (B, 2, 1, 1 + (lg_n - 1))
    assert lg_attn.shape == (B, 2, 1, 1 + (sm_n - 1))
    print("KERNEL_OK")
</pallas_src>

<mosaic_0001>
module attributes {stable_mosaic.version = 11 : i64} {
  func.func @_encoder_layer_kernel(%arg0: i32, %arg1: memref<1x5x64xf32, #tpu.memory_space<vmem>>, %arg2: memref<1x64xf32, #tpu.memory_space<vmem>>, %arg3: memref<1x64xf32, #tpu.memory_space<vmem>>, %arg4: memref<64x96xf32, #tpu.memory_space<vmem>>, %arg5: memref<32x64xf32, #tpu.memory_space<vmem>>, %arg6: memref<1x64xf32, #tpu.memory_space<vmem>>, %arg7: memref<1x64xf32, #tpu.memory_space<vmem>>, %arg8: memref<1x64xf32, #tpu.memory_space<vmem>>, %arg9: memref<64x128xf32, #tpu.memory_space<vmem>>, %arg10: memref<1x128xf32, #tpu.memory_space<vmem>>, %arg11: memref<128x64xf32, #tpu.memory_space<vmem>>, %arg12: memref<1x64xf32, #tpu.memory_space<vmem>>, %arg13: memref<1x64xf32, #tpu.memory_space<vmem>>, %arg14: memref<1x64xf32, #tpu.memory_space<vmem>>, %arg15: memref<1x5x64xf32, #tpu.memory_space<vmem>>) attributes {dimension_semantics = [#tpu.dimension_semantics<parallel>], iteration_bounds = array<i64: 2>, scalar_prefetch = 0 : i64, scratch_operands = 0 : i64, tpu.core_type = #tpu.core_type<tc>, window_params = [{transform_indices = @transform_0, window_bounds = array<i64: 1, 5, 64>}, {pipeline_mode = #tpu.pipeline_mode<synchronous>, transform_indices = @transform_1, window_bounds = array<i64: 1, 64>}, {pipeline_mode = #tpu.pipeline_mode<synchronous>, transform_indices = @transform_2, window_bounds = array<i64: 1, 64>}, {pipeline_mode = #tpu.pipeline_mode<synchronous>, transform_indices = @transform_3, window_bounds = array<i64: 64, 96>}, {pipeline_mode = #tpu.pipeline_mode<synchronous>, transform_indices = @transform_4, window_bounds = array<i64: 32, 64>}, {pipeline_mode = #tpu.pipeline_mode<synchronous>, transform_indices = @transform_5, window_bounds = array<i64: 1, 64>}, {pipeline_mode = #tpu.pipeline_mode<synchronous>, transform_indices = @transform_6, window_bounds = array<i64: 1, 64>}, {pipeline_mode = #tpu.pipeline_mode<synchronous>, transform_indices = @transform_7, window_bounds = array<i64: 1, 64>}, {pipeline_mode = #tpu.pipeline_mode<synchronous>, transform_indices = @transform_8, window_bounds = array<i64: 64, 128>}, {pipeline_mode = #tpu.pipeline_mode<synchronous>, transform_indices = @transform_9, window_bounds = array<i64: 1, 128>}, {pipeline_mode = #tpu.pipeline_mode<synchronous>, transform_indices = @transform_10, window_bounds = array<i64: 128, 64>}, {pipeline_mode = #tpu.pipeline_mode<synchronous>, transform_indices = @transform_11, window_bounds = array<i64: 1, 64>}, {pipeline_mode = #tpu.pipeline_mode<synchronous>, transform_indices = @transform_12, window_bounds = array<i64: 1, 64>}, {pipeline_mode = #tpu.pipeline_mode<synchronous>, transform_indices = @transform_13, window_bounds = array<i64: 1, 64>}, {transform_indices = @transform_14, window_bounds = array<i64: 1, 5, 64>}]} {
    %c0 = arith.constant 0 : index
    %c0_0 = arith.constant 0 : index
    %c0_1 = arith.constant 0 : index
    %0 = vector.load %arg1[%c0, %c0_0, %c0_1] : memref<1x5x64xf32, #tpu.memory_space<vmem>>, vector<1x5x64xf32>
    %1 = vector.shape_cast %0 : vector<1x5x64xf32> to vector<5x64xf32>
    %c0_2 = arith.constant 0 : index
    %c0_3 = arith.constant 0 : index
    %2 = vector.load %arg2[%c0_2, %c0_3] : memref<1x64xf32, #tpu.memory_space<vmem>>, vector<1x64xf32>
    %c0_4 = arith.constant 0 : index
    %c0_5 = arith.constant 0 : index
    %3 = vector.load %arg3[%c0_4, %c0_5] : memref<1x64xf32, #tpu.memory_space<vmem>>, vector<1x64xf32>
    %cst = arith.constant dense<0.000000e+00> : vector<5xf32>
    %4 = vector.multi_reduction <add>, %1, %cst [1] : vector<5x64xf32> to vector<5xf32>
    %5 = vector.shape_cast %4 : vector<5xf32> to vector<5x1xf32>
    %cst_6 = arith.constant 6.400000e+01 : f32
    %6 = vector.broadcast %cst_6 : f32 to vector<5x1xf32>
    %7 = arith.divf %5, %6 : vector<5x1xf32>
    %8 = vector.broadcast %7 : vector<5x1xf32> to vector<5x64xf32>
    %9 = arith.subf %1, %8 : vector<5x64xf32>
    %10 = arith.mulf %9, %9 : vector<5x64xf32>
    %cst_7 = arith.constant dense<0.000000e+00> : vector<5xf32>
    %11 = vector.multi_reduction <add>, %10, %cst_7 [1] : vector<5x64xf32> to vector<5xf32>
    %12 = vector.shape_cast %11 : vector<5xf32> to vector<5x1xf32>
    %cst_8 = arith.constant 6.400000e+01 : f32
    %13 = vector.broadcast %cst_8 : f32 to vector<5x1xf32>
    %14 = arith.divf %12, %13 : vector<5x1xf32>
    %cst_9 = arith.constant 9.99999974E-6 : f32
    %15 = vector.broadcast %cst_9 : f32 to vector<5x1xf32>
    %16 = arith.addf %14, %15 : vector<5x1xf32>
    %17 = math.rsqrt %16 : vector<5x1xf32>
    %18 = vector.broadcast %17 : vector<5x1xf32> to vector<5x64xf32>
    %19 = arith.mulf %9, %18 : vector<5x64xf32>
    %20 = vector.broadcast %2 : vector<1x64xf32> to vector<5x64xf32>
    %21 = arith.mulf %19, %20 : vector<5x64xf32>
    %22 = vector.broadcast %3 : vector<1x64xf32> to vector<5x64xf32>
    %23 = arith.addf %21, %22 : vector<5x64xf32>
    %c0_10 = arith.constant 0 : index
    %c0_11 = arith.constant 0 : index
    %24 = vector.load %arg4[%c0_10, %c0_11] : memref<64x96xf32, #tpu.memory_space<vmem>>, vector<64x96xf32>
    %cst_12 = arith.constant dense<0.000000e+00> : vector<5x96xf32>
    %25 = tpu.matmul %23, %24, %cst_12 {dimension_numbers = #tpu.dot_dimension_numbers<[1], [0], [0], [1], [0, 0, 1, 1], [], []>} : vector<5x64xf32>, vector<64x96xf32>, vector<5x96xf32> -> vector<5x96xf32>
    %26 = vector.extract_strided_slice %25 {offsets = [0, 0], sizes = [5, 16], strides = [1, 1]} : vector<5x96xf32> to vector<5x16xf32>
    %cst_13 = arith.constant 2.500000e-01 : f32
    %27 = vector.broadcast %cst_13 : f32 to vector<5x16xf32>
    %28 = arith.mulf %26, %27 : vector<5x16xf32>
    %29 = vector.extract_strided_slice %25 {offsets = [0, 32], sizes = [5, 16], strides = [1, 1]} : vector<5x96xf32> to vector<5x16xf32>
    %30 = vector.extract_strided_slice %25 {offsets = [0, 64], sizes = [5, 16], strides = [1, 1]} : vector<5x96xf32> to vector<5x16xf32>
    %cst_14 = arith.constant dense<0.000000e+00> : vector<5x5xf32>
    %31 = tpu.matmul %28, %29, %cst_14 {dimension_numbers = #tpu.dot_dimension_numbers<[1], [1], [0], [0], [0, 0, 1, 0], [], []>} : vector<5x16xf32>, vector<5x16xf32>, vector<5x5xf32> -> vector<5x5xf32>
    %cst_15 = arith.constant dense<0xFF800000> : vector<5xf32>
    %32 = vector.multi_reduction <maximumf>, %31, %cst_15 [1] : vector<5x5xf32> to vector<5xf32>
    %33 = vector.shape_cast %32 : vector<5xf32> to vector<5x1xf32>
    %34 = vector.broadcast %33 : vector<5x1xf32> to vector<5x5xf32>
    %35 = arith.subf %31, %34 : vector<5x5xf32>
    %36 = math.exp %35 : vector<5x5xf32>
    %cst_16 = arith.constant dense<0.000000e+00> : vector<5xf32>
    %37 = vector.multi_reduction <add>, %36, %cst_16 [1] : vector<5x5xf32> to vector<5xf32>
    %38 = vector.shape_cast %37 : vector<5xf32> to vector<5x1xf32>
    %39 = tpu.reciprocal %38 {approx = true} : vector<5x1xf32> -> vector<5x1xf32>
    %40 = vector.broadcast %39 : vector<5x1xf32> to vector<5x5xf32>
    %41 = arith.mulf %36, %40 : vector<5x5xf32>
    %cst_17 = arith.constant dense<0.000000e+00> : vector<5x16xf32>
    %42 = tpu.matmul %41, %30, %cst_17 {dimension_numbers = #tpu.dot_dimension_numbers<[1], [0], [0], [1], [0, 0, 1, 1], [], []>} : vector<5x5xf32>, vector<5x16xf32>, vector<5x16xf32> -> vector<5x16xf32>
    %43 = vector.extract_strided_slice %25 {offsets = [0, 16], sizes = [5, 16], strides = [1, 1]} : vector<5x96xf32> to vector<5x16xf32>
    %cst_18 = arith.constant 2.500000e-01 : f32
    %44 = vector.broadcast %cst_18 : f32 to vector<5x16xf32>
    %45 = arith.mulf %43, %44 : vector<5x16xf32>
    %46 = vector.extract_strided_slice %25 {offsets = [0, 48], sizes = [5, 16], strides = [1, 1]} : vector<5x96xf32> to vector<5x16xf32>
    %47 = vector.extract_strided_slice %25 {offsets = [0, 80], sizes = [5, 16], strides = [1, 1]} : vector<5x96xf32> to vector<5x16xf32>
    %cst_19 = arith.constant dense<0.000000e+00> : vector<5x5xf32>
    %48 = tpu.matmul %45, %46, %cst_19 {dimension_numbers = #tpu.dot_dimension_numbers<[1], [1], [0], [0], [0, 0, 1, 0], [], []>} : vector<5x16xf32>, vector<5x16xf32>, vector<5x5xf32> -> vector<5x5xf32>
    %cst_20 = arith.constant dense<0xFF800000> : vector<5xf32>
    %49 = vector.multi_reduction <maximumf>, %48, %cst_20 [1] : vector<5x5xf32> to vector<5xf32>
    %50 = vector.shape_cast %49 : vector<5xf32> to vector<5x1xf32>
    %51 = vector.broadcast %50 : vector<5x1xf32> to vector<5x5xf32>
    %52 = arith.subf %48, %51 : vector<5x5xf32>
    %53 = math.exp %52 : vector<5x5xf32>
    %cst_21 = arith.constant dense<0.000000e+00> : vector<5xf32>
    %54 = vector.multi_reduction <add>, %53, %cst_21 [1] : vector<5x5xf32> to vector<5xf32>
    %55 = vector.shape_cast %54 : vector<5xf32> to vector<5x1xf32>
    %56 = tpu.reciprocal %55 {approx = true} : vector<5x1xf32> -> vector<5x1xf32>
    %57 = vector.broadcast %56 : vector<5x1xf32> to vector<5x5xf32>
    %58 = arith.mulf %53, %57 : vector<5x5xf32>
    %cst_22 = arith.constant dense<0.000000e+00> : vector<5x16xf32>
    %59 = tpu.matmul %58, %47, %cst_22 {dimension_numbers = #tpu.dot_dimension_numbers<[1], [0], [0], [1], [0, 0, 1, 1], [], []>} : vector<5x5xf32>, vector<5x16xf32>, vector<5x16xf32> -> vector<5x16xf32>
    %60 = tpu.concatenate %42, %59 in 1 : vector<5x16xf32>, vector<5x16xf32> -> vector<5x32xf32>
    %c0_23 = arith.constant 0 : index
    %c0_24 = arith.constant 0 : index
    %61 = vector.load %arg5[%c0_23, %c0_24] : memref<32x64xf32, #tpu.memory_space<vmem>>, vector<32x64xf32>
    %cst_25 = arith.constant dense<0.000000e+00> : vector<5x64xf32>
    %62 = tpu.matmul %60, %61, %cst_25 {dimension_numbers = #tpu.dot_dimension_numbers<[1], [0], [0], [1], [0, 0, 1, 1], [], []>} : vector<5x32xf32>, vector<32x64xf32>, vector<5x64xf32> -> vector<5x64xf32>
    %63 = arith.addf %1, %62 : vector<5x64xf32>
    %c0_26 = arith.constant 0 : index
    %c0_27 = arith.constant 0 : index
    %64 = vector.load %arg6[%c0_26, %c0_27] : memref<1x64xf32, #tpu.memory_space<vmem>>, vector<1x64xf32>
    %65 = vector.broadcast %64 : vector<1x64xf32> to vector<5x64xf32>
    %66 = arith.addf %63, %65 : vector<5x64xf32>
    %c0_28 = arith.constant 0 : index
    %c0_29 = arith.constant 0 : index
    %67 = vector.load %arg7[%c0_28, %c0_29] : memref<1x64xf32, #tpu.memory_space<vmem>>, vector<1x64xf32>
    %c0_30 = arith.constant 0 : index
    %c0_31 = arith.constant 0 : index
    %68 = vector.load %arg8[%c0_30, %c0_31] : memref<1x64xf32, #tpu.memory_space<vmem>>, vector<1x64xf32>
    %cst_32 = arith.constant dense<0.000000e+00> : vector<5xf32>
    %69 = vector.multi_reduction <add>, %66, %cst_32 [1] : vector<5x64xf32> to vector<5xf32>
    %70 = vector.shape_cast %69 : vector<5xf32> to vector<5x1xf32>
    %cst_33 = arith.constant 6.400000e+01 : f32
    %71 = vector.broadcast %cst_33 : f32 to vector<5x1xf32>
    %72 = arith.divf %70, %71 : vector<5x1xf32>
    %73 = vector.broadcast %72 : vector<5x1xf32> to vector<5x64xf32>
    %74 = arith.subf %66, %73 : vector<5x64xf32>
    %75 = arith.mulf %74, %74 : vector<5x64xf32>
    %cst_34 = arith.constant dense<0.000000e+00> : vector<5xf32>
    %76 = vector.multi_reduction <add>, %75, %cst_34 [1] : vector<5x64xf32> to vector<5xf32>
    %77 = vector.shape_cast %76 : vector<5xf32> to vector<5x1xf32>
    %cst_35 = arith.constant 6.400000e+01 : f32
    %78 = vector.broadcast %cst_35 : f32 to vector<5x1xf32>
    %79 = arith.divf %77, %78 : vector<5x1xf32>
    %cst_36 = arith.constant 9.99999974E-6 : f32
    %80 = vector.broadcast %cst_36 : f32 to vector<5x1xf32>
    %81 = arith.addf %79, %80 : vector<5x1xf32>
    %82 = math.rsqrt %81 : vector<5x1xf32>
    %83 = vector.broadcast %82 : vector<5x1xf32> to vector<5x64xf32>
    %84 = arith.mulf %74, %83 : vector<5x64xf32>
    %85 = vector.broadcast %67 : vector<1x64xf32> to vector<5x64xf32>
    %86 = arith.mulf %84, %85 : vector<5x64xf32>
    %87 = vector.broadcast %68 : vector<1x64xf32> to vector<5x64xf32>
    %88 = arith.addf %86, %87 : vector<5x64xf32>
    %c0_37 = arith.constant 0 : index
    %c0_38 = arith.constant 0 : index
    %89 = vector.load %arg9[%c0_37, %c0_38] : memref<64x128xf32, #tpu.memory_space<vmem>>, vector<64x128xf32>
    %cst_39 = arith.constant dense<0.000000e+00> : vector<5x128xf32>
    %90 = tpu.matmul %88, %89, %cst_39 {dimension_numbers = #tpu.dot_dimension_numbers<[1], [0], [0], [1], [0, 0, 1, 1], [], []>} : vector<5x64xf32>, vector<64x128xf32>, vector<5x128xf32> -> vector<5x128xf32>
    %c0_40 = arith.constant 0 : index
    %c0_41 = arith.constant 0 : index
    %91 = vector.load %arg10[%c0_40, %c0_41] : memref<1x128xf32, #tpu.memory_space<vmem>>, vector<1x128xf32>
    %92 = vector.broadcast %91 : vector<1x128xf32> to vector<5x128xf32>
    %93 = arith.addf %90, %92 : vector<5x128xf32>
    %cst_42 = arith.constant 5.000000e-01 : f32
    %94 = vector.broadcast %cst_42 : f32 to vector<5x128xf32>
    %95 = arith.mulf %94, %93 : vector<5x128xf32>
    %cst_43 = arith.constant 0.707106769 : f32
    %96 = vector.broadcast %cst_43 : f32 to vector<5x128xf32>
    %97 = arith.mulf %93, %96 : vector<5x128xf32>
    %98 = math.absf %97 : vector<5x128xf32>
    %cst_44 = arith.constant 0.327591091 : f32
    %99 = vector.broadcast %cst_44 : f32 to vector<5x128xf32>
    %100 = arith.mulf %99, %98 : vector<5x128xf32>
    %cst_45 = arith.constant 1.000000e+00 : f32
    %101 = vector.broadcast %cst_45 : f32 to vector<5x128xf32>
    %102 = arith.addf %101, %100 : vector<5x128xf32>
    %cst_46 = arith.constant 1.000000e+00 : f32
    %103 = vector.broadcast %cst_46 : f32 to vector<5x128xf32>
    %104 = arith.divf %103, %102 : vector<5x128xf32>
    %cst_47 = arith.constant 1.06140542 : f32
    %105 = vector.broadcast %cst_47 : f32 to vector<5x128xf32>
    %106 = arith.mulf %105, %104 : vector<5x128xf32>
    %cst_48 = arith.constant -1.45315206 : f32
    %107 = vector.broadcast %cst_48 : f32 to vector<5x128xf32>
    %108 = arith.addf %106, %107 : vector<5x128xf32>
    %109 = arith.mulf %108, %104 : vector<5x128xf32>
    %cst_49 = arith.constant 1.42141378 : f32
    %110 = vector.broadcast %cst_49 : f32 to vector<5x128xf32>
    %111 = arith.addf %109, %110 : vector<5x128xf32>
    %112 = arith.mulf %111, %104 : vector<5x128xf32>
    %cst_50 = arith.constant -0.284496725 : f32
    %113 = vector.broadcast %cst_50 : f32 to vector<5x128xf32>
    %114 = arith.addf %112, %113 : vector<5x128xf32>
    %115 = arith.mulf %114, %104 : vector<5x128xf32>
    %cst_51 = arith.constant 0.254829586 : f32
    %116 = vector.broadcast %cst_51 : f32 to vector<5x128xf32>
    %117 = arith.addf %115, %116 : vector<5x128xf32>
    %118 = arith.mulf %117, %104 : vector<5x128xf32>
    %cst_52 = arith.constant 0.000000e+00 : f32
    %119 = vector.broadcast %cst_52 : f32 to vector<5x128xf32>
    %120 = arith.subf %119, %98 : vector<5x128xf32>
    %121 = arith.mulf %120, %98 : vector<5x128xf32>
    %122 = math.exp %121 : vector<5x128xf32>
    %123 = arith.mulf %118, %122 : vector<5x128xf32>
    %cst_53 = arith.constant 1.000000e+00 : f32
    %124 = vector.broadcast %cst_53 : f32 to vector<5x128xf32>
    %125 = arith.subf %124, %123 : vector<5x128xf32>
    %cst_54 = arith.constant 0.000000e+00 : f32
    %126 = vector.broadcast %cst_54 : f32 to vector<5x128xf32>
    %127 = arith.cmpf oge, %97, %126 : vector<5x128xf32>
    %cst_55 = arith.constant 0.000000e+00 : f32
    %128 = vector.broadcast %cst_55 : f32 to vector<5x128xf32>
    %129 = arith.subf %128, %125 : vector<5x128xf32>
    %130 = arith.select %127, %125, %129 : vector<5x128xi1>, vector<5x128xf32>
    %cst_56 = arith.constant 1.000000e+00 : f32
    %131 = vector.broadcast %cst_56 : f32 to vector<5x128xf32>
    %132 = arith.addf %131, %130 : vector<5x128xf32>
    %133 = arith.mulf %95, %132 : vector<5x128xf32>
    %c0_57 = arith.constant 0 : index
    %c0_58 = arith.constant 0 : index
    %134 = vector.load %arg11[%c0_57, %c0_58] : memref<128x64xf32, #tpu.memory_space<vmem>>, vector<128x64xf32>
    %cst_59 = arith.constant dense<0.000000e+00> : vector<5x64xf32>
    %135 = tpu.matmul %133, %134, %cst_59 {dimension_numbers = #tpu.dot_dimension_numbers<[1], [0], [0], [1], [0, 0, 1, 1], [], []>} : vector<5x128xf32>, vector<128x64xf32>, vector<5x64xf32> -> vector<5x64xf32>
    %136 = arith.addf %66, %135 : vector<5x64xf32>
    %c0_60 = arith.constant 0 : index
    %c0_61 = arith.constant 0 : index
    %137 = vector.load %arg12[%c0_60, %c0_61] : memref<1x64xf32, #tpu.memory_space<vmem>>, vector<1x64xf32>
    %138 = vector.broadcast %137 : vector<1x64xf32> to vector<5x64xf32>
    %139 = arith.addf %136, %138 : vector<5x64xf32>
    %c0_62 = arith.constant 0 : index
    %c0_63 = arith.constant 0 : index
    %140 = vector.load %arg13[%c0_62, %c0_63] : memref<1x64xf32, #tpu.memory_space<vmem>>, vector<1x64xf32>
    %c0_64 = arith.constant 0 : index
    %c0_65 = arith.constant 0 : index
    %141 = vector.load %arg14[%c0_64, %c0_65] : memref<1x64xf32, #tpu.memory_space<vmem>>, vector<1x64xf32>
    %cst_66 = arith.constant dense<0.000000e+00> : vector<5xf32>
    %142 = vector.multi_reduction <add>, %139, %cst_66 [1] : vector<5x64xf32> to vector<5xf32>
    %143 = vector.shape_cast %142 : vector<5xf32> to vector<5x1xf32>
    %cst_67 = arith.constant 6.400000e+01 : f32
    %144 = vector.broadcast %cst_67 : f32 to vector<5x1xf32>
    %145 = arith.divf %143, %144 : vector<5x1xf32>
    %146 = vector.broadcast %145 : vector<5x1xf32> to vector<5x64xf32>
    %147 = arith.subf %139, %146 : vector<5x64xf32>
    %148 = arith.mulf %147, %147 : vector<5x64xf32>
    %cst_68 = arith.constant dense<0.000000e+00> : vector<5xf32>
    %149 = vector.multi_reduction <add>, %148, %cst_68 [1] : vector<5x64xf32> to vector<5xf32>
    %150 = vector.shape_cast %149 : vector<5xf32> to vector<5x1xf32>
    %cst_69 = arith.constant 6.400000e+01 : f32
    %151 = vector.broadcast %cst_69 : f32 to vector<5x1xf32>
    %152 = arith.divf %150, %151 : vector<5x1xf32>
    %cst_70 = arith.constant 9.99999974E-6 : f32
    %153 = vector.broadcast %cst_70 : f32 to vector<5x1xf32>
    %154 = arith.addf %152, %153 : vector<5x1xf32>
    %155 = math.rsqrt %154 : vector<5x1xf32>
    %156 = vector.broadcast %155 : vector<5x1xf32> to vector<5x64xf32>
    %157 = arith.mulf %147, %156 : vector<5x64xf32>
    %158 = vector.broadcast %140 : vector<1x64xf32> to vector<5x64xf32>
    %159 = arith.mulf %157, %158 : vector<5x64xf32>
    %160 = vector.broadcast %141 : vector<1x64xf32> to vector<5x64xf32>
    %161 = arith.addf %159, %160 : vector<5x64xf32>
    %c0_71 = arith.constant 0 : index
    %c0_72 = arith.constant 0 : index
    %c0_73 = arith.constant 0 : index
    %162 = vector.load %arg15[%c0_71, %c0_72, %c0_73] : memref<1x5x64xf32, #tpu.memory_space<vmem>>, vector<1x5x64xf32>
    %163 = vector.shape_cast %162 : vector<1x5x64xf32> to vector<5x64xf32>
    %164 = vector.shape_cast %161 : vector<5x64xf32> to vector<1x5x64xf32>
    tpu.vector_store %arg15[%c0_71, %c0_72, %c0_73], %164 {strides = array<i32>} : memref<1x5x64xf32, #tpu.memory_space<vmem>>, vector<1x5x64xf32>,
    return
  }
  func.func @transform_0(%arg0: i32) -> (i32, i32, i32) {
    %c0_i32 = arith.constant 0 : i32
    %c0_i32_0 = arith.constant 0 : i32
    %c0_i32_1 = arith.constant 0 : i32
    return %arg0, %c0_i32, %c0_i32_0 : i32, i32, i32
  }
  func.func @transform_1(%arg0: i32) -> (i32, i32) {
    %c0_i32 = arith.constant 0 : i32
    %c0_i32_0 = arith.constant 0 : i32
    %c0_i32_1 = arith.constant 0 : i32
    return %c0_i32, %c0_i32_0 : i32, i32
  }
  func.func @transform_2(%arg0: i32) -> (i32, i32) {
    %c0_i32 = arith.constant 0 : i32
    %c0_i32_0 = arith.constant 0 : i32
    %c0_i32_1 = arith.constant 0 : i32
    return %c0_i32, %c0_i32_0 : i32, i32
  }
  func.func @transform_3(%arg0: i32) -> (i32, i32) {
    %c0_i32 = arith.constant 0 : i32
    %c0_i32_0 = arith.constant 0 : i32
    %c0_i32_1 = arith.constant 0 : i32
    return %c0_i32, %c0_i32_0 : i32, i32
  }
  func.func @transform_4(%arg0: i32) -> (i32, i32) {
    %c0_i32 = arith.constant 0 : i32
    %c0_i32_0 = arith.constant 0 : i32
    %c0_i32_1 = arith.constant 0 : i32
    return %c0_i32, %c0_i32_0 : i32, i32
  }
  func.func @transform_5(%arg0: i32) -> (i32, i32) {
    %c0_i32 = arith.constant 0 : i32
    %c0_i32_0 = arith.constant 0 : i32
    %c0_i32_1 = arith.constant 0 : i32
    return %c0_i32, %c0_i32_0 : i32, i32
  }
  func.func @transform_6(%arg0: i32) -> (i32, i32) {
    %c0_i32 = arith.constant 0 : i32
    %c0_i32_0 = arith.constant 0 : i32
    %c0_i32_1 = arith.constant 0 : i32
    return %c0_i32, %c0_i32_0 : i32, i32
  }
  func.func @transform_7(%arg0: i32) -> (i32, i32) {
    %c0_i32 = arith.constant 0 : i32
    %c0_i32_0 = arith.constant 0 : i32
    %c0_i32_1 = arith.constant 0 : i32
    return %c0_i32, %c0_i32_0 : i32, i32
  }
  func.func @transform_8(%arg0: i32) -> (i32, i32) {
    %c0_i32 = arith.constant 0 : i32
    %c0_i32_0 = arith.constant 0 : i32
    %c0_i32_1 = arith.constant 0 : i32
    return %c0_i32, %c0_i32_0 : i32, i32
  }
  func.func @transform_9(%arg0: i32) -> (i32, i32) {
    %c0_i32 = arith.constant 0 : i32
    %c0_i32_0 = arith.constant 0 : i32
    %c0_i32_1 = arith.constant 0 : i32
    return %c0_i32, %c0_i32_0 : i32, i32
  }
  func.func @transform_10(%arg0: i32) -> (i32, i32) {
    %c0_i32 = arith.constant 0 : i32
    %c0_i32_0 = arith.constant 0 : i32
    %c0_i32_1 = arith.constant 0 : i32
    return %c0_i32, %c0_i32_0 : i32, i32
  }
  func.func @transform_11(%arg0: i32) -> (i32, i32) {
    %c0_i32 = arith.constant 0 : i32
    %c0_i32_0 = arith.constant 0 : i32
    %c0_i32_1 = arith.constant 0 : i32
    return %c0_i32, %c0_i32_0 : i32, i32
  }
  func.func @transform_12(%arg0: i32) -> (i32, i32) {
    %c0_i32 = arith.constant 0 : i32
    %c0_i32_0 = arith.constant 0 : i32
    %c0_i32_1 = arith.constant 0 : i32
    return %c0_i32, %c0_i32_0 : i32, i32
  }
  func.func @transform_13(%arg0: i32) -> (i32, i32) {
    %c0_i32 = arith.constant 0 : i32
    %c0_i32_0 = arith.constant 0 : i32
    %c0_i32_1 = arith.constant 0 : i32
    return %c0_i32, %c0_i32_0 : i32, i32
  }
  func.func @transform_14(%arg0: i32) -> (i32, i32, i32) {
    %c0_i32 = arith.constant 0 : i32
    %c0_i32_0 = arith.constant 0 : i32
    %c0_i32_1 = arith.constant 0 : i32
    return %arg0, %c0_i32, %c0_i32_0 : i32, i32, i32
  }
}

module attributes {stable_mosaic.version = 11 : i64} {
  func.func @_cross_attn_block_kernel(%arg0: i32, %arg1: memref<1x1x64xf32, #tpu.memory_space<vmem>>, %arg2: memref<1x8x32xf32, #tpu.memory_space<vmem>>, %arg3: memref<64x32xf32, #tpu.memory_space<vmem>>, %arg4: memref<1x32xf32, #tpu.memory_space<vmem>>, %arg5: memref<1x32xf32, #tpu.memory_space<vmem>>, %arg6: memref<1x32xf32, #tpu.memory_space<vmem>>, %arg7: memref<32x32xf32, #tpu.memory_space<vmem>>, %arg8: memref<32x64xf32, #tpu.memory_space<vmem>>, %arg9: memref<32x32xf32, #tpu.memory_space<vmem>>, %arg10: memref<1x32xf32, #tpu.memory_space<vmem>>, %arg11: memref<32x64xf32, #tpu.memory_space<vmem>>, %arg12: memref<1x64xf32, #tpu.memory_space<vmem>>, %arg13: memref<1x1x64xf32, #tpu.memory_space<vmem>>, %arg14: memref<1x2x1x9xf32, #tpu.memory_space<vmem>>) attributes {dimension_semantics = [#tpu.dimension_semantics<parallel>], iteration_bounds = array<i64: 2>, scalar_prefetch = 0 : i64, scratch_operands = 0 : i64, tpu.core_type = #tpu.core_type<tc>, window_params = [{transform_indices = @transform_0, window_bounds = array<i64: 1, 1, 64>}, {transform_indices = @transform_1, window_bounds = array<i64: 1, 8, 32>}, {pipeline_mode = #tpu.pipeline_mode<synchronous>, transform_indices = @transform_2, window_bounds = array<i64: 64, 32>}, {pipeline_mode = #tpu.pipeline_mode<synchronous>, transform_indices = @transform_3, window_bounds = array<i64: 1, 32>}, {pipeline_mode = #tpu.pipeline_mode<synchronous>, transform_indices = @transform_4, window_bounds = array<i64: 1, 32>}, {pipeline_mode = #tpu.pipeline_mode<synchronous>, transform_indices = @transform_5, window_bounds = array<i64: 1, 32>}, {pipeline_mode = #tpu.pipeline_mode<synchronous>, transform_indices = @transform_6, window_bounds = array<i64: 32, 32>}, {pipeline_mode = #tpu.pipeline_mode<synchronous>, transform_indices = @transform_7, window_bounds = array<i64: 32, 64>}, {pipeline_mode = #tpu.pipeline_mode<synchronous>, transform_indices = @transform_8, window_bounds = array<i64: 32, 32>}, {pipeline_mode = #tpu.pipeline_mode<synchronous>, transform_indices = @transform_9, window_bounds = array<i64: 1, 32>}, {pipeline_mode = #tpu.pipeline_mode<synchronous>, transform_indices = @transform_10, window_bounds = array<i64: 32, 64>}, {pipeline_mode = #tpu.pipeline_mode<synchronous>, transform_indices = @transform_11, window_bounds = array<i64: 1, 64>}, {transform_indices = @transform_12, window_bounds = array<i64: 1, 1, 64>}, {transform_indices = @transform_13, window_bounds = array<i64: 1, 2, 1, 9>}]} {
    %c0 = arith.constant 0 : index
    %c0_0 = arith.constant 0 : index
    %c0_1 = arith.constant 0 : index
    %0 = vector.load %arg1[%c0, %c0_0, %c0_1] : memref<1x1x64xf32, #tpu.memory_space<vmem>>, vector<1x1x64xf32>
    %1 = vector.shape_cast %0 : vector<1x1x64xf32> to vector<1x64xf32>
    %c0_2 = arith.constant 0 : index
    %c0_3 = arith.constant 0 : index
    %c0_4 = arith.constant 0 : index
    %2 = vector.load %arg2[%c0_2, %c0_3, %c0_4] : memref<1x8x32xf32, #tpu.memory_space<vmem>>, vector<1x8x32xf32>
    %3 = vector.shape_cast %2 : vector<1x8x32xf32> to vector<8x32xf32>
    %c0_5 = arith.constant 0 : index
    %c0_6 = arith.constant 0 : index
    %4 = vector.load %arg3[%c0_5, %c0_6] : memref<64x32xf32, #tpu.memory_space<vmem>>, vector<64x32xf32>
    %cst = arith.constant dense<0.000000e+00> : vector<1x32xf32>
    %5 = tpu.matmul %1, %4, %cst {dimension_numbers = #tpu.dot_dimension_numbers<[1], [0], [0], [1], [0, 0, 1, 1], [], []>} : vector<1x64xf32>, vector<64x32xf32>, vector<1x32xf32> -> vector<1x32xf32>
    %c0_7 = arith.constant 0 : index
    %c0_8 = arith.constant 0 : index
    %6 = vector.load %arg4[%c0_7, %c0_8] : memref<1x32xf32, #tpu.memory_space<vmem>>, vector<1x32xf32>
    %7 = arith.addf %5, %6 : vector<1x32xf32>
    %c0_9 = arith.constant 0 : index
    %c0_10 = arith.constant 0 : index
    %8 = vector.load %arg5[%c0_9, %c0_10] : memref<1x32xf32, #tpu.memory_space<vmem>>, vector<1x32xf32>
    %c0_11 = arith.constant 0 : index
    %c0_12 = arith.constant 0 : index
    %9 = vector.load %arg6[%c0_11, %c0_12] : memref<1x32xf32, #tpu.memory_space<vmem>>, vector<1x32xf32>
    %cst_13 = arith.constant dense<0.000000e+00> : vector<1xf32>
    %10 = vector.multi_reduction <add>, %7, %cst_13 [1] : vector<1x32xf32> to vector<1xf32>
    %11 = vector.shape_cast %10 : vector<1xf32> to vector<1x1xf32>
    %cst_14 = arith.constant 3.200000e+01 : f32
    %12 = vector.broadcast %cst_14 : f32 to vector<1x1xf32>
    %13 = arith.divf %11, %12 : vector<1x1xf32>
    %14 = vector.broadcast %13 : vector<1x1xf32> to vector<1x32xf32>
    %15 = arith.subf %7, %14 : vector<1x32xf32>
    %16 = arith.mulf %15, %15 : vector<1x32xf32>
    %cst_15 = arith.constant dense<0.000000e+00> : vector<1xf32>
    %17 = vector.multi_reduction <add>, %16, %cst_15 [1] : vector<1x32xf32> to vector<1xf32>
    %18 = vector.shape_cast %17 : vector<1xf32> to vector<1x1xf32>
    %cst_16 = arith.constant 3.200000e+01 : f32
    %19 = vector.broadcast %cst_16 : f32 to vector<1x1xf32>
    %20 = arith.divf %18, %19 : vector<1x1xf32>
    %cst_17 = arith.constant 9.99999974E-6 : f32
    %21 = vector.broadcast %cst_17 : f32 to vector<1x1xf32>
    %22 = arith.addf %20, %21 : vector<1x1xf32>
    %23 = math.rsqrt %22 : vector<1x1xf32>
    %24 = vector.broadcast %23 : vector<1x1xf32> to vector<1x32xf32>
    %25 = arith.mulf %15, %24 : vector<1x32xf32>
    %26 = arith.mulf %25, %8 : vector<1x32xf32>
    %27 = arith.addf %26, %9 : vector<1x32xf32>
    %28 = tpu.concatenate %27, %3 in 0 : vector<1x32xf32>, vector<8x32xf32> -> vector<9x32xf32>
    %c0_18 = arith.constant 0 : index
    %c0_19 = arith.constant 0 : index
    %29 = vector.load %arg7[%c0_18, %c0_19] : memref<32x32xf32, #tpu.memory_space<vmem>>, vector<32x32xf32>
    %cst_20 = arith.constant dense<0.000000e+00> : vector<1x32xf32>
    %30 = tpu.matmul %27, %29, %cst_20 {dimension_numbers = #tpu.dot_dimension_numbers<[1], [0], [0], [1], [0, 0, 1, 1], [], []>} : vector<1x32xf32>, vector<32x32xf32>, vector<1x32xf32> -> vector<1x32xf32>
    %cst_21 = arith.constant 2.500000e-01 : f32
    %31 = vector.broadcast %cst_21 : f32 to vector<1x32xf32>
    %32 = arith.mulf %30, %31 : vector<1x32xf32>
    %c0_22 = arith.constant 0 : index
    %c0_23 = arith.constant 0 : index
    %33 = vector.load %arg8[%c0_22, %c0_23] : memref<32x64xf32, #tpu.memory_space<vmem>>, vector<32x64xf32>
    %cst_24 = arith.constant dense<0.000000e+00> : vector<9x64xf32>
    %34 = tpu.matmul %28, %33, %cst_24 {dimension_numbers = #tpu.dot_dimension_numbers<[1], [0], [0], [1], [0, 0, 1, 1], [], []>} : vector<9x32xf32>, vector<32x64xf32>, vector<9x64xf32> -> vector<9x64xf32>
    %35 = vector.extract_strided_slice %32 {offsets = [0, 0], sizes = [1, 16], strides = [1, 1]} : vector<1x32xf32> to vector<1x16xf32>
    %36 = vector.extract_strided_slice %34 {offsets = [0, 0], sizes = [9, 16], strides = [1, 1]} : vector<9x64xf32> to vector<9x16xf32>
    %37 = vector.extract_strided_slice %34 {offsets = [0, 32], sizes = [9, 16], strides = [1, 1]} : vector<9x64xf32> to vector<9x16xf32>
    %cst_25 = arith.constant dense<0.000000e+00> : vector<1x9xf32>
    %38 = tpu.matmul %35, %36, %cst_25 {dimension_numbers = #tpu.dot_dimension_numbers<[1], [1], [0], [0], [0, 0, 1, 0], [], []>} : vector<1x16xf32>, vector<9x16xf32>, vector<1x9xf32> -> vector<1x9xf32>
    %cst_26 = arith.constant dense<0xFF800000> : vector<1xf32>
    %39 = vector.multi_reduction <maximumf>, %38, %cst_26 [1] : vector<1x9xf32> to vector<1xf32>
    %40 = vector.shape_cast %39 : vector<1xf32> to vector<1x1xf32>
    %41 = vector.broadcast %40 : vector<1x1xf32> to vector<1x9xf32>
    %42 = arith.subf %38, %41 : vector<1x9xf32>
    %43 = math.exp %42 : vector<1x9xf32>
    %cst_27 = arith.constant dense<0.000000e+00> : vector<1xf32>
    %44 = vector.multi_reduction <add>, %43, %cst_27 [1] : vector<1x9xf32> to vector<1xf32>
    %45 = vector.shape_cast %44 : vector<1xf32> to vector<1x1xf32>
    %46 = tpu.reciprocal %45 {approx = true} : vector<1x1xf32> -> vector<1x1xf32>
    %47 = vector.broadcast %46 : vector<1x1xf32> to vector<1x9xf32>
    %48 = arith.mulf %43, %47 : vector<1x9xf32>
    %c0_28 = arith.constant 0 : index
    %c0_29 = arith.constant 0 : index
    %c0_30 = arith.constant 0 : index
    %c0_31 = arith.constant 0 : index
    %49 = vector.load %arg14[%c0_28, %c0_29, %c0_30, %c0_31] : memref<1x2x1x9xf32, #tpu.memory_space<vmem>>, vector<1x1x1x9xf32>
    %50 = vector.shape_cast %49 : vector<1x1x1x9xf32> to vector<1x9xf32>
    %51 = vector.shape_cast %48 : vector<1x9xf32> to vector<1x1x1x9xf32>
    tpu.vector_store %arg14[%c0_28, %c0_29, %c0_30, %c0_31], %51 {strides = array<i32>} : memref<1x2x1x9xf32, #tpu.memory_space<vmem>>, vector<1x1x1x9xf32>,
    %cst_32 = arith.constant dense<0.000000e+00> : vector<1x16xf32>
    %52 = tpu.matmul %48, %37, %cst_32 {dimension_numbers = #tpu.dot_dimension_numbers<[1], [0], [0], [1], [0, 0, 1, 1], [], []>} : vector<1x9xf32>, vector<9x16xf32>, vector<1x16xf32> -> vector<1x16xf32>
    %53 = vector.extract_strided_slice %32 {offsets = [0, 16], sizes = [1, 16], strides = [1, 1]} : vector<1x32xf32> to vector<1x16xf32>
    %54 = vector.extract_strided_slice %34 {offsets = [0, 16], sizes = [9, 16], strides = [1, 1]} : vector<9x64xf32> to vector<9x16xf32>
    %55 = vector.extract_strided_slice %34 {offsets = [0, 48], sizes = [9, 16], strides = [1, 1]} : vector<9x64xf32> to vector<9x16xf32>
    %cst_33 = arith.constant dense<0.000000e+00> : vector<1x9xf32>
    %56 = tpu.matmul %53, %54, %cst_33 {dimension_numbers = #tpu.dot_dimension_numbers<[1], [1], [0], [0], [0, 0, 1, 0], [], []>} : vector<1x16xf32>, vector<9x16xf32>, vector<1x9xf32> -> vector<1x9xf32>
    %cst_34 = arith.constant dense<0xFF800000> : vector<1xf32>
    %57 = vector.multi_reduction <maximumf>, %56, %cst_34 [1] : vector<1x9xf32> to vector<1xf32>
    %58 = vector.shape_cast %57 : vector<1xf32> to vector<1x1xf32>
    %59 = vector.broadcast %58 : vector<1x1xf32> to vector<1x9xf32>
    %60 = arith.subf %56, %59 : vector<1x9xf32>
    %61 = math.exp %60 : vector<1x9xf32>
    %cst_35 = arith.constant dense<0.000000e+00> : vector<1xf32>
    %62 = vector.multi_reduction <add>, %61, %cst_35 [1] : vector<1x9xf32> to vector<1xf32>
    %63 = vector.shape_cast %62 : vector<1xf32> to vector<1x1xf32>
    %64 = tpu.reciprocal %63 {approx = true} : vector<1x1xf32> -> vector<1x1xf32>
    %65 = vector.broadcast %64 : vector<1x1xf32> to vector<1x9xf32>
    %66 = arith.mulf %61, %65 : vector<1x9xf32>
    %c0_36 = arith.constant 0 : index
    %c1 = arith.constant 1 : index
    %c0_37 = arith.constant 0 : index
    %c0_38 = arith.constant 0 : index
    %67 = vector.load %arg14[%c0_36, %c1, %c0_37, %c0_38] : memref<1x2x1x9xf32, #tpu.memory_space<vmem>>, vector<1x1x1x9xf32>
    %68 = vector.shape_cast %67 : vector<1x1x1x9xf32> to vector<1x9xf32>
    %69 = vector.shape_cast %66 : vector<1x9xf32> to vector<1x1x1x9xf32>
    tpu.vector_store %arg14[%c0_36, %c1, %c0_37, %c0_38], %69 {strides = array<i32>} : memref<1x2x1x9xf32, #tpu.memory_space<vmem>>, vector<1x1x1x9xf32>,
    %cst_39 = arith.constant dense<0.000000e+00> : vector<1x16xf32>
    %70 = tpu.matmul %66, %55, %cst_39 {dimension_numbers = #tpu.dot_dimension_numbers<[1], [0], [0], [1], [0, 0, 1, 1], [], []>} : vector<1x9xf32>, vector<9x16xf32>, vector<1x16xf32> -> vector<1x16xf32>
    %71 = tpu.concatenate %52, %70 in 1 : vector<1x16xf32>, vector<1x16xf32> -> vector<1x32xf32>
    %c0_40 = arith.constant 0 : index
    %c0_41 = arith.constant 0 : index
    %72 = vector.load %arg9[%c0_40, %c0_41] : memref<32x32xf32, #tpu.memory_space<vmem>>, vector<32x32xf32>
    %cst_42 = arith.constant dense<0.000000e+00> : vector<1x32xf32>
    %73 = tpu.matmul %71, %72, %cst_42 {dimension_numbers = #tpu.dot_dimension_numbers<[1], [0], [0], [1], [0, 0, 1, 1], [], []>} : vector<1x32xf32>, vector<32x32xf32>, vector<1x32xf32> -> vector<1x32xf32>
    %c0_43 = arith.constant 0 : index
    %c0_44 = arith.constant 0 : index
    %74 = vector.load %arg10[%c0_43, %c0_44] : memref<1x32xf32, #tpu.memory_space<vmem>>, vector<1x32xf32>
    %75 = arith.addf %73, %74 : vector<1x32xf32>
    %c0_45 = arith.constant 0 : index
    %c0_46 = arith.constant 0 : index
    %76 = vector.load %arg11[%c0_45, %c0_46] : memref<32x64xf32, #tpu.memory_space<vmem>>, vector<32x64xf32>
    %cst_47 = arith.constant dense<0.000000e+00> : vector<1x64xf32>
    %77 = tpu.matmul %75, %76, %cst_47 {dimension_numbers = #tpu.dot_dimension_numbers<[1], [0], [0], [1], [0, 0, 1, 1], [], []>} : vector<1x32xf32>, vector<32x64xf32>, vector<1x64xf32> -> vector<1x64xf32>
    %c0_48 = arith.constant 0 : index
    %c0_49 = arith.constant 0 : index
    %78 = vector.load %arg12[%c0_48, %c0_49] : memref<1x64xf32, #tpu.memory_space<vmem>>, vector<1x64xf32>
    %79 = arith.addf %77, %78 : vector<1x64xf32>
    %80 = arith.addf %79, %1 : vector<1x64xf32>
    %c0_50 = arith.constant 0 : index
    %c0_51 = arith.constant 0 : index
    %c0_52 = arith.constant 0 : index
    %81 = vector.load %arg13[%c0_50, %c0_51, %c0_52] : memref<1x1x64xf32, #tpu.memory_space<vmem>>, vector<1x1x64xf32>
    %82 = vector.shape_cast %81 : vector<1x1x64xf32> to vector<1x64xf32>
    %83 = vector.shape_cast %80 : vector<1x64xf32> to vector<1x1x64xf32>
    tpu.vector_store %arg13[%c0_50, %c0_51, %c0_52], %83 {strides = array<i32>} : memref<1x1x64xf32, #tpu.memory_space<vmem>>, vector<1x1x64xf32>,
    return
  }
  func.func @transform_0(%arg0: i32) -> (i32, i32, i32) {
    %c0_i32 = arith.constant 0 : i32
    %c0_i32_0 = arith.constant 0 : i32
    %c0_i32_1 = arith.constant 0 : i32
    return %arg0, %c0_i32, %c0_i32_0 : i32, i32, i32
  }
  func.func @transform_1(%arg0: i32) -> (i32, i32, i32) {
    %c0_i32 = arith.constant 0 : i32
    %c0_i32_0 = arith.constant 0 : i32
    %c0_i32_1 = arith.constant 0 : i32
    return %arg0, %c0_i32, %c0_i32_0 : i32, i32, i32
  }
  func.func @transform_2(%arg0: i32) -> (i32, i32) {
    %c0_i32 = arith.constant 0 : i32
    %c0_i32_0 = arith.constant 0 : i32
    %c0_i32_1 = arith.constant 0 : i32
    return %c0_i32, %c0_i32_0 : i32, i32
  }
  func.func @transform_3(%arg0: i32) -> (i32, i32) {
    %c0_i32 = arith.constant 0 : i32
    %c0_i32_0 = arith.constant 0 : i32
    %c0_i32_1 = arith.constant 0 : i32
    return %c0_i32, %c0_i32_0 : i32, i32
  }
  func.func @transform_4(%arg0: i32) -> (i32, i32) {
    %c0_i32 = arith.constant 0 : i32
    %c0_i32_0 = arith.constant 0 : i32
    %c0_i32_1 = arith.constant 0 : i32
    return %c0_i32, %c0_i32_0 : i32, i32
  }
  func.func @transform_5(%arg0: i32) -> (i32, i32) {
    %c0_i32 = arith.constant 0 : i32
    %c0_i32_0 = arith.constant 0 : i32
    %c0_i32_1 = arith.constant 0 : i32
    return %c0_i32, %c0_i32_0 : i32, i32
  }
  func.func @transform_6(%arg0: i32) -> (i32, i32) {
    %c0_i32 = arith.constant 0 : i32
    %c0_i32_0 = arith.constant 0 : i32
    %c0_i32_1 = arith.constant 0 : i32
    return %c0_i32, %c0_i32_0 : i32, i32
  }
  func.func @transform_7(%arg0: i32) -> (i32, i32) {
    %c0_i32 = arith.constant 0 : i32
    %c0_i32_0 = arith.constant 0 : i32
    %c0_i32_1 = arith.constant 0 : i32
    return %c0_i32, %c0_i32_0 : i32, i32
  }
  func.func @transform_8(%arg0: i32) -> (i32, i32) {
    %c0_i32 = arith.constant 0 : i32
    %c0_i32_0 = arith.constant 0 : i32
    %c0_i32_1 = arith.constant 0 : i32
    return %c0_i32, %c0_i32_0 : i32, i32
  }
  func.func @transform_9(%arg0: i32) -> (i32, i32) {
    %c0_i32 = arith.constant 0 : i32
    %c0_i32_0 = arith.constant 0 : i32
    %c0_i32_1 = arith.constant 0 : i32
    return %c0_i32, %c0_i32_0 : i32, i32
  }
  func.func @transform_10(%arg0: i32) -> (i32, i32) {
    %c0_i32 = arith.constant 0 : i32
    %c0_i32_0 = arith.constant 0 : i32
    %c0_i32_1 = arith.constant 0 : i32
    return %c0_i32, %c0_i32_0 : i32, i32
  }
  func.func @transform_11(%arg0: i32) -> (i32, i32) {
    %c0_i32 = arith.constant 0 : i32
    %c0_i32_0 = arith.constant 0 : i32
    %c0_i32_1 = arith.constant 0 : i32
    return %c0_i32, %c0_i32_0 : i32, i32
  }
  func.func @transform_12(%arg0: i32) -> (i32, i32, i32) {
    %c0_i32 = arith.constant 0 : i32
    %c0_i32_0 = arith.constant 0 : i32
    %c0_i32_1 = arith.constant 0 : i32
    return %arg0, %c0_i32, %c0_i32_0 : i32, i32, i32
  }
  func.func @transform_13(%arg0: i32) -> (i32, i32, i32, i32) {
    %c0_i32 = arith.constant 0 : i32
    %c0_i32_0 = arith.constant 0 : i32
    %c0_i32_1 = arith.constant 0 : i32
    %c0_i32_2 = arith.constant 0 : i32
    return %arg0, %c0_i32, %c0_i32_0, %c0_i32_1 : i32, i32, i32, i32
  }
}

module attributes {stable_mosaic.version = 11 : i64} {
  func.func @_cross_attn_block_kernel(%arg0: i32, %arg1: memref<1x1x32xf32, #tpu.memory_space<vmem>>, %arg2: memref<1x4x64xf32, #tpu.memory_space<vmem>>, %arg3: memref<32x64xf32, #tpu.memory_space<vmem>>, %arg4: memref<1x64xf32, #tpu.memory_space<vmem>>, %arg5: memref<1x64xf32, #tpu.memory_space<vmem>>, %arg6: memref<1x64xf32, #tpu.memory_space<vmem>>, %arg7: memref<64x32xf32, #tpu.memory_space<vmem>>, %arg8: memref<64x64xf32, #tpu.memory_space<vmem>>, %arg9: memref<32x64xf32, #tpu.memory_space<vmem>>, %arg10: memref<1x64xf32, #tpu.memory_space<vmem>>, %arg11: memref<64x32xf32, #tpu.memory_space<vmem>>, %arg12: memref<1x32xf32, #tpu.memory_space<vmem>>, %arg13: memref<1x1x32xf32, #tpu.memory_space<vmem>>, %arg14: memref<1x2x1x5xf32, #tpu.memory_space<vmem>>) attributes {dimension_semantics = [#tpu.dimension_semantics<parallel>], iteration_bounds = array<i64: 2>, scalar_prefetch = 0 : i64, scratch_operands = 0 : i64, tpu.core_type = #tpu.core_type<tc>, window_params = [{transform_indices = @transform_0, window_bounds = array<i64: 1, 1, 32>}, {transform_indices = @transform_1, window_bounds = array<i64: 1, 4, 64>}, {pipeline_mode = #tpu.pipeline_mode<synchronous>, transform_indices = @transform_2, window_bounds = array<i64: 32, 64>}, {pipeline_mode = #tpu.pipeline_mode<synchronous>, transform_indices = @transform_3, window_bounds = array<i64: 1, 64>}, {pipeline_mode = #tpu.pipeline_mode<synchronous>, transform_indices = @transform_4, window_bounds = array<i64: 1, 64>}, {pipeline_mode = #tpu.pipeline_mode<synchronous>, transform_indices = @transform_5, window_bounds = array<i64: 1, 64>}, {pipeline_mode = #tpu.pipeline_mode<synchronous>, transform_indices = @transform_6, window_bounds = array<i64: 64, 32>}, {pipeline_mode = #tpu.pipeline_mode<synchronous>, transform_indices = @transform_7, window_bounds = array<i64: 64, 64>}, {pipeline_mode = #tpu.pipeline_mode<synchronous>, transform_indices = @transform_8, window_bounds = array<i64: 32, 64>}, {pipeline_mode = #tpu.pipeline_mode<synchronous>, transform_indices = @transform_9, window_bounds = array<i64: 1, 64>}, {pipeline_mode = #tpu.pipeline_mode<synchronous>, transform_indices = @transform_10, window_bounds = array<i64: 64, 32>}, {pipeline_mode = #tpu.pipeline_mode<synchronous>, transform_indices = @transform_11, window_bounds = array<i64: 1, 32>}, {transform_indices = @transform_12, window_bounds = array<i64: 1, 1, 32>}, {transform_indices = @transform_13, window_bounds = array<i64: 1, 2, 1, 5>}]} {
    %c0 = arith.constant 0 : index
    %c0_0 = arith.constant 0 : index
    %c0_1 = arith.constant 0 : index
    %0 = vector.load %arg1[%c0, %c0_0, %c0_1] : memref<1x1x32xf32, #tpu.memory_space<vmem>>, vector<1x1x32xf32>
    %1 = vector.shape_cast %0 : vector<1x1x32xf32> to vector<1x32xf32>
    %c0_2 = arith.constant 0 : index
    %c0_3 = arith.constant 0 : index
    %c0_4 = arith.constant 0 : index
    %2 = vector.load %arg2[%c0_2, %c0_3, %c0_4] : memref<1x4x64xf32, #tpu.memory_space<vmem>>, vector<1x4x64xf32>
    %3 = vector.shape_cast %2 : vector<1x4x64xf32> to vector<4x64xf32>
    %c0_5 = arith.constant 0 : index
    %c0_6 = arith.constant 0 : index
    %4 = vector.load %arg3[%c0_5, %c0_6] : memref<32x64xf32, #tpu.memory_space<vmem>>, vector<32x64xf32>
    %cst = arith.constant dense<0.000000e+00> : vector<1x64xf32>
    %5 = tpu.matmul %1, %4, %cst {dimension_numbers = #tpu.dot_dimension_numbers<[1], [0], [0], [1], [0, 0, 1, 1], [], []>} : vector<1x32xf32>, vector<32x64xf32>, vector<1x64xf32> -> vector<1x64xf32>
    %c0_7 = arith.constant 0 : index
    %c0_8 = arith.constant 0 : index
    %6 = vector.load %arg4[%c0_7, %c0_8] : memref<1x64xf32, #tpu.memory_space<vmem>>, vector<1x64xf32>
    %7 = arith.addf %5, %6 : vector<1x64xf32>
    %c0_9 = arith.constant 0 : index
    %c0_10 = arith.constant 0 : index
    %8 = vector.load %arg5[%c0_9, %c0_10] : memref<1x64xf32, #tpu.memory_space<vmem>>, vector<1x64xf32>
    %c0_11 = arith.constant 0 : index
    %c0_12 = arith.constant 0 : index
    %9 = vector.load %arg6[%c0_11, %c0_12] : memref<1x64xf32, #tpu.memory_space<vmem>>, vector<1x64xf32>
    %cst_13 = arith.constant dense<0.000000e+00> : vector<1xf32>
    %10 = vector.multi_reduction <add>, %7, %cst_13 [1] : vector<1x64xf32> to vector<1xf32>
    %11 = vector.shape_cast %10 : vector<1xf32> to vector<1x1xf32>
    %cst_14 = arith.constant 6.400000e+01 : f32
    %12 = vector.broadcast %cst_14 : f32 to vector<1x1xf32>
    %13 = arith.divf %11, %12 : vector<1x1xf32>
    %14 = vector.broadcast %13 : vector<1x1xf32> to vector<1x64xf32>
    %15 = arith.subf %7, %14 : vector<1x64xf32>
    %16 = arith.mulf %15, %15 : vector<1x64xf32>
    %cst_15 = arith.constant dense<0.000000e+00> : vector<1xf32>
    %17 = vector.multi_reduction <add>, %16, %cst_15 [1] : vector<1x64xf32> to vector<1xf32>
    %18 = vector.shape_cast %17 : vector<1xf32> to vector<1x1xf32>
    %cst_16 = arith.constant 6.400000e+01 : f32
    %19 = vector.broadcast %cst_16 : f32 to vector<1x1xf32>
    %20 = arith.divf %18, %19 : vector<1x1xf32>
    %cst_17 = arith.constant 9.99999974E-6 : f32
    %21 = vector.broadcast %cst_17 : f32 to vector<1x1xf32>
    %22 = arith.addf %20, %21 : vector<1x1xf32>
    %23 = math.rsqrt %22 : vector<1x1xf32>
    %24 = vector.broadcast %23 : vector<1x1xf32> to vector<1x64xf32>
    %25 = arith.mulf %15, %24 : vector<1x64xf32>
    %26 = arith.mulf %25, %8 : vector<1x64xf32>
    %27 = arith.addf %26, %9 : vector<1x64xf32>
    %28 = tpu.concatenate %27, %3 in 0 : vector<1x64xf32>, vector<4x64xf32> -> vector<5x64xf32>
    %c0_18 = arith.constant 0 : index
    %c0_19 = arith.constant 0 : index
    %29 = vector.load %arg7[%c0_18, %c0_19] : memref<64x32xf32, #tpu.memory_space<vmem>>, vector<64x32xf32>
    %cst_20 = arith.constant dense<0.000000e+00> : vector<1x32xf32>
    %30 = tpu.matmul %27, %29, %cst_20 {dimension_numbers = #tpu.dot_dimension_numbers<[1], [0], [0], [1], [0, 0, 1, 1], [], []>} : vector<1x64xf32>, vector<64x32xf32>, vector<1x32xf32> -> vector<1x32xf32>
    %cst_21 = arith.constant 2.500000e-01 : f32
    %31 = vector.broadcast %cst_21 : f32 to vector<1x32xf32>
    %32 = arith.mulf %30, %31 : vector<1x32xf32>
    %c0_22 = arith.constant 0 : index
    %c0_23 = arith.constant 0 : index
    %33 = vector.load %arg8[%c0_22, %c0_23] : memref<64x64xf32, #tpu.memory_space<vmem>>, vector<64x64xf32>
    %cst_24 = arith.constant dense<0.000000e+00> : vector<5x64xf32>
    %34 = tpu.matmul %28, %33, %cst_24 {dimension_numbers = #tpu.dot_dimension_numbers<[1], [0], [0], [1], [0, 0, 1, 1], [], []>} : vector<5x64xf32>, vector<64x64xf32>, vector<5x64xf32> -> vector<5x64xf32>
    %35 = vector.extract_strided_slice %32 {offsets = [0, 0], sizes = [1, 16], strides = [1, 1]} : vector<1x32xf32> to vector<1x16xf32>
    %36 = vector.extract_strided_slice %34 {offsets = [0, 0], sizes = [5, 16], strides = [1, 1]} : vector<5x64xf32> to vector<5x16xf32>
    %37 = vector.extract_strided_slice %34 {offsets = [0, 32], sizes = [5, 16], strides = [1, 1]} : vector<5x64xf32> to vector<5x16xf32>
    %cst_25 = arith.constant dense<0.000000e+00> : vector<1x5xf32>
    %38 = tpu.matmul %35, %36, %cst_25 {dimension_numbers = #tpu.dot_dimension_numbers<[1], [1], [0], [0], [0, 0, 1, 0], [], []>} : vector<1x16xf32>, vector<5x16xf32>, vector<1x5xf32> -> vector<1x5xf32>
    %cst_26 = arith.constant dense<0xFF800000> : vector<1xf32>
    %39 = vector.multi_reduction <maximumf>, %38, %cst_26 [1] : vector<1x5xf32> to vector<1xf32>
    %40 = vector.shape_cast %39 : vector<1xf32> to vector<1x1xf32>
    %41 = vector.broadcast %40 : vector<1x1xf32> to vector<1x5xf32>
    %42 = arith.subf %38, %41 : vector<1x5xf32>
    %43 = math.exp %42 : vector<1x5xf32>
    %cst_27 = arith.constant dense<0.000000e+00> : vector<1xf32>
    %44 = vector.multi_reduction <add>, %43, %cst_27 [1] : vector<1x5xf32> to vector<1xf32>
    %45 = vector.shape_cast %44 : vector<1xf32> to vector<1x1xf32>
    %46 = tpu.reciprocal %45 {approx = true} : vector<1x1xf32> -> vector<1x1xf32>
    %47 = vector.broadcast %46 : vector<1x1xf32> to vector<1x5xf32>
    %48 = arith.mulf %43, %47 : vector<1x5xf32>
    %c0_28 = arith.constant 0 : index
    %c0_29 = arith.constant 0 : index
    %c0_30 = arith.constant 0 : index
    %c0_31 = arith.constant 0 : index
    %49 = vector.load %arg14[%c0_28, %c0_29, %c0_30, %c0_31] : memref<1x2x1x5xf32, #tpu.memory_space<vmem>>, vector<1x1x1x5xf32>
    %50 = vector.shape_cast %49 : vector<1x1x1x5xf32> to vector<1x5xf32>
    %51 = vector.shape_cast %48 : vector<1x5xf32> to vector<1x1x1x5xf32>
    tpu.vector_store %arg14[%c0_28, %c0_29, %c0_30, %c0_31], %51 {strides = array<i32>} : memref<1x2x1x5xf32, #tpu.memory_space<vmem>>, vector<1x1x1x5xf32>,
    %cst_32 = arith.constant dense<0.000000e+00> : vector<1x16xf32>
    %52 = tpu.matmul %48, %37, %cst_32 {dimension_numbers = #tpu.dot_dimension_numbers<[1], [0], [0], [1], [0, 0, 1, 1], [], []>} : vector<1x5xf32>, vector<5x16xf32>, vector<1x16xf32> -> vector<1x16xf32>
    %53 = vector.extract_strided_slice %32 {offsets = [0, 16], sizes = [1, 16], strides = [1, 1]} : vector<1x32xf32> to vector<1x16xf32>
    %54 = vector.extract_strided_slice %34 {offsets = [0, 16], sizes = [5, 16], strides = [1, 1]} : vector<5x64xf32> to vector<5x16xf32>
    %55 = vector.extract_strided_slice %34 {offsets = [0, 48], sizes = [5, 16], strides = [1, 1]} : vector<5x64xf32> to vector<5x16xf32>
    %cst_33 = arith.constant dense<0.000000e+00> : vector<1x5xf32>
    %56 = tpu.matmul %53, %54, %cst_33 {dimension_numbers = #tpu.dot_dimension_numbers<[1], [1], [0], [0], [0, 0, 1, 0], [], []>} : vector<1x16xf32>, vector<5x16xf32>, vector<1x5xf32> -> vector<1x5xf32>
    %cst_34 = arith.constant dense<0xFF800000> : vector<1xf32>
    %57 = vector.multi_reduction <maximumf>, %56, %cst_34 [1] : vector<1x5xf32> to vector<1xf32>
    %58 = vector.shape_cast %57 : vector<1xf32> to vector<1x1xf32>
    %59 = vector.broadcast %58 : vector<1x1xf32> to vector<1x5xf32>
    %60 = arith.subf %56, %59 : vector<1x5xf32>
    %61 = math.exp %60 : vector<1x5xf32>
    %cst_35 = arith.constant dense<0.000000e+00> : vector<1xf32>
    %62 = vector.multi_reduction <add>, %61, %cst_35 [1] : vector<1x5xf32> to vector<1xf32>
    %63 = vector.shape_cast %62 : vector<1xf32> to vector<1x1xf32>
    %64 = tpu.reciprocal %63 {approx = true} : vector<1x1xf32> -> vector<1x1xf32>
    %65 = vector.broadcast %64 : vector<1x1xf32> to vector<1x5xf32>
    %66 = arith.mulf %61, %65 : vector<1x5xf32>
    %c0_36 = arith.constant 0 : index
    %c1 = arith.constant 1 : index
    %c0_37 = arith.constant 0 : index
    %c0_38 = arith.constant 0 : index
    %67 = vector.load %arg14[%c0_36, %c1, %c0_37, %c0_38] : memref<1x2x1x5xf32, #tpu.memory_space<vmem>>, vector<1x1x1x5xf32>
    %68 = vector.shape_cast %67 : vector<1x1x1x5xf32> to vector<1x5xf32>
    %69 = vector.shape_cast %66 : vector<1x5xf32> to vector<1x1x1x5xf32>
    tpu.vector_store %arg14[%c0_36, %c1, %c0_37, %c0_38], %69 {strides = array<i32>} : memref<1x2x1x5xf32, #tpu.memory_space<vmem>>, vector<1x1x1x5xf32>,
    %cst_39 = arith.constant dense<0.000000e+00> : vector<1x16xf32>
    %70 = tpu.matmul %66, %55, %cst_39 {dimension_numbers = #tpu.dot_dimension_numbers<[1], [0], [0], [1], [0, 0, 1, 1], [], []>} : vector<1x5xf32>, vector<5x16xf32>, vector<1x16xf32> -> vector<1x16xf32>
    %71 = tpu.concatenate %52, %70 in 1 : vector<1x16xf32>, vector<1x16xf32> -> vector<1x32xf32>
    %c0_40 = arith.constant 0 : index
    %c0_41 = arith.constant 0 : index
    %72 = vector.load %arg9[%c0_40, %c0_41] : memref<32x64xf32, #tpu.memory_space<vmem>>, vector<32x64xf32>
    %cst_42 = arith.constant dense<0.000000e+00> : vector<1x64xf32>
    %73 = tpu.matmul %71, %72, %cst_42 {dimension_numbers = #tpu.dot_dimension_numbers<[1], [0], [0], [1], [0, 0, 1, 1], [], []>} : vector<1x32xf32>, vector<32x64xf32>, vector<1x64xf32> -> vector<1x64xf32>
    %c0_43 = arith.constant 0 : index
    %c0_44 = arith.constant 0 : index
    %74 = vector.load %arg10[%c0_43, %c0_44] : memref<1x64xf32, #tpu.memory_space<vmem>>, vector<1x64xf32>
    %75 = arith.addf %73, %74 : vector<1x64xf32>
    %c0_45 = arith.constant 0 : index
    %c0_46 = arith.constant 0 : index
    %76 = vector.load %arg11[%c0_45, %c0_46] : memref<64x32xf32, #tpu.memory_space<vmem>>, vector<64x32xf32>
    %cst_47 = arith.constant dense<0.000000e+00> : vector<1x32xf32>
    %77 = tpu.matmul %75, %76, %cst_47 {dimension_numbers = #tpu.dot_dimension_numbers<[1], [0], [0], [1], [0, 0, 1, 1], [], []>} : vector<1x64xf32>, vector<64x32xf32>, vector<1x32xf32> -> vector<1x32xf32>
    %c0_48 = arith.constant 0 : index
    %c0_49 = arith.constant 0 : index
    %78 = vector.load %arg12[%c0_48, %c0_49] : memref<1x32xf32, #tpu.memory_space<vmem>>, vector<1x32xf32>
    %79 = arith.addf %77, %78 : vector<1x32xf32>
    %80 = arith.addf %79, %1 : vector<1x32xf32>
    %c0_50 = arith.constant 0 : index
    %c0_51 = arith.constant 0 : index
    %c0_52 = arith.constant 0 : index
    %81 = vector.load %arg13[%c0_50, %c0_51, %c0_52] : memref<1x1x32xf32, #tpu.memory_space<vmem>>, vector<1x1x32xf32>
    %82 = vector.shape_cast %81 : vector<1x1x32xf32> to vector<1x32xf32>
    %83 = vector.shape_cast %80 : vector<1x32xf32> to vector<1x1x32xf32>
    tpu.vector_store %arg13[%c0_50, %c0_51, %c0_52], %83 {strides = array<i32>} : memref<1x1x32xf32, #tpu.memory_space<vmem>>, vector<1x1x32xf32>,
    return
  }
  func.func @transform_0(%arg0: i32) -> (i32, i32, i32) {
    %c0_i32 = arith.constant 0 : i32
    %c0_i32_0 = arith.constant 0 : i32
    %c0_i32_1 = arith.constant 0 : i32
    return %arg0, %c0_i32, %c0_i32_0 : i32, i32, i32
  }
  func.func @transform_1(%arg0: i32) -> (i32, i32, i32) {
    %c0_i32 = arith.constant 0 : i32
    %c0_i32_0 = arith.constant 0 : i32
    %c0_i32_1 = arith.constant 0 : i32
    return %arg0, %c0_i32, %c0_i32_0 : i32, i32, i32
  }
  func.func @transform_2(%arg0: i32) -> (i32, i32) {
    %c0_i32 = arith.constant 0 : i32
    %c0_i32_0 = arith.constant 0 : i32
    %c0_i32_1 = arith.constant 0 : i32
    return %c0_i32, %c0_i32_0 : i32, i32
  }
  func.func @transform_3(%arg0: i32) -> (i32, i32) {
    %c0_i32 = arith.constant 0 : i32
    %c0_i32_0 = arith.constant 0 : i32
    %c0_i32_1 = arith.constant 0 : i32
    return %c0_i32, %c0_i32_0 : i32, i32
  }
  func.func @transform_4(%arg0: i32) -> (i32, i32) {
    %c0_i32 = arith.constant 0 : i32
    %c0_i32_0 = arith.constant 0 : i32
    %c0_i32_1 = arith.constant 0 : i32
    return %c0_i32, %c0_i32_0 : i32, i32
  }
  func.func @transform_5(%arg0: i32) -> (i32, i32) {
    %c0_i32 = arith.constant 0 : i32
    %c0_i32_0 = arith.constant 0 : i32
    %c0_i32_1 = arith.constant 0 : i32
    return %c0_i32, %c0_i32_0 : i32, i32
  }
  func.func @transform_6(%arg0: i32) -> (i32, i32) {
    %c0_i32 = arith.constant 0 : i32
    %c0_i32_0 = arith.constant 0 : i32
    %c0_i32_1 = arith.constant 0 : i32
    return %c0_i32, %c0_i32_0 : i32, i32
  }
  func.func @transform_7(%arg0: i32) -> (i32, i32) {
    %c0_i32 = arith.constant 0 : i32
    %c0_i32_0 = arith.constant 0 : i32
    %c0_i32_1 = arith.constant 0 : i32
    return %c0_i32, %c0_i32_0 : i32, i32
  }
  func.func @transform_8(%arg0: i32) -> (i32, i32) {
    %c0_i32 = arith.constant 0 : i32
    %c0_i32_0 = arith.constant 0 : i32
    %c0_i32_1 = arith.constant 0 : i32
    return %c0_i32, %c0_i32_0 : i32, i32
  }
  func.func @transform_9(%arg0: i32) -> (i32, i32) {
    %c0_i32 = arith.constant 0 : i32
    %c0_i32_0 = arith.constant 0 : i32
    %c0_i32_1 = arith.constant 0 : i32
    return %c0_i32, %c0_i32_0 : i32, i32
  }
  func.func @transform_10(%arg0: i32) -> (i32, i32) {
    %c0_i32 = arith.constant 0 : i32
    %c0_i32_0 = arith.constant 0 : i32
    %c0_i32_1 = arith.constant 0 : i32
    return %c0_i32, %c0_i32_0 : i32, i32
  }
  func.func @transform_11(%arg0: i32) -> (i32, i32) {
    %c0_i32 = arith.constant 0 : i32
    %c0_i32_0 = arith.constant 0 : i32
    %c0_i32_1 = arith.constant 0 : i32
    return %c0_i32, %c0_i32_0 : i32, i32
  }
  func.func @transform_12(%arg0: i32) -> (i32, i32, i32) {
    %c0_i32 = arith.constant 0 : i32
    %c0_i32_0 = arith.constant 0 : i32
    %c0_i32_1 = arith.constant 0 : i32
    return %arg0, %c0_i32, %c0_i32_0 : i32, i32, i32
  }
  func.func @transform_13(%arg0: i32) -> (i32, i32, i32, i32) {
    %c0_i32 = arith.constant 0 : i32
    %c0_i32_0 = arith.constant 0 : i32
    %c0_i32_1 = arith.constant 0 : i32
    %c0_i32_2 = arith.constant 0 : i32
    return %arg0, %c0_i32, %c0_i32_0, %c0_i32_1 : i32, i32, i32, i32
  }
}

module attributes {stable_mosaic.version = 11 : i64} {
  func.func @_encoder_layer_kernel(%arg0: i32, %arg1: memref<1x9x32xf32, #tpu.memory_space<vmem>>, %arg2: memref<1x32xf32, #tpu.memory_space<vmem>>, %arg3: memref<1x32xf32, #tpu.memory_space<vmem>>, %arg4: memref<32x96xf32, #tpu.memory_space<vmem>>, %arg5: memref<32x32xf32, #tpu.memory_space<vmem>>, %arg6: memref<1x32xf32, #tpu.memory_space<vmem>>, %arg7: memref<1x32xf32, #tpu.memory_space<vmem>>, %arg8: memref<1x32xf32, #tpu.memory_space<vmem>>, %arg9: memref<32x128xf32, #tpu.memory_space<vmem>>, %arg10: memref<1x128xf32, #tpu.memory_space<vmem>>, %arg11: memref<128x32xf32, #tpu.memory_space<vmem>>, %arg12: memref<1x32xf32, #tpu.memory_space<vmem>>, %arg13: memref<1x32xf32, #tpu.memory_space<vmem>>, %arg14: memref<1x32xf32, #tpu.memory_space<vmem>>, %arg15: memref<1x9x32xf32, #tpu.memory_space<vmem>>) attributes {dimension_semantics = [#tpu.dimension_semantics<parallel>], iteration_bounds = array<i64: 2>, scalar_prefetch = 0 : i64, scratch_operands = 0 : i64, tpu.core_type = #tpu.core_type<tc>, window_params = [{transform_indices = @transform_0, window_bounds = array<i64: 1, 9, 32>}, {pipeline_mode = #tpu.pipeline_mode<synchronous>, transform_indices = @transform_1, window_bounds = array<i64: 1, 32>}, {pipeline_mode = #tpu.pipeline_mode<synchronous>, transform_indices = @transform_2, window_bounds = array<i64: 1, 32>}, {pipeline_mode = #tpu.pipeline_mode<synchronous>, transform_indices = @transform_3, window_bounds = array<i64: 32, 96>}, {pipeline_mode = #tpu.pipeline_mode<synchronous>, transform_indices = @transform_4, window_bounds = array<i64: 32, 32>}, {pipeline_mode = #tpu.pipeline_mode<synchronous>, transform_indices = @transform_5, window_bounds = array<i64: 1, 32>}, {pipeline_mode = #tpu.pipeline_mode<synchronous>, transform_indices = @transform_6, window_bounds = array<i64: 1, 32>}, {pipeline_mode = #tpu.pipeline_mode<synchronous>, transform_indices = @transform_7, window_bounds = array<i64: 1, 32>}, {pipeline_mode = #tpu.pipeline_mode<synchronous>, transform_indices = @transform_8, window_bounds = array<i64: 32, 128>}, {pipeline_mode = #tpu.pipeline_mode<synchronous>, transform_indices = @transform_9, window_bounds = array<i64: 1, 128>}, {pipeline_mode = #tpu.pipeline_mode<synchronous>, transform_indices = @transform_10, window_bounds = array<i64: 128, 32>}, {pipeline_mode = #tpu.pipeline_mode<synchronous>, transform_indices = @transform_11, window_bounds = array<i64: 1, 32>}, {pipeline_mode = #tpu.pipeline_mode<synchronous>, transform_indices = @transform_12, window_bounds = array<i64: 1, 32>}, {pipeline_mode = #tpu.pipeline_mode<synchronous>, transform_indices = @transform_13, window_bounds = array<i64: 1, 32>}, {transform_indices = @transform_14, window_bounds = array<i64: 1, 9, 32>}]} {
    %c0 = arith.constant 0 : index
    %c0_0 = arith.constant 0 : index
    %c0_1 = arith.constant 0 : index
    %0 = vector.load %arg1[%c0, %c0_0, %c0_1] : memref<1x9x32xf32, #tpu.memory_space<vmem>>, vector<1x9x32xf32>
    %1 = vector.shape_cast %0 : vector<1x9x32xf32> to vector<9x32xf32>
    %c0_2 = arith.constant 0 : index
    %c0_3 = arith.constant 0 : index
    %2 = vector.load %arg2[%c0_2, %c0_3] : memref<1x32xf32, #tpu.memory_space<vmem>>, vector<1x32xf32>
    %c0_4 = arith.constant 0 : index
    %c0_5 = arith.constant 0 : index
    %3 = vector.load %arg3[%c0_4, %c0_5] : memref<1x32xf32, #tpu.memory_space<vmem>>, vector<1x32xf32>
    %cst = arith.constant dense<0.000000e+00> : vector<9xf32>
    %4 = vector.multi_reduction <add>, %1, %cst [1] : vector<9x32xf32> to vector<9xf32>
    %5 = vector.shape_cast %4 : vector<9xf32> to vector<9x1xf32>
    %cst_6 = arith.constant 3.200000e+01 : f32
    %6 = vector.broadcast %cst_6 : f32 to vector<9x1xf32>
    %7 = arith.divf %5, %6 : vector<9x1xf32>
    %8 = vector.broadcast %7 : vector<9x1xf32> to vector<9x32xf32>
    %9 = arith.subf %1, %8 : vector<9x32xf32>
    %10 = arith.mulf %9, %9 : vector<9x32xf32>
    %cst_7 = arith.constant dense<0.000000e+00> : vector<9xf32>
    %11 = vector.multi_reduction <add>, %10, %cst_7 [1] : vector<9x32xf32> to vector<9xf32>
    %12 = vector.shape_cast %11 : vector<9xf32> to vector<9x1xf32>
    %cst_8 = arith.constant 3.200000e+01 : f32
    %13 = vector.broadcast %cst_8 : f32 to vector<9x1xf32>
    %14 = arith.divf %12, %13 : vector<9x1xf32>
    %cst_9 = arith.constant 9.99999974E-6 : f32
    %15 = vector.broadcast %cst_9 : f32 to vector<9x1xf32>
    %16 = arith.addf %14, %15 : vector<9x1xf32>
    %17 = math.rsqrt %16 : vector<9x1xf32>
    %18 = vector.broadcast %17 : vector<9x1xf32> to vector<9x32xf32>
    %19 = arith.mulf %9, %18 : vector<9x32xf32>
    %20 = vector.broadcast %2 : vector<1x32xf32> to vector<9x32xf32>
    %21 = arith.mulf %19, %20 : vector<9x32xf32>
    %22 = vector.broadcast %3 : vector<1x32xf32> to vector<9x32xf32>
    %23 = arith.addf %21, %22 : vector<9x32xf32>
    %c0_10 = arith.constant 0 : index
    %c0_11 = arith.constant 0 : index
    %24 = vector.load %arg4[%c0_10, %c0_11] : memref<32x96xf32, #tpu.memory_space<vmem>>, vector<32x96xf32>
    %cst_12 = arith.constant dense<0.000000e+00> : vector<9x96xf32>
    %25 = tpu.matmul %23, %24, %cst_12 {dimension_numbers = #tpu.dot_dimension_numbers<[1], [0], [0], [1], [0, 0, 1, 1], [], []>} : vector<9x32xf32>, vector<32x96xf32>, vector<9x96xf32> -> vector<9x96xf32>
    %26 = vector.extract_strided_slice %25 {offsets = [0, 0], sizes = [9, 16], strides = [1, 1]} : vector<9x96xf32> to vector<9x16xf32>
    %cst_13 = arith.constant 2.500000e-01 : f32
    %27 = vector.broadcast %cst_13 : f32 to vector<9x16xf32>
    %28 = arith.mulf %26, %27 : vector<9x16xf32>
    %29 = vector.extract_strided_slice %25 {offsets = [0, 32], sizes = [9, 16], strides = [1, 1]} : vector<9x96xf32> to vector<9x16xf32>
    %30 = vector.extract_strided_slice %25 {offsets = [0, 64], sizes = [9, 16], strides = [1, 1]} : vector<9x96xf32> to vector<9x16xf32>
    %cst_14 = arith.constant dense<0.000000e+00> : vector<9x9xf32>
    %31 = tpu.matmul %28, %29, %cst_14 {dimension_numbers = #tpu.dot_dimension_numbers<[1], [1], [0], [0], [0, 0, 1, 0], [], []>} : vector<9x16xf32>, vector<9x16xf32>, vector<9x9xf32> -> vector<9x9xf32>
    %cst_15 = arith.constant dense<0xFF800000> : vector<9xf32>
    %32 = vector.multi_reduction <maximumf>, %31, %cst_15 [1] : vector<9x9xf32> to vector<9xf32>
    %33 = vector.shape_cast %32 : vector<9xf32> to vector<9x1xf32>
    %34 = vector.broadcast %33 : vector<9x1xf32> to vector<9x9xf32>
    %35 = arith.subf %31, %34 : vector<9x9xf32>
    %36 = math.exp %35 : vector<9x9xf32>
    %cst_16 = arith.constant dense<0.000000e+00> : vector<9xf32>
    %37 = vector.multi_reduction <add>, %36, %cst_16 [1] : vector<9x9xf32> to vector<9xf32>
    %38 = vector.shape_cast %37 : vector<9xf32> to vector<9x1xf32>
    %39 = tpu.reciprocal %38 {approx = true} : vector<9x1xf32> -> vector<9x1xf32>
    %40 = vector.broadcast %39 : vector<9x1xf32> to vector<9x9xf32>
    %41 = arith.mulf %36, %40 : vector<9x9xf32>
    %cst_17 = arith.constant dense<0.000000e+00> : vector<9x16xf32>
    %42 = tpu.matmul %41, %30, %cst_17 {dimension_numbers = #tpu.dot_dimension_numbers<[1], [0], [0], [1], [0, 0, 1, 1], [], []>} : vector<9x9xf32>, vector<9x16xf32>, vector<9x16xf32> -> vector<9x16xf32>
    %43 = vector.extract_strided_slice %25 {offsets = [0, 16], sizes = [9, 16], strides = [1, 1]} : vector<9x96xf32> to vector<9x16xf32>
    %cst_18 = arith.constant 2.500000e-01 : f32
    %44 = vector.broadcast %cst_18 : f32 to vector<9x16xf32>
    %45 = arith.mulf %43, %44 : vector<9x16xf32>
    %46 = vector.extract_strided_slice %25 {offsets = [0, 48], sizes = [9, 16], strides = [1, 1]} : vector<9x96xf32> to vector<9x16xf32>
    %47 = vector.extract_strided_slice %25 {offsets = [0, 80], sizes = [9, 16], strides = [1, 1]} : vector<9x96xf32> to vector<9x16xf32>
    %cst_19 = arith.constant dense<0.000000e+00> : vector<9x9xf32>
    %48 = tpu.matmul %45, %46, %cst_19 {dimension_numbers = #tpu.dot_dimension_numbers<[1], [1], [0], [0], [0, 0, 1, 0], [], []>} : vector<9x16xf32>, vector<9x16xf32>, vector<9x9xf32> -> vector<9x9xf32>
    %cst_20 = arith.constant dense<0xFF800000> : vector<9xf32>
    %49 = vector.multi_reduction <maximumf>, %48, %cst_20 [1] : vector<9x9xf32> to vector<9xf32>
    %50 = vector.shape_cast %49 : vector<9xf32> to vector<9x1xf32>
    %51 = vector.broadcast %50 : vector<9x1xf32> to vector<9x9xf32>
    %52 = arith.subf %48, %51 : vector<9x9xf32>
    %53 = math.exp %52 : vector<9x9xf32>
    %cst_21 = arith.constant dense<0.000000e+00> : vector<9xf32>
    %54 = vector.multi_reduction <add>, %53, %cst_21 [1] : vector<9x9xf32> to vector<9xf32>
    %55 = vector.shape_cast %54 : vector<9xf32> to vector<9x1xf32>
    %56 = tpu.reciprocal %55 {approx = true} : vector<9x1xf32> -> vector<9x1xf32>
    %57 = vector.broadcast %56 : vector<9x1xf32> to vector<9x9xf32>
    %58 = arith.mulf %53, %57 : vector<9x9xf32>
    %cst_22 = arith.constant dense<0.000000e+00> : vector<9x16xf32>
    %59 = tpu.matmul %58, %47, %cst_22 {dimension_numbers = #tpu.dot_dimension_numbers<[1], [0], [0], [1], [0, 0, 1, 1], [], []>} : vector<9x9xf32>, vector<9x16xf32>, vector<9x16xf32> -> vector<9x16xf32>
    %60 = tpu.concatenate %42, %59 in 1 : vector<9x16xf32>, vector<9x16xf32> -> vector<9x32xf32>
    %c0_23 = arith.constant 0 : index
    %c0_24 = arith.constant 0 : index
    %61 = vector.load %arg5[%c0_23, %c0_24] : memref<32x32xf32, #tpu.memory_space<vmem>>, vector<32x32xf32>
    %cst_25 = arith.constant dense<0.000000e+00> : vector<9x32xf32>
    %62 = tpu.matmul %60, %61, %cst_25 {dimension_numbers = #tpu.dot_dimension_numbers<[1], [0], [0], [1], [0, 0, 1, 1], [], []>} : vector<9x32xf32>, vector<32x32xf32>, vector<9x32xf32> -> vector<9x32xf32>
    %63 = arith.addf %1, %62 : vector<9x32xf32>
    %c0_26 = arith.constant 0 : index
    %c0_27 = arith.constant 0 : index
    %64 = vector.load %arg6[%c0_26, %c0_27] : memref<1x32xf32, #tpu.memory_space<vmem>>, vector<1x32xf32>
    %65 = vector.broadcast %64 : vector<1x32xf32> to vector<9x32xf32>
    %66 = arith.addf %63, %65 : vector<9x32xf32>
    %c0_28 = arith.constant 0 : index
    %c0_29 = arith.constant 0 : index
    %67 = vector.load %arg7[%c0_28, %c0_29] : memref<1x32xf32, #tpu.memory_space<vmem>>, vector<1x32xf32>
    %c0_30 = arith.constant 0 : index
    %c0_31 = arith.constant 0 : index
    %68 = vector.load %arg8[%c0_30, %c0_31] : memref<1x32xf32, #tpu.memory_space<vmem>>, vector<1x32xf32>
    %cst_32 = arith.constant dense<0.000000e+00> : vector<9xf32>
    %69 = vector.multi_reduction <add>, %66, %cst_32 [1] : vector<9x32xf32> to vector<9xf32>
    %70 = vector.shape_cast %69 : vector<9xf32> to vector<9x1xf32>
    %cst_33 = arith.constant 3.200000e+01 : f32
    %71 = vector.broadcast %cst_33 : f32 to vector<9x1xf32>
    %72 = arith.divf %70, %71 : vector<9x1xf32>
    %73 = vector.broadcast %72 : vector<9x1xf32> to vector<9x32xf32>
    %74 = arith.subf %66, %73 : vector<9x32xf32>
    %75 = arith.mulf %74, %74 : vector<9x32xf32>
    %cst_34 = arith.constant dense<0.000000e+00> : vector<9xf32>
    %76 = vector.multi_reduction <add>, %75, %cst_34 [1] : vector<9x32xf32> to vector<9xf32>
    %77 = vector.shape_cast %76 : vector<9xf32> to vector<9x1xf32>
    %cst_35 = arith.constant 3.200000e+01 : f32
    %78 = vector.broadcast %cst_35 : f32 to vector<9x1xf32>
    %79 = arith.divf %77, %78 : vector<9x1xf32>
    %cst_36 = arith.constant 9.99999974E-6 : f32
    %80 = vector.broadcast %cst_36 : f32 to vector<9x1xf32>
    %81 = arith.addf %79, %80 : vector<9x1xf32>
    %82 = math.rsqrt %81 : vector<9x1xf32>
    %83 = vector.broadcast %82 : vector<9x1xf32> to vector<9x32xf32>
    %84 = arith.mulf %74, %83 : vector<9x32xf32>
    %85 = vector.broadcast %67 : vector<1x32xf32> to vector<9x32xf32>
    %86 = arith.mulf %84, %85 : vector<9x32xf32>
    %87 = vector.broadcast %68 : vector<1x32xf32> to vector<9x32xf32>
    %88 = arith.addf %86, %87 : vector<9x32xf32>
    %c0_37 = arith.constant 0 : index
    %c0_38 = arith.constant 0 : index
    %89 = vector.load %arg9[%c0_37, %c0_38] : memref<32x128xf32, #tpu.memory_space<vmem>>, vector<32x128xf32>
    %cst_39 = arith.constant dense<0.000000e+00> : vector<9x128xf32>
    %90 = tpu.matmul %88, %89, %cst_39 {dimension_numbers = #tpu.dot_dimension_numbers<[1], [0], [0], [1], [0, 0, 1, 1], [], []>} : vector<9x32xf32>, vector<32x128xf32>, vector<9x128xf32> -> vector<9x128xf32>
    %c0_40 = arith.constant 0 : index
    %c0_41 = arith.constant 0 : index
    %91 = vector.load %arg10[%c0_40, %c0_41] : memref<1x128xf32, #tpu.memory_space<vmem>>, vector<1x128xf32>
    %92 = vector.broadcast %91 : vector<1x128xf32> to vector<9x128xf32>
    %93 = arith.addf %90, %92 : vector<9x128xf32>
    %cst_42 = arith.constant 5.000000e-01 : f32
    %94 = vector.broadcast %cst_42 : f32 to vector<9x128xf32>
    %95 = arith.mulf %94, %93 : vector<9x128xf32>
    %cst_43 = arith.constant 0.707106769 : f32
    %96 = vector.broadcast %cst_43 : f32 to vector<9x128xf32>
    %97 = arith.mulf %93, %96 : vector<9x128xf32>
    %98 = math.absf %97 : vector<9x128xf32>
    %cst_44 = arith.constant 0.327591091 : f32
    %99 = vector.broadcast %cst_44 : f32 to vector<9x128xf32>
    %100 = arith.mulf %99, %98 : vector<9x128xf32>
    %cst_45 = arith.constant 1.000000e+00 : f32
    %101 = vector.broadcast %cst_45 : f32 to vector<9x128xf32>
    %102 = arith.addf %101, %100 : vector<9x128xf32>
    %cst_46 = arith.constant 1.000000e+00 : f32
    %103 = vector.broadcast %cst_46 : f32 to vector<9x128xf32>
    %104 = arith.divf %103, %102 : vector<9x128xf32>
    %cst_47 = arith.constant 1.06140542 : f32
    %105 = vector.broadcast %cst_47 : f32 to vector<9x128xf32>
    %106 = arith.mulf %105, %104 : vector<9x128xf32>
    %cst_48 = arith.constant -1.45315206 : f32
    %107 = vector.broadcast %cst_48 : f32 to vector<9x128xf32>
    %108 = arith.addf %106, %107 : vector<9x128xf32>
    %109 = arith.mulf %108, %104 : vector<9x128xf32>
    %cst_49 = arith.constant 1.42141378 : f32
    %110 = vector.broadcast %cst_49 : f32 to vector<9x128xf32>
    %111 = arith.addf %109, %110 : vector<9x128xf32>
    %112 = arith.mulf %111, %104 : vector<9x128xf32>
    %cst_50 = arith.constant -0.284496725 : f32
    %113 = vector.broadcast %cst_50 : f32 to vector<9x128xf32>
    %114 = arith.addf %112, %113 : vector<9x128xf32>
    %115 = arith.mulf %114, %104 : vector<9x128xf32>
    %cst_51 = arith.constant 0.254829586 : f32
    %116 = vector.broadcast %cst_51 : f32 to vector<9x128xf32>
    %117 = arith.addf %115, %116 : vector<9x128xf32>
    %118 = arith.mulf %117, %104 : vector<9x128xf32>
    %cst_52 = arith.constant 0.000000e+00 : f32
    %119 = vector.broadcast %cst_52 : f32 to vector<9x128xf32>
    %120 = arith.subf %119, %98 : vector<9x128xf32>
    %121 = arith.mulf %120, %98 : vector<9x128xf32>
    %122 = math.exp %121 : vector<9x128xf32>
    %123 = arith.mulf %118, %122 : vector<9x128xf32>
    %cst_53 = arith.constant 1.000000e+00 : f32
    %124 = vector.broadcast %cst_53 : f32 to vector<9x128xf32>
    %125 = arith.subf %124, %123 : vector<9x128xf32>
    %cst_54 = arith.constant 0.000000e+00 : f32
    %126 = vector.broadcast %cst_54 : f32 to vector<9x128xf32>
    %127 = arith.cmpf oge, %97, %126 : vector<9x128xf32>
    %cst_55 = arith.constant 0.000000e+00 : f32
    %128 = vector.broadcast %cst_55 : f32 to vector<9x128xf32>
    %129 = arith.subf %128, %125 : vector<9x128xf32>
    %130 = arith.select %127, %125, %129 : vector<9x128xi1>, vector<9x128xf32>
    %cst_56 = arith.constant 1.000000e+00 : f32
    %131 = vector.broadcast %cst_56 : f32 to vector<9x128xf32>
    %132 = arith.addf %131, %130 : vector<9x128xf32>
    %133 = arith.mulf %95, %132 : vector<9x128xf32>
    %c0_57 = arith.constant 0 : index
    %c0_58 = arith.constant 0 : index
    %134 = vector.load %arg11[%c0_57, %c0_58] : memref<128x32xf32, #tpu.memory_space<vmem>>, vector<128x32xf32>
    %cst_59 = arith.constant dense<0.000000e+00> : vector<9x32xf32>
    %135 = tpu.matmul %133, %134, %cst_59 {dimension_numbers = #tpu.dot_dimension_numbers<[1], [0], [0], [1], [0, 0, 1, 1], [], []>} : vector<9x128xf32>, vector<128x32xf32>, vector<9x32xf32> -> vector<9x32xf32>
    %136 = arith.addf %66, %135 : vector<9x32xf32>
    %c0_60 = arith.constant 0 : index
    %c0_61 = arith.constant 0 : index
    %137 = vector.load %arg12[%c0_60, %c0_61] : memref<1x32xf32, #tpu.memory_space<vmem>>, vector<1x32xf32>
    %138 = vector.broadcast %137 : vector<1x32xf32> to vector<9x32xf32>
    %139 = arith.addf %136, %138 : vector<9x32xf32>
    %c0_62 = arith.constant 0 : index
    %c0_63 = arith.constant 0 : index
    %140 = vector.load %arg13[%c0_62, %c0_63] : memref<1x32xf32, #tpu.memory_space<vmem>>, vector<1x32xf32>
    %c0_64 = arith.constant 0 : index
    %c0_65 = arith.constant 0 : index
    %141 = vector.load %arg14[%c0_64, %c0_65] : memref<1x32xf32, #tpu.memory_space<vmem>>, vector<1x32xf32>
    %cst_66 = arith.constant dense<0.000000e+00> : vector<9xf32>
    %142 = vector.multi_reduction <add>, %139, %cst_66 [1] : vector<9x32xf32> to vector<9xf32>
    %143 = vector.shape_cast %142 : vector<9xf32> to vector<9x1xf32>
    %cst_67 = arith.constant 3.200000e+01 : f32
    %144 = vector.broadcast %cst_67 : f32 to vector<9x1xf32>
    %145 = arith.divf %143, %144 : vector<9x1xf32>
    %146 = vector.broadcast %145 : vector<9x1xf32> to vector<9x32xf32>
    %147 = arith.subf %139, %146 : vector<9x32xf32>
    %148 = arith.mulf %147, %147 : vector<9x32xf32>
    %cst_68 = arith.constant dense<0.000000e+00> : vector<9xf32>
    %149 = vector.multi_reduction <add>, %148, %cst_68 [1] : vector<9x32xf32> to vector<9xf32>
    %150 = vector.shape_cast %149 : vector<9xf32> to vector<9x1xf32>
    %cst_69 = arith.constant 3.200000e+01 : f32
    %151 = vector.broadcast %cst_69 : f32 to vector<9x1xf32>
    %152 = arith.divf %150, %151 : vector<9x1xf32>
    %cst_70 = arith.constant 9.99999974E-6 : f32
    %153 = vector.broadcast %cst_70 : f32 to vector<9x1xf32>
    %154 = arith.addf %152, %153 : vector<9x1xf32>
    %155 = math.rsqrt %154 : vector<9x1xf32>
    %156 = vector.broadcast %155 : vector<9x1xf32> to vector<9x32xf32>
    %157 = arith.mulf %147, %156 : vector<9x32xf32>
    %158 = vector.broadcast %140 : vector<1x32xf32> to vector<9x32xf32>
    %159 = arith.mulf %157, %158 : vector<9x32xf32>
    %160 = vector.broadcast %141 : vector<1x32xf32> to vector<9x32xf32>
    %161 = arith.addf %159, %160 : vector<9x32xf32>
    %c0_71 = arith.constant 0 : index
    %c0_72 = arith.constant 0 : index
    %c0_73 = arith.constant 0 : index
    %162 = vector.load %arg15[%c0_71, %c0_72, %c0_73] : memref<1x9x32xf32, #tpu.memory_space<vmem>>, vector<1x9x32xf32>
    %163 = vector.shape_cast %162 : vector<1x9x32xf32> to vector<9x32xf32>
    %164 = vector.shape_cast %161 : vector<9x32xf32> to vector<1x9x32xf32>
    tpu.vector_store %arg15[%c0_71, %c0_72, %c0_73], %164 {strides = array<i32>} : memref<1x9x32xf32, #tpu.memory_space<vmem>>, vector<1x9x32xf32>,
    return
  }
  func.func @transform_0(%arg0: i32) -> (i32, i32, i32) {
    %c0_i32 = arith.constant 0 : i32
    %c0_i32_0 = arith.constant 0 : i32
    %c0_i32_1 = arith.constant 0 : i32
    return %arg0, %c0_i32, %c0_i32_0 : i32, i32, i32
  }
  func.func @transform_1(%arg0: i32) -> (i32, i32) {
    %c0_i32 = arith.constant 0 : i32
    %c0_i32_0 = arith.constant 0 : i32
    %c0_i32_1 = arith.constant 0 : i32
    return %c0_i32, %c0_i32_0 : i32, i32
  }
  func.func @transform_2(%arg0: i32) -> (i32, i32) {
    %c0_i32 = arith.constant 0 : i32
    %c0_i32_0 = arith.constant 0 : i32
    %c0_i32_1 = arith.constant 0 : i32
    return %c0_i32, %c0_i32_0 : i32, i32
  }
  func.func @transform_3(%arg0: i32) -> (i32, i32) {
    %c0_i32 = arith.constant 0 : i32
    %c0_i32_0 = arith.constant 0 : i32
    %c0_i32_1 = arith.constant 0 : i32
    return %c0_i32, %c0_i32_0 : i32, i32
  }
  func.func @transform_4(%arg0: i32) -> (i32, i32) {
    %c0_i32 = arith.constant 0 : i32
    %c0_i32_0 = arith.constant 0 : i32
    %c0_i32_1 = arith.constant 0 : i32
    return %c0_i32, %c0_i32_0 : i32, i32
  }
  func.func @transform_5(%arg0: i32) -> (i32, i32) {
    %c0_i32 = arith.constant 0 : i32
    %c0_i32_0 = arith.constant 0 : i32
    %c0_i32_1 = arith.constant 0 : i32
    return %c0_i32, %c0_i32_0 : i32, i32
  }
  func.func @transform_6(%arg0: i32) -> (i32, i32) {
    %c0_i32 = arith.constant 0 : i32
    %c0_i32_0 = arith.constant 0 : i32
    %c0_i32_1 = arith.constant 0 : i32
    return %c0_i32, %c0_i32_0 : i32, i32
  }
  func.func @transform_7(%arg0: i32) -> (i32, i32) {
    %c0_i32 = arith.constant 0 : i32
    %c0_i32_0 = arith.constant 0 : i32
    %c0_i32_1 = arith.constant 0 : i32
    return %c0_i32, %c0_i32_0 : i32, i32
  }
  func.func @transform_8(%arg0: i32) -> (i32, i32) {
    %c0_i32 = arith.constant 0 : i32
    %c0_i32_0 = arith.constant 0 : i32
    %c0_i32_1 = arith.constant 0 : i32
    return %c0_i32, %c0_i32_0 : i32, i32
  }
  func.func @transform_9(%arg0: i32) -> (i32, i32) {
    %c0_i32 = arith.constant 0 : i32
    %c0_i32_0 = arith.constant 0 : i32
    %c0_i32_1 = arith.constant 0 : i32
    return %c0_i32, %c0_i32_0 : i32, i32
  }
  func.func @transform_10(%arg0: i32) -> (i32, i32) {
    %c0_i32 = arith.constant 0 : i32
    %c0_i32_0 = arith.constant 0 : i32
    %c0_i32_1 = arith.constant 0 : i32
    return %c0_i32, %c0_i32_0 : i32, i32
  }
  func.func @transform_11(%arg0: i32) -> (i32, i32) {
    %c0_i32 = arith.constant 0 : i32
    %c0_i32_0 = arith.constant 0 : i32
    %c0_i32_1 = arith.constant 0 : i32
    return %c0_i32, %c0_i32_0 : i32, i32
  }
  func.func @transform_12(%arg0: i32) -> (i32, i32) {
    %c0_i32 = arith.constant 0 : i32
    %c0_i32_0 = arith.constant 0 : i32
    %c0_i32_1 = arith.constant 0 : i32
    return %c0_i32, %c0_i32_0 : i32, i32
  }
  func.func @transform_13(%arg0: i32) -> (i32, i32) {
    %c0_i32 = arith.constant 0 : i32
    %c0_i32_0 = arith.constant 0 : i32
    %c0_i32_1 = arith.constant 0 : i32
    return %c0_i32, %c0_i32_0 : i32, i32
  }
  func.func @transform_14(%arg0: i32) -> (i32, i32, i32) {
    %c0_i32 = arith.constant 0 : i32
    %c0_i32_0 = arith.constant 0 : i32
    %c0_i32_1 = arith.constant 0 : i32
    return %arg0, %c0_i32, %c0_i32_0 : i32, i32, i32
  }
}

</mosaic_0001>

<bundles_post_ra>
// kernel: _lambda_.5
= control target key start
LH: loop header
LB: loop body
LE: loop exit
PB: predicated region body
PF: predicated region fallthrough
CT: control target
= control target key end

     0   :  { %19 = vsyncpa [#allocation3], 0  ;;  %s2070_s0 = inlined_call_operand.vmem [shape: f32[2,5,64], index: 0, kind: input, shape index: {}]   ;;  %s2071_s1 = inlined_call_operand.vmem [shape: f32[1,64], index: 1, kind: input, shape index: {}, may-alias: {1,6,12}]   ;;  %s2072_s2 = inlined_call_operand.vmem [shape: f32[1,64], index: 2, kind: input, shape index: {}, may-alias: {2,5,7,11,13}]   ;;  %s2073_s3 = inlined_call_operand.hbm [shape: f32[64,96], index: 3, kind: input, shape index: {}]   ;;  %s2074_s4 = inlined_call_operand.vmem [shape: f32[32,64], index: 4, kind: input, shape index: {}]   ;;  %s2075_s5 = inlined_call_operand.vmem [shape: f32[1,64], index: 5, kind: input, shape index: {}, may-alias: {2,5,7,11,13}]   ;;  %s2076_s6 = inlined_call_operand.vmem [shape: f32[1,64], index: 6, kind: input, shape index: {}, may-alias: {1,6,12}]   ;;  %s2077_s7 = inlined_call_operand.vmem [shape: f32[1,64], index: 7, kind: input, shape index: {}, may-alias: {2,5,7,11,13}]   ;;  %s2078_s8 = inlined_call_operand.vmem [shape: f32[64,128], index: 8, kind: input, shape index: {}]   ;;  %s2079_s9 = inlined_call_operand.vmem [shape: f32[1,128], index: 9, kind: input, shape index: {}]   ;;  %s2080_s10 = inlined_call_operand.hbm [shape: f32[128,64], index: 10, kind: input, shape index: {}]   ;;  %s2081_s11 = inlined_call_operand.vmem [shape: f32[1,64], index: 11, kind: input, shape index: {}, may-alias: {2,5,7,11,13}]   ;;  %s2082_s12 = inlined_call_operand.vmem [shape: f32[1,64], index: 12, kind: input, shape index: {}, may-alias: {1,6,12}]   ;;  %s2083_s13 = inlined_call_operand.vmem [shape: f32[1,64], index: 13, kind: input, shape index: {}, may-alias: {2,5,7,11,13}]   ;;  %s2084_s14 = inlined_call_operand.vmem [shape: f32[2,5,64], index: 14, kind: output, shape index: {}]  }
   0x1   :  { %20 = vsyncpa [#allocation5], 0  ;;  %s1837_s29 = smov 0  }
   0x2 LB: > { %2088 = sst [smem:[#allocation8_spill]] %s1747_s29  ;;  %s1843_s30 = sadd.s32 4294967295, %s1747_s29   ;;  %s1747_s29 = sphi %s1837_s29, %s26_s29  }
   0x3   : > { %p1382_p0 = scmp.ge.s32.totalorder %s1747_s29, 1  ;;  %p356_p1 = scmp.lt.s32.totalorder %s1747_s29, 3 }
   0x4   : > { %s1749_s15 = smov [#allocation2]   ;;  %p2085_p3 = scmp.eq.s32.totalorder %s1843_s30, 0 }
   0x5   : > { %s374_s16 = sshll.u32 %s1749_s15, 4  ;;  %p1847_p2 = pnand %p1382_p0, %p356_p1  ;;  %s375_s16 = int_to_ptr.vmem [resolvable:$true] %s374_s16 }
   0x6   : > { %s1750_s18 = smov [#allocation4]   ;;  %s1677_s23 = scalar_lea.hbm %s2073_s3, 1024 }
   0x7   : > { %s2089_s17 = scalar_select %p1847_p2, 1, 0 }
   0x8   : > { %p1627_p4 = pneg %p1847_p2  ;;  %s405_s19 = sshll.u32 %s1750_s18, 4  ;;  %s1860_s19 = int_to_ptr.vmem [resolvable:$true] %s405_s19 }
   0x9   : > { %p1678_p6 = scmp.ne.s32.totalorder %s2073_s3, %s1677_s23  ;;  %p1684_p10 = scmp.lt.u32.totalorder %s1677_s23, %s2073_s3 }
   0xa   : > { %p1856_p5 = pnand %p2085_p3, %p1627_p4 }
   0xc   : > { %p1679_p7 = pneg %p1856_p5 }
   0xe   : > { %p1680_p8 = pnand %p1679_p7, %p1678_p6 }
  0x10   : > { %p1681_p9 = pneg %p1680_p8 }
  0x12   : > { %p1686_p11 = pnand %p1684_p10, %p1681_p9 }
  0x14   : > { %1689 = shalt.err (!%p1686_p11)
}
  0x15   : > { %s1690_s28 = scalar_lea.vmem %s375_s16, 1024  ;;  %p1698_p1 = scmp.lt.s32.totalorder %s375_s16, %s375_s16 }
  0x16   : > { %p1691_p12 = scmp.ne.s32.totalorder %s375_s16, %s1690_s28  ;;  %p1699_p4 = scmp.lt.s32.totalorder %s1690_s28, %s1690_s28 }
  0x18   : > { %p1693_p13 = pnand %p1691_p12, %p1679_p7  ;;  %p1700_p3 = por %p1699_p4, %p1698_p1 }
  0x1a   : > { %p1694_p0 = pneg %p1693_p13 }
  0x1c   : > { %p1701_p2 = pnand %p1700_p3, %p1694_p0 }
  0x1e   : > { %1704 = shalt.err (!%p1701_p2)
}
  0x1f   : > { %s1751_s15 = smov 128   ;;  %s1752_s18 = smov 8  }
  0x20   : > { %1630 = dma.hbm_to_vmem [thread:$0]  (!%p1856_p5), %s2073_s3, 1024, %s375_s16, [#allocation3], %s1751_s15, %s1751_s15, %s1752_s18  }
  0x21   : > { %s1705_s25 = scalar_lea.hbm %s2080_s10, 2048 }
  0x22   : > { %p1706_p6 = scmp.ne.s32.totalorder %s2080_s10, %s1705_s25  ;;  %p1712_p8 = scmp.lt.u32.totalorder %s1705_s25, %s2080_s10 }
  0x24   : > { %p1708_p2 = pnand %p1706_p6, %p1679_p7 }
  0x26   : > { %p1709_p3 = pneg %p1708_p2 }
  0x28   : > { %p1714_p9 = pnand %p1712_p8, %p1709_p3 }
  0x2a   : > { %1717 = shalt.err (!%p1714_p9)
}
  0x2b   : > { %s1718_s16 = scalar_lea.vmem %s1860_s19, 2048  ;;  %p1726_p13 = scmp.lt.s32.totalorder %s1860_s19, %s1860_s19 }
  0x2c   : > { %p1719_p10 = scmp.ne.s32.totalorder %s1860_s19, %s1718_s16  ;;  %p1727_p0 = scmp.lt.s32.totalorder %s1718_s16, %s1718_s16 }
  0x2e   : > { %p1721_p11 = pnand %p1719_p10, %p1679_p7  ;;  %p1728_p1 = por %p1727_p0, %p1726_p13 }
  0x30   : > { %p1722_p12 = pneg %p1721_p11 }
  0x32   : > { %p1729_p4 = pnand %p1728_p1, %p1722_p12 }
  0x34   : > { %1732 = shalt.err (!%p1729_p4)
}
  0x35   : > { %1633 = dma.hbm_to_vmem [thread:$0]  (!%p1856_p5), %s2080_s10, 2048, %s1860_s19, [#allocation5], %s1751_s15, %s1751_s15, %s1752_s18  }
  0x36   : > { %p2091_p6 = scmp.ne.s32.totalorder %s2089_s17, 0 }
  0x37   : > { %p2092_p2 = scmp.eq.s32.totalorder (!%p2091_p6), %s1843_s30, 0 }
  0x38   : > { %437 = sbr.rel (%p2091_p6) target bundleno = 3421 (0xd5d), region = 76 }
  0x3f   : > { %1738 = dma.done.wait (%p2092_p2), [#allocation3], 1024   ;;  %p2093_p7 = pmov %p2092_p2 }
  0x40   : > { %p2094_p3 = pmov %p2092_p2 }
  0x41   : > { %1740 = vsyncadd (%p2093_p7), [#allocation3], 4294966272 }
  0x42   : > { %1742 = dma.done.wait (%p2094_p3), [#allocation5], 2048   ;;  %p2095_p8 = pmov %p2092_p2 }
  0x43   : > { %p485_p9 = scmp.lt.s32.totalorder %s1843_s30, 1  ;;  %vm496_vm0 = vcmask 520192   ;;  %v525_v7 = vld [vmem:[#allocation2] sm:$0xff]  ;;  %v526_v8 = vld [vmem:[#allocation2 + $0x8] sm:$0xff]  ;;  %v527_v10 = vld [vmem:[#allocation2 + $0x10] sm:$0xff]  ;;  %v1753_v12 = vmov 0.0|0.0  }
  0x44   : > { %1744 = vsyncadd (%p2095_p8), [#allocation5], 4294965248  ;;  %v1566_v9 = vpack.c.bf16 %v526_v8, %v525_v7  ;;  %v528_v11 = vld [vmem:[#allocation2 + $0x18] sm:$0xff]  ;;  %1565 = vmatprep.subr.bf16.mxu1 %v1753_v12  ;;  %vm1754_vm1 = vmmov 0   ;;  %v1755_v13 = vmov 0.0   ;;  %v529_v15 = vld [vmem:[#allocation2 + $0x20] sm:$0xff] }
  0x45   : > { %s2098_s30 = smov (!%p485_p9, %s1843_s30), 1  ;;  %1477 = vmatprep.mubr.msk.f32.mxu1 %vm1754_vm1, %v1755_v13  ;;  %v1569_v14 = vpack.c.bf16 %v528_v11, %v527_v10  ;;  %1480 = vmatprep.subr.mxu0 %v1755_v13  ;;  %v530_v16 = vld [vmem:[#allocation2 + $0x28] sm:$0xff]  ;;  %v531_v18 = vld [vmem:[#allocation2 + $0x30] sm:$0xff]  ;;  %v532_v19 = vld [vmem:[#allocation2 + $0x38] sm:$0xff]  ;;  %vm533_vm2 = vcmask 523264   ;;  %s1756_s25 = smov 64  }
  0x46   : > { %s1389_s17 = sshll.u32 %s2098_s30, 3  ;;  %1567 = vmatpush3.bf16.msra.mxu1 %v1566_v9  ;;  %1482 = vmatprep.mubr.msk.f32.mxu0 %vm1754_vm1, %v1755_v13  ;;  %v1572_v17 = vpack.c.bf16 %v530_v16, %v529_v15  ;;  %v1575_v20 = vpack.c.bf16 %v532_v19, %v531_v18  ;;  %v1391_v25 = vld [vmem:[%s2071_s1] ss:$0 sm:$0xff]  ;;  %s1757_s26 = smov 96   ;;  %vm611_vm3 = vcmask 130048   ;;  %vm705_vm4 = vcmask 1044480  }
  0x47   : > { %s488_s15 = scalar_lea.vmem %s2070_s0, %s1389_s17  ;;  %1568 = vmatprep.subr.bf16.mxu1 %v1753_v12  ;;  %v1392_v27 = vld [vmem:[%s2072_s2] ss:$0 sm:$0xff]  ;;  %s1758_s27 = smov 80   ;;  %vm687_vm5 = vcmask 36864   ;;  %vm701_vm6 = vcmask 39936   ;;  %v950_v63 = vld [vmem:[%s2074_s4 + $0x8] sm:$0xff] }
  0x48   : > { %v1929_v0 = vld [vmem:[%s488_s15] sm:$0x1f]  ;;  %s1759_s28 = smov 112   ;;  %s1760_s16 = smov 48   ;;  %vm953_vm7 = vcmask 261120  }
  0x49   : > { %v497_v1 = vsel %vm496_vm0, %v1929_v0, 0.0  ;;  %v949_v62 = vld [vmem:[%s2074_s4] sm:$0xff]  ;;  %s1761_s24 = smov 16  }
  0x4a   : > { %498 = vadd.xlane.f32.xlu0 %v497_v1  ;;  %1570 = vmatpush3.bf16.msra.mxu1 %v1569_v14  ;;  %v951_v1 = vld [vmem:[%s2074_s4 + $0x10] sm:$0xff]  ;;  %v1403_v10 = vld [vmem:[%s2075_s5] ss:$0 sm:$0xff] }
  0x4b   : > { %1571 = vmatprep.subr.bf16.mxu1 %v1753_v12 }
  0x4e   : > { %1573 = vmatpush3.bf16.msra.mxu1 %v1572_v17 }
  0x4f   : > { %1574 = vmatprep.subr.bf16.mxu1 %v1753_v12 }
  0x52   : > { %1576 = vmatpush3.bf16.msra.mxu1 %v1575_v20 }
  0x53   : > { %1485 = vmatprep.subr.mxu1 %v1755_v13 }
  0xd7   : > { %v499_v2 = vpop.xlane.xlu0 %498 }
  0xd8   : > { %v501_v3 = vmul.f32 0.015625, %v499_v2  ;;  %v1578_v2 = vpack.c.bf16 %v950_v63, %v949_v62  ;;  %v1194_v62 = vld [vmem:[#allocation4 + $0x70] sm:$0xff]  ;;  %v1195_v63 = vld [vmem:[#allocation4 + $0x78] sm:$0xff] }
  0xda   : > { %v502_v4 = vsub.f32 %v1929_v0, %v501_v3  ;;  %v952_v3 = vld [vmem:[%s2074_s4 + $0x18] sm:$0xff] }
  0xdc   : > { %v503_v5 = vmul.f32 %v502_v4, %v502_v4 }
  0xde   : > { %v504_v6 = vsel %vm496_vm0, %v503_v5, 0.0 }
  0xdf   : > { %505 = vadd.xlane.f32.xlu0 %v504_v6 }
 0x16c   : > { %v506_v21 = vpop.xlane.xlu0 %505 }
 0x16d   : > { %v507_v22 = vmul.f32 0.015625, %v506_v21  ;;  %v1065_v21 = vld [vmem:[%s2078_s8] sm:$0xff] }
 0x16f   : > { %v508_v23 = vadd.f32 1e-05, %v507_v22 }
 0x171   : > { %1659 = vrsqrt.f32 %v508_v23  ;;  %v1067_v23 = vld [vmem:[%s2078_s8 + $0x10] sm:$0xff] }
 0x17b   : > { %v1660_v24 = vpop.eup %1659 }
 0x17c   : > { %v510_v26 = vmul.f32 %v1660_v24, %v502_v4  ;;  %v1581_v4 = vpack.c.bf16 %v952_v3, %v951_v1  ;;  %v1068_v24 = vld [vmem:[%s2078_s8 + $0x18] sm:$0xff]  ;;  %v1617_v1 = vpack.c.bf16 %v1195_v63, %v1194_v62 }
 0x17e   : > { %v517_v28 = vmul.f32 %v1391_v25, %v510_v26  ;;  %v1587_v25 = vpack.c.bf16 %v1068_v24, %v1067_v23  ;;  %v1069_v26 = vld [vmem:[%s2078_s8 + $0x20] sm:$0xff] }
 0x180   : > { %v524_v29 = vadd.f32 %v1392_v27, %v517_v28  ;;  %v1070_v27 = vld [vmem:[%s2078_s8 + $0x28] sm:$0xff] }
 0x181   : > { %v1590_v28 = vpack.c.bf16 %v1070_v27, %v1069_v26 }
 0x182   : > { %1478 = vmatmul.mubr.msk.f32.vlgmr.msra.gmra.mrb[0].mxu1 %vm533_vm2, %v524_v29  ;;  %v1071_v29 = vld [vmem:[%s2078_s8 + $0x30] sm:$0xff] }
 0x183   : > { %1487 = vmatprep.mubr.msk.f32.mxu1 %vm1754_vm1, %v1755_v13 }
 0x255   : > { %v603_v30 = vpop.f32.mrb[0].mxu1 }
 0x256   : > { %699 = vrot.lane.b32.xlu0 %v603_v30, %s1756_s25  ;;  %609 = vrot.lane.b32.xlu1 %v603_v30, %s1757_s26  ;;  %v1479_v31 = vpop.f32.mrb[1].mxu1  ;;  %v607_v34 = vmul.f32 0.25, %v603_v30 }
 0x25a   : > { %780 = vrot.lane.b32.xlu0 %v603_v30, %s1758_s27 }
 0x2c8   : > { %v700_v32 = vpop.permute.xlu0 %699  ;;  %v610_v33 = vpop.permute.xlu1 %609 }
 0x2c9   : > { %1481 = vmatpush3.xpose.msk.msra.mxu0 %vm611_vm3, %v610_v33  ;;  %1486 = vmatpush3.msk.msra.mxu1 %vm705_vm4, %v700_v32 }
 0x2ca   : > { %1490 = vmatprep.subr.mxu1 %v1755_v13  ;;  %1577 = vmatprep.subr.bf16.mxu0 %v1753_v12 }
 0x2cc   : > { %1483 = vmatmul.mubr.msk.f32.vlgmr.msra.gmra.mrb[0].mxu0 %vm611_vm3, %v607_v34  ;;  %v781_v43 = vpop.permute.xlu0 %780 }
 0x2cd   : > { %1508 = vmatprep.mubr.msk.f32.mxu0 %vm1754_vm1, %v1755_v13  ;;  %1579 = vmatpush3.bf16.msra.mxu0 %v1578_v2  ;;  %v1406_v2 = vld [vmem:[%s2079_s9] ss:$0 sm:$0xff] }
 0x2ce   : > { %1580 = vmatprep.subr.bf16.mxu0 %v1753_v12 }
 0x2d1   : > { %1582 = vmatpush3.bf16.msra.mxu0 %v1581_v4 }
 0x2d2   : > { %1595 = vmatprep.subr.bf16.mxu0 %v1753_v12 }
 0x39f   : > { %v683_v35 = vpop.f32.mrb[0].mxu0 }
 0x3a0   : > { %v1484_v36 = vpop.f32.mrb[1].mxu0  ;;  %v688_v37 = vsel %vm687_vm5, %v683_v35, -inf }
 0x3a1   : > { %689 = vmax.xlane.f32.xlu1 %v688_v37  ;;  %v1404_v36 = vld [vmem:[%s2076_s6] ss:$0 sm:$0xff] }
 0x42e   : > { %v690_v38 = vpop.xlane.xlu1 %689 }
 0x42f   : > { %v691_v39 = vsub.f32 %v683_v35, %v690_v38  ;;  %v1405_v38 = vld [vmem:[%s2077_s7] ss:$0 sm:$0xff] }
 0x431   : > { %v692_v40 = vmul.f32 1.442695, %v691_v39 }
 0x433   : > { %1661 = vpow2.f32 %v692_v40 }
 0x43d   : > { %v1662_v41 = vpop.eup %1661 }
 0x43e   : > { %v694_v42 = vsel %vm687_vm5, %v1662_v41, 0.0 }
 0x43f   : > { %695 = vadd.xlane.f32.xlu0 %v694_v42  ;;  %v1181_v42 = vld [vmem:[#allocation4 + $0x8] sm:$0xff] }
 0x455   : > { %778 = vrot.lane.b32.xlu0 %v607_v34, %s1759_s28 }
 0x4cc   : > { %v696_v44 = vpop.xlane.xlu0 %695 }
 0x4cd   : > { %1663 = vrcp.f32 %v696_v44  ;;  %v1182_v44 = vld [vmem:[#allocation4 + $0x10] sm:$0xff] }
 0x4d0   : > { %v779_v47 = vpop.permute.xlu0 %778 }
 0x4d7   : > { %v1664_v45 = vpop.eup %1663 }
 0x4d8   : > { %v698_v46 = vmul.f32 %v1664_v45, %v1662_v41  ;;  %v1180_v41 = vld [vmem:[#allocation4] sm:$0xff]  ;;  %v1183_v45 = vld [vmem:[#allocation4 + $0x18] sm:$0xff] }
 0x4da   : > { %1488 = vmatmul.mubr.msk.f32.vlgmr.msra.gmra.mrb[2].mxu1 %vm701_vm6, %v698_v46  ;;  %v1599_v46 = vpack.c.bf16 %v1183_v45, %v1182_v44 }
 0x4db   : > { %1491 = vmatpush3.xpose.msk.msra.mxu1 %vm611_vm3, %v781_v43  ;;  %1492 = vmatprep.mubr.msk.f32.mxu1 %vm1754_vm1, %v1755_v13  ;;  %v1596_v43 = vpack.c.bf16 %v1181_v42, %v1180_v41 }
 0x4dc   : > { %1495 = vmatprep.subr.mxu1 %v1755_v13 }
 0x4de   : > { %1493 = vmatmul.mubr.msk.f32.vlgmr.msra.gmra.mrb[4].mxu1 %vm611_vm3, %v779_v47  ;;  %v1184_v47 = vld [vmem:[#allocation4 + $0x20] sm:$0xff] }
 0x4df   : > { %1497 = vmatprep.mubr.msk.f32.mxu1 %vm1754_vm1, %v1755_v13 }
 0x5ad   : > { %v774_v48 = vpop.f32.mrb[2].mxu1 }
 0x5ae   : > { %v1489_v49 = vpop.f32.mrb[3].mxu1 }
 0x5b1   : > { %v852_v50 = vpop.f32.mrb[4].mxu1 }
 0x5b2   : > { %v1494_v51 = vpop.f32.mrb[5].mxu1  ;;  %v856_v52 = vsel %vm687_vm5, %v852_v50, -inf }
 0x5b3   : > { %857 = vmax.xlane.f32.xlu1 %v856_v52  ;;  %v1187_v51 = vld [vmem:[#allocation4 + $0x38] sm:$0xff] }
 0x5c4   : > { %867 = vrot.lane.b32.xlu1 %v603_v30, %s1760_s16  ;;  %v1072_v30 = vld [vmem:[%s2078_s8 + $0x38] sm:$0xff]  ;;  %s492_s16 = scalar_lea.vmem %s2084_s14, %s1389_s17 }
 0x5c5   : > { %v1593_v31 = vpack.c.bf16 %v1072_v30, %v1071_v29 }
 0x640   : > { %v858_v53 = vpop.xlane.xlu1 %857 }
 0x641   : > { %v859_v54 = vsub.f32 %v852_v50, %v858_v53  ;;  %v1186_v50 = vld [vmem:[#allocation4 + $0x30] sm:$0xff]  ;;  %v1188_v53 = vld [vmem:[#allocation4 + $0x40] sm:$0xff] }
 0x642   : > { %v1605_v52 = vpack.c.bf16 %v1187_v51, %v1186_v50 }
 0x643   : > { %v860_v55 = vmul.f32 1.442695, %v859_v54  ;;  %v1189_v54 = vld [vmem:[#allocation4 + $0x48] sm:$0xff] }
 0x644   : > { %v868_v56 = vpop.permute.xlu1 %867 }
 0x645   : > { %1665 = vpow2.f32 %v860_v55  ;;  %1496 = vmatpush3.msk.msra.mxu1 %vm705_vm4, %v868_v56  ;;  %v1608_v55 = vpack.c.bf16 %v1189_v54, %v1188_v53  ;;  %v1190_v56 = vld [vmem:[#allocation4 + $0x50] sm:$0xff] }
 0x646   : > { %1583 = vmatprep.subr.bf16.mxu1 %v1753_v12 }
 0x64f   : > { %v1666_v57 = vpop.eup %1665 }
 0x650   : > { %v862_v58 = vsel %vm687_vm5, %v1666_v57, 0.0 }
 0x651   : > { %863 = vadd.xlane.f32.xlu0 %v862_v58 }
 0x6de   : > { %v864_v59 = vpop.xlane.xlu0 %863 }
 0x6df   : > { %1667 = vrcp.f32 %v864_v59  ;;  %v1192_v59 = vld [vmem:[#allocation4 + $0x60] sm:$0xff] }
 0x6e9   : > { %v1668_v60 = vpop.eup %1667 }
 0x6ea   : > { %v866_v61 = vmul.f32 %v1668_v60, %v1666_v57  ;;  %v1191_v57 = vld [vmem:[#allocation4 + $0x58] sm:$0xff]  ;;  %v1193_v60 = vld [vmem:[#allocation4 + $0x68] sm:$0xff] }
 0x6eb   : > { %v1611_v58 = vpack.c.bf16 %v1191_v57, %v1190_v56 }
 0x6ec   : > { %1498 = vmatmul.mubr.msk.f32.vlgmr.msra.gmra.mrb[6].mxu1 %vm701_vm6, %v866_v61  ;;  %v1614_v61 = vpack.c.bf16 %v1193_v60, %v1192_v59 }
 0x6ed   : > { %1527 = vmatprep.mubr.msk.f32.mxu1 %vm1754_vm1, %v1755_v13 }
 0x7bf   : > { %v940_v5 = vpop.f32.mrb[6].mxu1 }
 0x7c0   : > { %945 = vrot.lane.b32.xlu1 %v940_v5, %s1761_s24  ;;  %v1499_v6 = vpop.f32.mrb[7].mxu1 }
 0x832   : > { %v946_v7 = vpop.permute.xlu1 %945 }
 0x833   : > { %v948_v8 = vsel %vm611_vm3, %v774_v48, %v946_v7  ;;  %v1185_v48 = vld [vmem:[#allocation4 + $0x28] sm:$0xff] }
 0x834   : > { %1509 = vmatmul.mubr.msk.f32.vlgmr.msra.gmra.mrb[2].mxu0 %vm953_vm7, %v948_v8  ;;  %v1602_v49 = vpack.c.bf16 %v1185_v48, %v1184_v47  ;;  %v1410_v47 = vld [vmem:[%s2083_s13] ss:$0 sm:$0xff] }
 0x835   : > { %1562 = vmatprep.mubr.msk.f32.mxu0 %vm1754_vm1, %v1755_v13  ;;  %1597 = vmatpush3.bf16.msra.mxu0 %v1596_v43 }
 0x836   : > { %1598 = vmatprep.subr.bf16.mxu0 %v1753_v12 }
 0x839   : > { %1600 = vmatpush3.bf16.msra.mxu0 %v1599_v46 }
 0x83a   : > { %1601 = vmatprep.subr.bf16.mxu0 %v1753_v12 }
 0x83d   : > { %1603 = vmatpush3.bf16.msra.mxu0 %v1602_v49 }
 0x83e   : > { %1604 = vmatprep.subr.bf16.mxu0 %v1753_v12 }
 0x841   : > { %1606 = vmatpush3.bf16.msra.mxu0 %v1605_v52 }
 0x842   : > { %1607 = vmatprep.subr.bf16.mxu0 %v1753_v12 }
 0x845   : > { %1609 = vmatpush3.bf16.msra.mxu0 %v1608_v55 }
 0x846   : > { %1610 = vmatprep.subr.bf16.mxu0 %v1753_v12 }
 0x849   : > { %1612 = vmatpush3.bf16.msra.mxu0 %v1611_v58 }
 0x84a   : > { %1613 = vmatprep.subr.bf16.mxu0 %v1753_v12 }
 0x84d   : > { %1615 = vmatpush3.bf16.msra.mxu0 %v1614_v61 }
 0x84e   : > { %1616 = vmatprep.subr.bf16.mxu0 %v1753_v12 }
 0x851   : > { %1618 = vmatpush3.bf16.msra.mxu0 %v1617_v1 }
 0x907   : > { %v1023_v9 = vpop.f32.mrb[2].mxu0 }
 0x908   : > { %v1027_v11 = vadd.f32 %v1023_v9, %v1929_v0  ;;  %v1510_v14 = vpop.f32.mrb[3].mxu0  ;;  %v1066_v0 = vld [vmem:[%s2078_s8 + $0x8] sm:$0xff] }
 0x909   : > { %v1584_v22 = vpack.c.bf16 %v1066_v0, %v1065_v21 }
 0x90a   : > { %v1999_v15 = vadd.f32 %v1403_v10, %v1027_v11 }
 0x90b   : > { %1585 = vmatpush3.bf16.msra.mxu1 %v1584_v22 }
 0x90c   : > { %v1038_v16 = vsel %vm496_vm0, %v1999_v15, 0.0  ;;  %1586 = vmatprep.subr.bf16.mxu1 %v1753_v12 }
 0x90d   : > { %1039 = vadd.xlane.f32.xlu1 %v1038_v16 }
 0x90f   : > { %1588 = vmatpush3.bf16.msra.mxu1 %v1587_v25 }
 0x910   : > { %1589 = vmatprep.subr.bf16.mxu1 %v1753_v12 }
 0x913   : > { %1591 = vmatpush3.bf16.msra.mxu1 %v1590_v28 }
 0x914   : > { %1592 = vmatprep.subr.bf16.mxu1 %v1753_v12 }
 0x917   : > { %1594 = vmatpush3.bf16.msra.mxu1 %v1593_v31 }
 0x99a   : > { %v1040_v17 = vpop.xlane.xlu1 %1039 }
 0x99b   : > { %v1041_v18 = vmul.f32 0.015625, %v1040_v17 }
 0x99d   : > { %v1042_v19 = vsub.f32 %v1999_v15, %v1041_v18 }
 0x99f   : > { %v1043_v20 = vmul.f32 %v1042_v19, %v1042_v19 }
 0x9a1   : > { %v1044_v13 = vsel %vm496_vm0, %v1043_v20, 0.0 }
 0x9a2   : > { %1045 = vadd.xlane.f32.xlu0 %v1044_v13 }
 0xa2f   : > { %v1046_v32 = vpop.xlane.xlu0 %1045 }
 0xa30   : > { %v1047_v33 = vmul.f32 0.015625, %v1046_v32  ;;  %v1408_v32 = vld [vmem:[%s2081_s11] ss:$0 sm:$0xff] }
 0xa32   : > { %v1048_v34 = vadd.f32 1e-05, %v1047_v33 }
 0xa34   : > { %1669 = vrsqrt.f32 %v1048_v34 }
 0xa3e   : > { %v1670_v35 = vpop.eup %1669 }
 0xa3f   : > { %v1050_v37 = vmul.f32 %v1670_v35, %v1042_v19 }
 0xa41   : > { %v1057_v39 = vmul.f32 %v1404_v36, %v1050_v37 }
 0xa43   : > { %v1064_v40 = vadd.f32 %v1405_v38, %v1057_v39 }
 0xa45   : > { %1528 = vmatmul.mubr.msk.f32.vlgmr.msra.gmra.mrb[8].mxu1 %vm533_vm2, %v1064_v40 }
 0xb18   : > { %v1149_v3 = vpop.f32.mrb[8].mxu1 }
 0xb19   : > { %v1150_v4 = vadd.f32 %v1406_v2, %v1149_v3  ;;  %v1529_v5 = vpop.f32.mrb[9].mxu1 }
 0xb1b   : > { %v1154_v6 = vmul.f32 0.70710677, %v1150_v4  ;;  %v1153_v28 = vmul.f32 0.5, %v1150_v4 }
 0xb1d   : > { %v1155_v7 = vand.u32 2147483647, %v1154_v6  ;;  %vm1175_vm8 = vcmp.ge.f32.partialorder %v1154_v6, 0.0 }
 0xb1f   : > { %v1156_v8 = vmul.f32 0.3275911, %v1155_v7  ;;  %v1169_v10 = vsub.f32 0.0, %v1155_v7 }
 0xb21   : > { %v1157_v9 = vadd.f32 1.0, %v1156_v8  ;;  %v1170_v14 = vmul.f32 %v1169_v10, %v1155_v7 }
 0xb23   : > { %1671 = vrcp.f32 %v1157_v9  ;;  %v1171_v17 = vmul.f32 1.442695, %v1170_v14 }
 0xb25   : > { %1673 = vpow2.f32 %v1171_v17 }
 0xb2d   : > { %v1672_v11 = vpop.eup %1671 }
 0xb2e   : > { %v1160_v12 = vmul.f32 1.0614054, %v1672_v11 }
 0xb2f   : > { %v1674_v23 = vpop.eup %1673 }
 0xb30   : > { %v1161_v16 = vadd.f32 -1.4531521, %v1160_v12 }
 0xb32   : > { %v1162_v18 = vmul.f32 %v1672_v11, %v1161_v16 }
 0xb34   : > { %v1163_v19 = vadd.f32 1.4214138, %v1162_v18 }
 0xb36   : > { %v1164_v20 = vmul.f32 %v1672_v11, %v1163_v19 }
 0xb38   : > { %v1165_v13 = vadd.f32 -0.28449672, %v1164_v20 }
 0xb3a   : > { %v1166_v21 = vmul.f32 %v1672_v11, %v1165_v13 }
 0xb3c   : > { %v1167_v0 = vadd.f32 0.2548296, %v1166_v21 }
 0xb3e   : > { %v1168_v22 = vmul.f32 %v1672_v11, %v1167_v0 }
 0xb40   : > { %v1173_v24 = vmul.f32 %v1674_v23, %v1168_v22 }
 0xb42   : > { %v1174_v25 = vsub.f32 1.0, %v1173_v24 }
 0xb44   : > { %v1176_v26 = vsub.f32 0.0, %v1174_v25 }
 0xb46   : > { %v1177_v27 = vsel %vm1175_vm8, %v1174_v25, %v1176_v26 }
 0xb47   : > { %v1178_v29 = vadd.f32 1.0, %v1177_v27 }
 0xb49   : > { %v1179_v30 = vmul.f32 %v1178_v29, %v1153_v28 }
 0xb4b   : > { %1563 = vmatmul.mubr.f32.vlgmr.msra.gmra.mrb[4].mxu0 %v1179_v30 }
 0xc1e   : > { %v1262_v31 = vpop.f32.mrb[4].mxu0 }
 0xc1f   : > { %v1266_v33 = vadd.f32 %v1262_v31, %v1999_v15  ;;  %v1564_v34 = vpop.f32.mrb[5].mxu0  ;;  %v1409_v15 = vld [vmem:[%s2082_s12] ss:$0 sm:$0xff] }
 0xc21   : > { %v1274_v35 = vadd.f32 %v1408_v32, %v1266_v33 }
 0xc23   : > { %v1277_v36 = vsel %vm496_vm0, %v1274_v35, 0.0 }
 0xc24   : > { %1278 = vadd.xlane.f32.xlu0 %v1277_v36 }
 0xcb1   : > { %v1279_v37 = vpop.xlane.xlu0 %1278 }
 0xcb2   : > { %v1280_v38 = vmul.f32 0.015625, %v1279_v37 }
 0xcb4   : > { %v1281_v39 = vsub.f32 %v1274_v35, %v1280_v38 }
 0xcb6   : > { %v1282_v40 = vmul.f32 %v1281_v39, %v1281_v39 }
 0xcb8   : > { %v1283_v41 = vsel %vm496_vm0, %v1282_v40, 0.0 }
 0xcb9   : > { %1284 = vadd.xlane.f32.xlu0 %v1283_v41 }
 0xd46   : > { %v1285_v42 = vpop.xlane.xlu0 %1284 }
 0xd47   : > { %v1286_v43 = vmul.f32 0.015625, %v1285_v42 }
 0xd49   : > { %v1287_v44 = vadd.f32 1e-05, %v1286_v43 }
 0xd4b   : > { %1675 = vrsqrt.f32 %v1287_v44 }
 0xd55   : > { %v1676_v45 = vpop.eup %1675 }
 0xd56   : > { %v1289_v46 = vmul.f32 %v1676_v45, %v1281_v39 }
 0xd58   : > { %v1296_v48 = vmul.f32 %v1409_v15, %v1289_v46 }
 0xd5a   : > { %v1303_v49 = vadd.f32 %v1410_v47, %v1296_v48 }
 0xd5c   : > { %1304 = vst.msk [vmem:[%s492_s16] sm:$0x1f] %vm496_vm0, %v1303_v49 }
 0xd5d PF: > { %s2096_s29 = sld [smem:[#allocation8_spill]] }
 0xd63   : > { %s26_s29 = sadd.s32 1, %s2096_s29  }
 0xd64   : > { %p23_p5 = scmp.ge.s32.totalorder %s26_s29, 4  }
 0xd66   :  { %25 = sbr.rel (!%p23_p5) target bundleno = 2 (0x2), region = 115 }
 0xd6d   :  { %1324 = vsyncpa [#allocation3], 1 }
 0xd6e   :  { %1326 = vsyncpa [#allocation3 + $0x1], 1 }
 0xd6f   :  { %1327 = vsyncpa [#allocation5], 1 }

// kernel: _lambda_.7
= control target key start
LH: loop header
LB: loop body
LE: loop exit
PB: predicated region body
PF: predicated region fallthrough
CT: control target
= control target key end

     0   :  { %s2075_s0 = inlined_call_operand.vmem [shape: f32[2,1,64], index: 0, kind: input, shape index: {}]   ;;  %s2076_s1 = inlined_call_operand.vmem [shape: f32[2,8,32], index: 1, kind: input, shape index: {}]   ;;  %s2077_s2 = inlined_call_operand.vmem [shape: f32[64,32], index: 2, kind: input, shape index: {}]   ;;  %s2078_s3 = inlined_call_operand.vmem [shape: f32[1,32], index: 3, kind: input, shape index: {}, may-alias: {3,5,9}]   ;;  %s2079_s4 = inlined_call_operand.vmem [shape: f32[1,32], index: 4, kind: input, shape index: {}]   ;;  %s2080_s5 = inlined_call_operand.vmem [shape: f32[1,32], index: 5, kind: input, shape index: {}, may-alias: {3,5,9}]   ;;  %s2081_s6 = inlined_call_operand.vmem [shape: f32[32,32], index: 6, kind: input, shape index: {}]   ;;  %s2082_s7 = inlined_call_operand.vmem [shape: f32[32,64], index: 7, kind: input, shape index: {}]   ;;  %s2083_s8 = inlined_call_operand.vmem [shape: f32[32,32], index: 8, kind: input, shape index: {}]   ;;  %s2084_s9 = inlined_call_operand.vmem [shape: f32[1,32], index: 9, kind: input, shape index: {}, may-alias: {3,5,9}]   ;;  %s2085_s10 = inlined_call_operand.vmem [shape: f32[32,64], index: 10, kind: input, shape index: {}]   ;;  %s2086_s11 = inlined_call_operand.vmem [shape: f32[1,64], index: 11, kind: input, shape index: {}]   ;;  %s2087_s12 = inlined_call_operand.vmem [shape: f32[2,1,64], index: 12, kind: output, shape index: {0}]   ;;  %s2088_s13 = inlined_call_operand.hbm [shape: f32[2,2,1,9], index: 13, kind: output, shape index: {1}]  }
   0x1   :  { %2089 = sst [smem:[#allocation6_spill]] %s2075_s0 }
   0x2   :  { %2090 = sst [smem:[#allocation7_spill]] %s2077_s2 }
   0x3   :  { %2091 = sst [smem:[#allocation8_spill]] %s2078_s3 }
   0x4   :  { %2092 = sst [smem:[#allocation9_spill]] %s2081_s6 }
   0x5   :  { %19 = vsyncpa [#allocation3], 0 }
   0x6   :  { %21 = vsyncpa [#allocation3 + $0x1], 0  ;;  %s1787_s25 = smov 0   ;;  %s1789_s26 = smov 0  }
   0x7   :  { %s1791_s27 = smov 0   ;;  %s1793_s28 = smov 0  }
   0x8 LB: > { %s1808_s29 = sadd.s32 4294967295, %s1705_s28   ;;  %s1354_s30 = sadd.s32 4294967294, %s1705_s28   ;;  %s1705_s28 = sphi %s1793_s28, %s2108_s28   ;;  %s1701_s27 = sphi %s1791_s27, %s2107_s27   ;;  %s1697_s26 = sphi %s1789_s26, %s2106_s26   ;;  %s1693_s25 = sphi %s1787_s25, %s2105_s25  }
   0x9   : > { %s1812_s14 = sadd.s32 1, %s1705_s28   ;;  %s322_s15 = sadd.s32 1, %s1701_s27 }
   0xa   : > { %s319_s16 = ssub.s32 %s1705_s28, %s1812_s14  ;;  %p332_p0 = scmp.ne.s32.totalorder %s1701_s27, %s1697_s26 }
   0xb   : > { %p320_p1 = scmp.eq.s32.totalorder %s319_s16, 0  ;;  %p333_p2 = scmp.eq.s32.totalorder %s1808_s29, 1 }
   0xc   : > { %p338_p3 = scmp.ne.s32.totalorder %s1697_s26, %s1693_s25  ;;  %p339_p4 = scmp.eq.s32.totalorder %s1354_s30, 1 }
   0xd   : > { %s1823_s17 = scalar_select %p320_p1, %s1701_s27, %s322_s15  }
   0xe   : > { %p1825_p5 = por %p333_p2, %p332_p0  ;;  %p1829_p6 = por %p339_p4, %p338_p3 }
   0xf   : > { %2093 = sst [smem:[#allocation5_spill]] %s1823_s17  ;;  %p1357_p7 = scmp.ge.s32.totalorder %s1705_s28, 1 }
  0x10   : > { %p400_p8 = scmp.lt.s32.totalorder %s1705_s28, 3 }
  0x12   : > { %p401_p9 = pnand %p1357_p7, %p400_p8 }
  0x13   : > { %s2096_s2 = sld [smem:[#allocation7_spill]] (!%p401_p9)  ;;  %v1707_v3 = vmov (!%p401_p9), 0.0|0.0   ;;  %vm1708_vm0 = vmmov (!%p401_p9), 0   ;;  %v1709_v6 = vmov (!%p401_p9), 0.0   ;;  %p449_p10 = scmp.lt.s32.totalorder (!%p401_p9), %s1808_s29, 1  ;;  %vm470_vm1 = vcmask (!%p401_p9), 523264  }
  0x14   : > { %404 = sbr.rel (%p401_p9) target bundleno = 2619 (0xa3b), region = 68  ;;  %1516 = vmatprep.subr.bf16.mxu0 (!%p401_p9), %v1707_v3  ;;  %1441 = vmatprep.mubr.msk.f32.mxu0 (!%p401_p9), %vm1708_vm0, %v1709_v6  ;;  %s2097_s0 = sld [smem:[#allocation6_spill]] (!%p401_p9)  ;;  %vm546_vm2 = vcmask (!%p401_p9), 253952   ;;  %v647_v30 = vld [vmem:[%s2082_s7] sm:$0xff] (!%p401_p9)  ;;  %v648_v31 = vld [vmem:[%s2082_s7 + $0x8] sm:$0xff] (!%p401_p9)  ;;  %v649_v42 = vld [vmem:[%s2082_s7 + $0x10] sm:$0xff] (!%p401_p9) }
  0x15   : > { %1528 = vmatprep.subr.bf16.mxu1 (!%p401_p9), %v1707_v3  ;;  %1452 = vmatprep.mubr.msk.f32.mxu1 (!%p401_p9), %vm1708_vm0, %v1709_v6  ;;  %s2098_s3 = sld [smem:[#allocation8_spill]] (!%p401_p9)  ;;  %s2099_s6 = sld [smem:[#allocation9_spill]] (!%p401_p9)  ;;  %v1534_v33 = vpack.c.bf16 (!%p401_p9), %v648_v31, %v647_v30  ;;  %v544_v38 = vld [vmem:[%s2079_s4] sm:$0x1] (!%p401_p9)  ;;  %v650_v43 = vld [vmem:[%s2082_s7 + $0x18] sm:$0xff] (!%p401_p9)  ;;  %vm572_vm3 = vcmask (!%p401_p9), 261120  }
  0x16   : > { %v545_v41 = vld [vmem:[%s2080_s5] sm:$0x1] (!%p401_p9)  ;;  %vm566_vm4 = vcmask (!%p401_p9), 1040384   ;;  %v1538_v47 = vpack.c.bf16 (!%p401_p9), %v650_v43, %v649_v42  ;;  %vm731_vm5 = vcmask (!%p401_p9), 130048   ;;  %vm1711_vm7 = vmmov (!%p401_p9), 1   ;;  %s1714_s23 = smov (!%p401_p9), 16  }
  0x17   : > { %vm1929_vm6 = vmpackc.low (!%p401_p9), %vm731_vm5, %vm731_vm5  ;;  %vm811_vm9 = vcmask (!%p401_p9), 65536   ;;  %vm829_vm10 = vcmask (!%p401_p9), 72704  }
  0x18   : > { %vm1943_vm8 = vmpackc.low (!%p401_p9), %vm566_vm4, %vm1711_vm7 }
  0x19   : > { %v461_v0 = vld [vmem:[%s2096_s2] sm:$0xff] (!%p401_p9)  ;;  %v462_v1 = vld [vmem:[%s2096_s2 + $0x8] sm:$0xff] (!%p401_p9)  ;;  %v463_v2 = vld [vmem:[%s2096_s2 + $0x10] sm:$0xff] (!%p401_p9) }
  0x1a   : > { %v1517_v4 = vpack.c.bf16 (!%p401_p9), %v462_v1, %v461_v0  ;;  %v464_v5 = vld [vmem:[%s2096_s2 + $0x18] sm:$0xff] (!%p401_p9)  ;;  %v465_v8 = vld [vmem:[%s2096_s2 + $0x20] sm:$0xff] (!%p401_p9)  ;;  %v466_v9 = vld [vmem:[%s2096_s2 + $0x28] sm:$0xff] (!%p401_p9) }
  0x1b   : > { %v1520_v7 = vpack.c.bf16 %v464_v5, %v463_v2  ;;  %v1523_v10 = vpack.c.bf16 %v466_v9, %v465_v8  ;;  %v467_v11 = vld [vmem:[%s2096_s2 + $0x30] sm:$0xff]  ;;  %v468_v12 = vld [vmem:[%s2096_s2 + $0x38] sm:$0xff]  ;;  %s1869_s17 = scalar_select %p449_p10, %s1808_s29, 1  ;;  %v469_v15 = vld [vmem:[%s2098_s3] sm:$0x1] }
  0x1c   : > { %1518 = vmatpush3.bf16.msra.mxu0 %v1517_v4  ;;  %v1526_v13 = vpack.c.bf16 %v468_v12, %v467_v11  ;;  %v568_v25 = vld [vmem:[%s2099_s6] sm:$0xff]  ;;  %v569_v26 = vld [vmem:[%s2099_s6 + $0x8] sm:$0xff]  ;;  %v570_v27 = vld [vmem:[%s2099_s6 + $0x10] sm:$0xff]  ;;  %s1710_s3 = smov 96  }
  0x1d   : > { %1519 = vmatprep.subr.bf16.mxu0 %v1707_v3  ;;  %s451_s22 = scalar_lea.vmem %s2097_s0, %s1869_s17  ;;  %v1529_v28 = vpack.c.bf16 %v569_v26, %v568_v25  ;;  %v571_v29 = vld [vmem:[%s2099_s6 + $0x18] sm:$0xff]  ;;  %s1359_s16 = sshll.u32 %s1869_s17, 3 }
  0x1e   : > { %v1876_v14 = vld [vmem:[%s451_s22] sm:$0x1]  ;;  %v1532_v32 = vpack.c.bf16 %v571_v29, %v570_v27  ;;  %s455_s0 = scalar_lea.vmem %s2076_s1, %s1359_s16  ;;  %s1712_s6 = smov 112  }
  0x1f   : > { %1530 = vmatpush3.bf16.msra.mxu1 %v1529_v28  ;;  %v460_v39 = vld [vmem:[%s455_s0] sm:$0xff]  ;;  %s446_s16 = sand.u32 1, %s1697_s26   ;;  %s1713_s0 = smov 80  }
  0x20   : > { %1521 = vmatpush3.bf16.msra.mxu0 %v1520_v7  ;;  %1531 = vmatprep.subr.bf16.mxu1 %v1707_v3  ;;  %v564_v45 = vrot.slane %v460_v39, 7  ;;  %s1358_s20 = sshll.u32 %s446_s16, 1  ;;  %s2024_s15 = scalar_lea.sflag [#allocation3], %s446_s16 }
  0x21   : > { %1522 = vmatprep.subr.bf16.mxu0 %v1707_v3  ;;  %s1957_s21 = scalar_lea.vmem [#allocation2], %s1358_s20 }
  0x22   : > { %s1264_s2 = sshll.u32 %s1957_s21, 4  ;;  %s2020_s2 = int_to_ptr.vmem [resolvable:$true] %s1264_s2 }
  0x23   : > { %1533 = vmatpush3.bf16.msra.mxu1 %v1532_v32 }
  0x24   : > { %1524 = vmatpush3.bf16.msra.mxu0 %v1523_v10  ;;  %1535 = vmatprep.subr.bf16.mxu1 %v1534_v33 }
  0x25   : > { %1525 = vmatprep.subr.bf16.mxu0 %v1707_v3 }
  0x28   : > { %1527 = vmatpush3.bf16.msra.mxu0 %v1526_v13 }
  0x29   : > { %1542 = vmatprep.subr.bf16.mxu0 %v1707_v3 }
  0x2b   : > { %1442 = vmatmul.mubr.msk.f32.vlgmr.msra.gmra.mrb[0].mxu0 %vm470_vm1, %v1876_v14 }
  0x2c   : > { %1470 = vmatprep.mubr.msk.f32.mxu0 %vm1708_vm0, %v1709_v6 }
  0xfe   : > { %v540_v16 = vpop.f32.mrb[0].mxu0 }
  0xff   : > { %v541_v17 = vadd.f32 %v540_v16, %v469_v15  ;;  %v1443_v18 = vpop.f32.mrb[1].mxu0 }
 0x101   : > { %v547_v19 = vsel %vm546_vm2, %v541_v17, 0.0 }
 0x102   : > { %548 = vadd.xlane.f32.xlu0 %v547_v19 }
 0x18f   : > { %v549_v20 = vpop.xlane.xlu0 %548 }
 0x190   : > { %v551_v21 = vmul.f32 0.03125, %v549_v20 }
 0x192   : > { %v552_v22 = vsub.f32 %v541_v17, %v551_v21 }
 0x194   : > { %v553_v23 = vmul.f32 %v552_v22, %v552_v22 }
 0x196   : > { %v554_v24 = vsel %vm546_vm2, %v553_v23, 0.0 }
 0x197   : > { %555 = vadd.xlane.f32.xlu0 %v554_v24 }
 0x224   : > { %v556_v34 = vpop.xlane.xlu0 %555 }
 0x225   : > { %v557_v35 = vmul.f32 0.03125, %v556_v34  ;;  %v1085_v34 = vld [vmem:[%s2083_s8] sm:$0xff] }
 0x227   : > { %v558_v36 = vadd.f32 1e-05, %v557_v35  ;;  %v1086_v35 = vld [vmem:[%s2083_s8 + $0x8] sm:$0xff] }
 0x229   : > { %1633 = vrsqrt.f32 %v558_v36  ;;  %v1087_v36 = vld [vmem:[%s2083_s8 + $0x10] sm:$0xff] }
 0x233   : > { %v1634_v37 = vpop.eup %1633 }
 0x234   : > { %v560_v40 = vmul.f32 %v1634_v37, %v552_v22  ;;  %v1559_v37 = vpack.c.bf16 %v1086_v35, %v1085_v34 }
 0x236   : > { %v561_v44 = vmul.f32 %v560_v40, %v544_v38  ;;  %v1088_v38 = vld [vmem:[%s2083_s8 + $0x18] sm:$0xff]  ;;  %v1164_v40 = vld [vmem:[%s2085_s10 + $0x8] sm:$0xff] }
 0x237   : > { %v1562_v39 = vpack.c.bf16 %v1088_v38, %v1087_v36 }
 0x238   : > { %v562_v46 = vadd.f32 %v561_v44, %v545_v41 }
 0x23a   : > { %1453 = vmatmul.mubr.msk.f32.vlgmr.msra.gmra.mrb[0].mxu1 %vm572_vm3, %v562_v46  ;;  %v567_v48 = vsel %vm566_vm4, %v562_v46, %v564_v45  ;;  %v1165_v46 = vld [vmem:[%s2085_s10 + $0x10] sm:$0xff] }
 0x23b   : > { %1537 = vmatpush3.bf16.msra.mxu1 %v1534_v33  ;;  %1463 = vmatprep.mubr.msk.f32.mxu1 %vm572_vm3, %v567_v48  ;;  %v1089_v48 = vld [vmem:[%s2084_s9] sm:$0x1] }
 0x23c   : > { %1539 = vmatprep.subr.bf16.mxu1 %v1538_v47 }
 0x23f   : > { %1541 = vmatpush3.bf16.msra.mxu1 %v1538_v47 }
 0x240   : > { %1546 = vmatprep.subr.bf16.mxu1 %v1707_v3 }
 0x242   : > { %1464 = vmatmul.mubr.msk.f32.vlgmr.msra.gmra.mrb[2].mxu1 %vm572_vm3, %v564_v45 }
 0x243   : > { %1477 = vmatprep.mubr.msk.f32.mxu1 %vm1708_vm0, %v1709_v6 }
 0x30d   : > { %v642_v49 = vpop.f32.mrb[0].mxu1 }
 0x30e   : > { %v1454_v50 = vpop.f32.mrb[1].mxu1  ;;  %v646_v56 = vmul.f32 0.25, %v642_v49 }
 0x315   : > { %v1465_v51 = vpop.f32.mrb[2].mxu1 }
 0x316   : > { %v722_v52 = vpop.f32.mrb[3].mxu1 }
 0x317   : > { %v1543_v54 = vpack.c.bf16 %v1465_v51, %v722_v52  ;;  %v1933_v55 = vpack.i.bf16 %v1465_v51, %v722_v52 }
 0x319   : > { %1619 = vrot.lane.b32.xlu0 %v1933_v55, %s1710_s3  ;;  %1545 = vmatpush3.bf16.xpose.msk.msra.mxu0 %vm1929_vm6, %v1543_v54  ;;  %s1643_s3 = scalar_lea.vmem %s2020_s2, 32 }
 0x31a   : > { %1554 = vmatprep.subr.bf16.mxu0 %v1707_v3  ;;  %p1644_p11 = scmp.ne.s32.totalorder %s2020_s2, %s1643_s3 }
 0x31c   : > { %p1645_p12 = pnand %p1644_p11, %p1825_p5 }
 0x31e   : > { %p1646_p13 = pneg %p1645_p12 }
 0x320   : > { %1471 = vmatmul.mubr.msk.f32.vlgmr.msra.gmra.mrb[2].mxu0 %vm731_vm5, %v646_v56 }
 0x321   : > { %1491 = vmatprep.mubr.msk.f32.mxu0 %vm1708_vm0, %v1709_v6 }
 0x38b   : > { %v1620_v57 = vpop.permute.xlu0 %1619 }
 0x38c   : > { %v1622_v58 = vunpack.i.h.bf16 %v1620_v57  ;;  %v1621_v59 = vunpack.i.l.bf16 %v1620_v57 }
 0x38e   : > { %v1547_v61 = vpack.c.bf16 %v1622_v58, %v1621_v59 }
 0x390   : > { %1549 = vmatpush3.bf16.msk.msra.mxu1 %vm1943_vm8, %v1547_v61 }
 0x391   : > { %1550 = vmatprep.subr.bf16.mxu1 %v1707_v3 }
 0x3f3   : > { %v807_v62 = vpop.f32.mrb[2].mxu0 }
 0x3f4   : > { %v1472_v63 = vpop.f32.mrb[3].mxu0  ;;  %v812_v0 = vsel %vm811_vm9, %v807_v62, -inf }
 0x3f5   : > { %813 = vmax.xlane.f32.xlu1 %v812_v0 }
 0x406   : > { %1624 = vrot.lane.b32.xlu1 %v1933_v55, %s1712_s6 }
 0x482   : > { %v814_v1 = vpop.xlane.xlu1 %813 }
 0x483   : > { %v815_v2 = vsub.f32 %v807_v62, %v814_v1 }
 0x485   : > { %v816_v4 = vmul.f32 1.442695, %v815_v2 }
 0x486   : > { %v1625_v8 = vpop.permute.xlu1 %1624 }
 0x487   : > { %1635 = vpow2.f32 %v816_v4  ;;  %v1627_v10 = vunpack.i.h.bf16 %v1625_v8  ;;  %v1626_v11 = vunpack.i.l.bf16 %v1625_v8 }
 0x489   : > { %v1551_v15 = vpack.c.bf16 %v1627_v10, %v1626_v11 }
 0x491   : > { %v1636_v5 = vpop.eup %1635 }
 0x492   : > { %v818_v7 = vsel %vm811_vm9, %v1636_v5, 0.0 }
 0x493   : > { %819 = vadd.xlane.f32.xlu1 %v818_v7 }
 0x4a4   : > { %905 = vrot.lane.b32.xlu1 %v646_v56, %s1712_s6 }
 0x520   : > { %v820_v9 = vpop.xlane.xlu1 %819 }
 0x521   : > { %1637 = vrcp.f32 %v820_v9 }
 0x524   : > { %v906_v16 = vpop.permute.xlu1 %905 }
 0x52b   : > { %v1638_v12 = vpop.eup %1637 }
 0x52c   : > { %v822_v13 = vmul.f32 %v1638_v12, %v1636_v5 }
 0x52e   : > { %1478 = vmatmul.mubr.msk.f32.vlgmr.msra.gmra.mrb[4].mxu1 %vm829_vm10, %v822_v13  ;;  %823 = vst.msk [vmem:[%s1957_s21] sm:$0x1] %vm811_vm9, %v822_v13 }
 0x52f   : > { %1553 = vmatpush3.bf16.xpose.msk.msra.mxu1 %vm1929_vm6, %v1551_v15  ;;  %1484 = vmatprep.mubr.msk.f32.mxu1 %vm1708_vm0, %v1709_v6 }
 0x530   : > { %1564 = vmatprep.subr.bf16.mxu1 %v1707_v3 }
 0x536   : > { %1485 = vmatmul.mubr.msk.f32.vlgmr.msra.gmra.mrb[6].mxu1 %vm731_vm5, %v906_v16 }
 0x537   : > { %1513 = vmatprep.mubr.msk.f32.mxu1 %vm1708_vm0, %v1709_v6 }
 0x601   : > { %v901_v17 = vpop.f32.mrb[4].mxu1 }
 0x602   : > { %v1479_v18 = vpop.f32.mrb[5].mxu1 }
 0x609   : > { %v983_v19 = vpop.f32.mrb[6].mxu1 }
 0x60a   : > { %v1486_v20 = vpop.f32.mrb[7].mxu1  ;;  %v987_v21 = vsel %vm811_vm9, %v983_v19, -inf }
 0x60b   : > { %988 = vmax.xlane.f32.xlu1 %v987_v21 }
 0x698   : > { %v989_v22 = vpop.xlane.xlu1 %988 }
 0x699   : > { %v990_v23 = vsub.f32 %v983_v19, %v989_v22 }
 0x69b   : > { %v991_v24 = vmul.f32 1.442695, %v990_v23 }
 0x69d   : > { %1639 = vpow2.f32 %v991_v24 }
 0x6a7   : > { %v1640_v25 = vpop.eup %1639 }
 0x6a8   : > { %v993_v26 = vsel %vm811_vm9, %v1640_v25, 0.0 }
 0x6a9   : > { %994 = vadd.xlane.f32.xlu0 %v993_v26 }
 0x6bf   : > { %1629 = vrot.lane.b32.xlu0 %v1933_v55, %s1713_s0  ;;  %s1382_s0 = sshll.u32 %s1808_s29, 5  ;;  %s1715_s29 = smov [#allocation2]  }
 0x6c0   : > { %s2018_s30 = scalar_lea.hbm %s2088_s13, %s1382_s0 }
 0x736   : > { %v995_v27 = vpop.xlane.xlu0 %994 }
 0x737   : > { %1641 = vrcp.f32 %v995_v27 }
 0x73a   : > { %v1630_v28 = vpop.permute.xlu0 %1629 }
 0x73b   : > { %v1632_v29 = vunpack.i.h.bf16 %v1630_v28  ;;  %v1631_v30 = vunpack.i.l.bf16 %v1630_v28 }
 0x73d   : > { %v1555_v31 = vpack.c.bf16 %v1632_v29, %v1631_v30 }
 0x73f   : > { %1557 = vmatpush3.bf16.msk.msra.mxu0 %vm1943_vm8, %v1555_v31 }
 0x740   : > { %1558 = vmatprep.subr.bf16.mxu0 %v1707_v3 }
 0x741   : > { %v1642_v32 = vpop.eup %1641 }
 0x742   : > { %v997_v33 = vmul.f32 %v1642_v32, %v1640_v25 }
 0x744   : > { %1492 = vmatmul.mubr.msk.f32.vlgmr.msra.gmra.mrb[4].mxu0 %vm829_vm10, %v997_v33  ;;  %1372 = vst.msk [vmem:[%s1957_s21 + $0x1] sm:$0x1] %vm811_vm9, %v997_v33  ;;  %s1647_s21 = sshll.u32 %s1715_s29, 4  ;;  %s1648_s21 = int_to_ptr.vmem [resolvable:$false] %s1647_s21 }
 0x745   : > { %1502 = vmatprep.mubr.msk.f32.mxu0 %vm1708_vm0, %v1709_v6  ;;  %1560 = vmatpush3.bf16.msra.mxu0 %v1559_v37  ;;  %v1163_v6 = vld [vmem:[%s2085_s10] sm:$0xff]  ;;  %s1649_s6 = scalar_lea.vmem %s1648_s21, 64  ;;  %p1650_p0 = scmp.lt.s32.totalorder %s2020_s2, %s1648_s21 }
 0x746   : > { %1561 = vmatprep.subr.bf16.mxu0 %v1707_v3  ;;  %v1565_v41 = vpack.c.bf16 %v1164_v40, %v1163_v6  ;;  %p1651_p1 = scmp.lt.s32.totalorder %s1649_s6, %s1643_s3 }
 0x748   : > { %1566 = vmatpush3.bf16.msra.mxu1 %v1565_v41  ;;  %p1652_p2 = por %p1651_p1, %p1650_p0 }
 0x749   : > { %1563 = vmatpush3.bf16.msra.mxu0 %v1562_v39  ;;  %1567 = vmatprep.subr.bf16.mxu1 %v1707_v3  ;;  %v1166_v3 = vld [vmem:[%s2085_s10 + $0x18] sm:$0xff] }
 0x74a   : > { %v1568_v47 = vpack.c.bf16 %v1166_v3, %v1165_v46  ;;  %p1653_p3 = pnand %p1652_p2, %p1646_p13 }
 0x74c   : > { %1569 = vmatpush3.bf16.msra.mxu1 %v1568_v47 }
 0x817   : > { %v1076_v42 = vpop.f32.mrb[4].mxu0 }
 0x818   : > { %1081 = vrot.lane.b32.xlu1 %v1076_v42, %s1714_s23  ;;  %v1493_v43 = vpop.f32.mrb[5].mxu0 }
 0x88a   : > { %v1082_v44 = vpop.permute.xlu1 %1081 }
 0x88b   : > { %v1084_v45 = vsel %vm731_vm5, %v901_v17, %v1082_v44 }
 0x88c   : > { %1503 = vmatmul.mubr.msk.f32.vlgmr.msra.gmra.mrb[6].mxu0 %vm572_vm3, %v1084_v45 }
 0x95f   : > { %v1159_v49 = vpop.f32.mrb[6].mxu0 }
 0x960   : > { %v1160_v50 = vadd.f32 %v1159_v49, %v1089_v48  ;;  %v1504_v51 = vpop.f32.mrb[7].mxu0 }
 0x962   : > { %1514 = vmatmul.mubr.msk.f32.vlgmr.msra.gmra.mrb[8].mxu1 %vm572_vm3, %v1160_v50 }
 0x963   : > { %1656 = shalt.err (!%p1653_p3)
}
 0x964   : > { %s1657_s16 = scalar_lea.hbm %s2018_s30, 32  ;;  %s1661_s22 = scalar_lea.hbm %s2088_s13, 64 }
 0x965   : > { %p1658_p4 = scmp.ne.s32.totalorder %s2018_s30, %s1657_s16  ;;  %p1662_p9 = scmp.lt.u32.totalorder %s2018_s30, %s2088_s13 }
 0x966   : > { %p1663_p10 = scmp.lt.u32.totalorder %s1661_s22, %s1657_s16  ;;  %p1665_p12 = scmp.lt.u32.totalorder %s1657_s16, %s2018_s30 }
 0x967   : > { %p1659_p7 = pnand %p1658_p4, %p1825_p5 }
 0x968   : > { %p1664_p11 = por %p1663_p10, %p1662_p9 }
 0x969   : > { %p1660_p8 = pneg %p1659_p7 }
 0x96a   : > { %p1666_p13 = por %p1665_p12, %p1664_p11 }
 0x96c   : > { %p1667_p0 = pnand %p1666_p13, %p1660_p8 }
 0x96e   : > { %1670 = shalt.err (!%p1667_p0)
}
 0x96f   : > { %s1716_s3 = smov 1   ;;  %v1167_v52 = vld [vmem:[%s2086_s11] sm:$0x1]  ;;  %s458_s0 = scalar_lea.vmem %s2087_s12, %s1869_s17  ;;  %vm1242_vm11 = vcmask 516096  }
 0x970   : > { %1570 = dma.vmem_to_hbm [thread:$0]  (%p1825_p5), %s2020_s2, 32, %s2018_s30, %s2024_s15, %s1714_s23, %s1714_s23, %s1716_s3  }
 0xa35   : > { %v1237_v53 = vpop.f32.mrb[8].mxu1 }
 0xa36   : > { %v1238_v54 = vadd.f32 %v1237_v53, %v1167_v52  ;;  %v1515_v55 = vpop.f32.mrb[9].mxu1 }
 0xa38   : > { %v1241_v56 = vadd.f32 %v1238_v54, %v1876_v14 }
 0xa3a   : > { %1243 = vst.msk [vmem:[%s458_s0] sm:$0x1] %vm1242_vm11, %v1241_v56 }
 0xa3b PF: > { %p1576_p5 = scmp.ge.s32.totalorder %s1705_s28, 2  ;;  %s1285_s18 = sand.u32 1, %s1693_s25  }
 0xa3c   : > { %s1286_s23 = scalar_lea.sflag [#allocation3], %s1285_s18 }
 0xa3d   : > { %p1573_p1 = pnand %p1576_p5, %p1829_p6 }
 0xa3f   : > { %1688 = dma.done.wait (!%p1573_p1), %s1286_s23, 32  }
 0xa40   : > { %1690 = vsyncadd (!%p1573_p1), %s1286_s23, 4294967264  ;;  %s2104_s2 = sld [smem:[#allocation5_spill]]  ;;  %p24_p2 = scmp.ge.s32.totalorder %s1812_s14, 4  }
 0xa41   : > { %s2105_s25 = smov %s1697_s26  ;;  %s2106_s26 = smov %s1701_s27 }
 0xa42   : > { %s2108_s28 = smov %s1812_s14  ;;  %26 = sbr.rel (!%p24_p2) target bundleno = 8 (0x8), region = 119 }
 0xa46   : > { %s2107_s27 = smov %s2104_s2 }
 0xa49   :  { %1291 = vsyncpa [#allocation3], 1 }
 0xa4a   :  { %1293 = vsyncpa [#allocation3 + $0x1], 1 }

// kernel: _lambda_.6
= control target key start
LH: loop header
LB: loop body
LE: loop exit
PB: predicated region body
PF: predicated region fallthrough
CT: control target
= control target key end

     0   :  { %s2058_s0 = inlined_call_operand.vmem [shape: f32[2,1,32], index: 0, kind: input, shape index: {}]   ;;  %s2059_s1 = inlined_call_operand.vmem [shape: f32[2,4,64], index: 1, kind: input, shape index: {}]   ;;  %s2060_s2 = inlined_call_operand.vmem [shape: f32[32,64], index: 2, kind: input, shape index: {}]   ;;  %s2061_s3 = inlined_call_operand.vmem [shape: f32[1,64], index: 3, kind: input, shape index: {}, may-alias: {3,5,9}]   ;;  %s2062_s4 = inlined_call_operand.vmem [shape: f32[1,64], index: 4, kind: input, shape index: {}]   ;;  %s2063_s5 = inlined_call_operand.vmem [shape: f32[1,64], index: 5, kind: input, shape index: {}, may-alias: {3,5,9}]   ;;  %s2064_s6 = inlined_call_operand.vmem [shape: f32[64,32], index: 6, kind: input, shape index: {}]   ;;  %s2065_s7 = inlined_call_operand.vmem [shape: f32[64,64], index: 7, kind: input, shape index: {}]   ;;  %s2066_s8 = inlined_call_operand.vmem [shape: f32[32,64], index: 8, kind: input, shape index: {}]   ;;  %s2067_s9 = inlined_call_operand.vmem [shape: f32[1,64], index: 9, kind: input, shape index: {}, may-alias: {3,5,9}]   ;;  %s2068_s10 = inlined_call_operand.vmem [shape: f32[64,32], index: 10, kind: input, shape index: {}]   ;;  %s2069_s11 = inlined_call_operand.vmem [shape: f32[1,32], index: 11, kind: input, shape index: {}]   ;;  %s2070_s12 = inlined_call_operand.vmem [shape: f32[2,1,32], index: 12, kind: output, shape index: {0}]   ;;  %s2071_s13 = inlined_call_operand.hbm [shape: f32[2,2,1,5], index: 13, kind: output, shape index: {1}]  }
   0x1   :  { %2073 = sst [smem:[#allocation6_spill]] %s2058_s0 }
   0x2   :  { %2074 = sst [smem:[#allocation7_spill]] %s2060_s2 }
   0x3   :  { %2075 = sst [smem:[#allocation8_spill]] %s2061_s3 }
   0x4   :  { %19 = vsyncpa [#allocation3], 0 }
   0x5   :  { %21 = vsyncpa [#allocation3 + $0x1], 0  ;;  %s1761_s25 = smov 0   ;;  %s1763_s26 = smov 0  }
   0x6   :  { %s1765_s27 = smov 0   ;;  %s1767_s28 = smov 0  }
   0x7 LB: > { %s1782_s29 = sadd.s32 4294967295, %s1680_s28   ;;  %s1343_s30 = sadd.s32 4294967294, %s1680_s28   ;;  %s1680_s28 = sphi %s1767_s28, %s2087_s28   ;;  %s1676_s27 = sphi %s1765_s27, %s2086_s27   ;;  %s1672_s26 = sphi %s1763_s26, %s2085_s26   ;;  %s1668_s25 = sphi %s1761_s25, %s2084_s25  }
   0x8   : > { %s1786_s14 = sadd.s32 1, %s1680_s28   ;;  %s322_s15 = sadd.s32 1, %s1676_s27 }
   0x9   : > { %s319_s16 = ssub.s32 %s1680_s28, %s1786_s14  ;;  %p332_p0 = scmp.ne.s32.totalorder %s1676_s27, %s1672_s26 }
   0xa   : > { %p320_p1 = scmp.eq.s32.totalorder %s319_s16, 0  ;;  %p333_p2 = scmp.eq.s32.totalorder %s1782_s29, 1 }
   0xb   : > { %p338_p3 = scmp.ne.s32.totalorder %s1672_s26, %s1668_s25  ;;  %p339_p4 = scmp.eq.s32.totalorder %s1343_s30, 1 }
   0xc   : > { %s1797_s17 = scalar_select %p320_p1, %s1676_s27, %s322_s15  }
   0xd   : > { %p1799_p5 = por %p333_p2, %p332_p0  ;;  %p1803_p6 = por %p339_p4, %p338_p3 }
   0xe   : > { %2076 = sst [smem:[#allocation5_spill]] %s1797_s17  ;;  %p1346_p7 = scmp.ge.s32.totalorder %s1680_s28, 1 }
   0xf   : > { %p400_p8 = scmp.lt.s32.totalorder %s1680_s28, 3 }
  0x11   : > { %p401_p9 = pnand %p1346_p7, %p400_p8 }
  0x12   : > { %s2079_s2 = sld [smem:[#allocation7_spill]] (!%p401_p9)  ;;  %v1682_v3 = vmov (!%p401_p9), 0.0|0.0   ;;  %vm1683_vm0 = vmmov (!%p401_p9), 0   ;;  %v1684_v6 = vmov (!%p401_p9), 0.0   ;;  %p449_p10 = scmp.lt.s32.totalorder (!%p401_p9), %s1782_s29, 1  ;;  %vm466_vm1 = vcmask (!%p401_p9), 261120  }
  0x13   : > { %404 = sbr.rel (%p401_p9) target bundleno = 2178 (0x882), region = 68  ;;  %1513 = vmatprep.subr.bf16.mxu0 (!%p401_p9), %v1682_v3  ;;  %1422 = vmatprep.mubr.msk.f32.mxu0 (!%p401_p9), %vm1683_vm0, %v1684_v6  ;;  %s2080_s0 = sld [smem:[#allocation6_spill]] (!%p401_p9)  ;;  %vm542_vm2 = vcmask (!%p401_p9), 516096   ;;  %v564_v19 = vld [vmem:[%s2064_s6] sm:$0xff] (!%p401_p9)  ;;  %v565_v20 = vld [vmem:[%s2064_s6 + $0x8] sm:$0xff] (!%p401_p9)  ;;  %v566_v24 = vld [vmem:[%s2064_s6 + $0x10] sm:$0xff] (!%p401_p9) }
  0x14   : > { %1519 = vmatprep.subr.bf16.mxu1 (!%p401_p9), %v1682_v3  ;;  %1441 = vmatprep.mubr.msk.f32.mxu1 (!%p401_p9), %vm1683_vm0, %v1684_v6  ;;  %s2081_s3 = sld [smem:[#allocation8_spill]] (!%p401_p9)  ;;  %v1520_v21 = vpack.c.bf16 (!%p401_p9), %v565_v20, %v564_v19  ;;  %v647_v22 = vld [vmem:[%s2065_s7] sm:$0xff] (!%p401_p9)  ;;  %v648_v23 = vld [vmem:[%s2065_s7 + $0x8] sm:$0xff] (!%p401_p9)  ;;  %v567_v26 = vld [vmem:[%s2064_s6 + $0x18] sm:$0xff] (!%p401_p9)  ;;  %vm572_vm3 = vcmask (!%p401_p9), 523264   ;;  %vm562_vm4 = vcmask (!%p401_p9), 1040384  }
  0x15   : > { %v1532_v25 = vpack.c.bf16 (!%p401_p9), %v648_v23, %v647_v22  ;;  %v649_v27 = vld [vmem:[%s2065_s7 + $0x10] sm:$0xff] (!%p401_p9)  ;;  %v650_v28 = vld [vmem:[%s2065_s7 + $0x18] sm:$0xff] (!%p401_p9)  ;;  %v1523_v29 = vpack.c.bf16 (!%p401_p9), %v567_v26, %v566_v24  ;;  %v568_v31 = vld [vmem:[%s2064_s6 + $0x20] sm:$0xff] (!%p401_p9)  ;;  %vm728_vm5 = vcmask (!%p401_p9), 130048   ;;  %vm805_vm6 = vcmask (!%p401_p9), 32768   ;;  %s1686_s24 = smov (!%p401_p9), 96  }
  0x16   : > { %1521 = vmatpush3.bf16.msra.mxu1 (!%p401_p9), %v1520_v21  ;;  %v1535_v30 = vpack.c.bf16 (!%p401_p9), %v650_v28, %v649_v27  ;;  %v569_v32 = vld [vmem:[%s2064_s6 + $0x28] sm:$0xff] (!%p401_p9)  ;;  %v651_v33 = vld [vmem:[%s2065_s7 + $0x20] sm:$0xff] (!%p401_p9)  ;;  %v570_v37 = vld [vmem:[%s2064_s6 + $0x30] sm:$0xff] (!%p401_p9)  ;;  %vm824_vm7 = vcmask (!%p401_p9), 1044480   ;;  %s1687_s30 = smov (!%p401_p9), 80   ;;  %vm820_vm8 = vcmask (!%p401_p9), 39936  }
  0x17   : > { %1522 = vmatprep.subr.bf16.mxu1 (!%p401_p9), %v1682_v3  ;;  %v652_v34 = vld [vmem:[%s2065_s7 + $0x28] sm:$0xff] (!%p401_p9)  ;;  %v1526_v35 = vpack.c.bf16 (!%p401_p9), %v569_v32, %v568_v31  ;;  %v571_v38 = vld [vmem:[%s2064_s6 + $0x38] sm:$0xff] (!%p401_p9)  ;;  %v653_v39 = vld [vmem:[%s2065_s7 + $0x30] sm:$0xff] (!%p401_p9) }
  0x18   : > { %v461_v0 = vld [vmem:[%s2079_s2] sm:$0xff] (!%p401_p9)  ;;  %v462_v1 = vld [vmem:[%s2079_s2 + $0x8] sm:$0xff] (!%p401_p9)  ;;  %v463_v2 = vld [vmem:[%s2079_s2 + $0x10] sm:$0xff] (!%p401_p9)  ;;  %v1538_v36 = vpack.c.bf16 (!%p401_p9), %v652_v34, %v651_v33  ;;  %v1529_v41 = vpack.c.bf16 (!%p401_p9), %v571_v38, %v570_v37 }
  0x19   : > { %v1514_v4 = vpack.c.bf16 (!%p401_p9), %v462_v1, %v461_v0  ;;  %v464_v5 = vld [vmem:[%s2079_s2 + $0x18] sm:$0xff] (!%p401_p9)  ;;  %v540_v47 = vld [vmem:[%s2062_s4] sm:$0x1] (!%p401_p9)  ;;  %v1071_v26 = vld [vmem:[%s2066_s8 + $0x8] sm:$0xff] (!%p401_p9) }
  0x1a   : > { %v1517_v7 = vpack.c.bf16 %v464_v5, %v463_v2  ;;  %s1829_s20 = scalar_select %p449_p10, %s1782_s29, 1  ;;  %v465_v9 = vld [vmem:[%s2081_s3] sm:$0x1]  ;;  %1524 = vmatpush3.bf16.msra.mxu1 %v1523_v29  ;;  %v654_v40 = vld [vmem:[%s2065_s7 + $0x38] sm:$0xff]  ;;  %v1072_v27 = vld [vmem:[%s2066_s8 + $0x10] sm:$0xff] }
  0x1b   : > { %1515 = vmatpush3.bf16.msra.mxu0 %v1514_v4  ;;  %1525 = vmatprep.subr.bf16.mxu1 %v1682_v3  ;;  %v1541_v42 = vpack.c.bf16 %v654_v40, %v653_v39  ;;  %v541_v50 = vld [vmem:[%s2063_s5] sm:$0x1]  ;;  %s1685_s3 = smov 112   ;;  %v1073_v29 = vld [vmem:[%s2066_s8 + $0x18] sm:$0xff]  ;;  %v1149_v33 = vld [vmem:[%s2068_s10 + $0x8] sm:$0xff] }
  0x1c   : > { %1516 = vmatprep.subr.bf16.mxu0 %v1682_v3  ;;  %s451_s23 = scalar_lea.vmem %s2080_s0, %s1829_s20  ;;  %s1348_s15 = sshll.u32 %s1829_s20, 2  ;;  %v1148_v32 = vld [vmem:[%s2068_s10] sm:$0xff]  ;;  %v1150_v34 = vld [vmem:[%s2068_s10 + $0x10] sm:$0xff]  ;;  %v1153_v39 = vld [vmem:[%s2068_s10 + $0x28] sm:$0xff] }
  0x1d   : > { %v1836_v8 = vld [vmem:[%s451_s23] sm:$0x1]  ;;  %s455_s21 = scalar_lea.vmem %s2059_s1, %s1348_s15  ;;  %s446_s15 = sand.u32 1, %s1672_s26  }
  0x1e   : > { %1527 = vmatpush3.bf16.msra.mxu1 %v1526_v35  ;;  %v460_v48 = vld [vmem:[%s455_s21] sm:$0xf]  ;;  %s1347_s17 = sshll.u32 %s446_s15, 1  ;;  %v1550_v35 = vpack.c.bf16 %v1149_v33, %v1148_v32  ;;  %s2072_s23 = smov 16  }
  0x1f   : > { %1518 = vmatpush3.bf16.msra.mxu0 %v1517_v7  ;;  %1528 = vmatprep.subr.bf16.mxu1 %v1682_v3  ;;  %v560_v52 = vrot.slane %v460_v48, 7  ;;  %s1937_s16 = scalar_lea.vmem [#allocation2], %s1347_s17  ;;  %v1152_v38 = vld [vmem:[%s2068_s10 + $0x20] sm:$0xff]  ;;  %s1368_s21 = sshll.u32 %s1782_s29, 5 }
  0x20   : > { %1531 = vmatprep.subr.bf16.mxu0 %v1682_v3  ;;  %v1556_v40 = vpack.c.bf16 %v1153_v39, %v1152_v38  ;;  %s1253_s22 = sshll.u32 %s1937_s16, 4  ;;  %s1689_s29 = smov [#allocation2]   ;;  %s2003_s22 = int_to_ptr.vmem [resolvable:$true] %s1253_s22 }
  0x22   : > { %1423 = vmatmul.mubr.msk.f32.vlgmr.msra.gmra.mrb[0].mxu0 %vm466_vm1, %v1836_v8  ;;  %1530 = vmatpush3.bf16.msra.mxu1 %v1529_v41 }
  0x23   : > { %1460 = vmatprep.mubr.msk.f32.mxu0 %vm1683_vm0, %v1684_v6  ;;  %1533 = vmatpush3.bf16.msra.mxu0 %v1532_v25  ;;  %v1070_v25 = vld [vmem:[%s2066_s8] sm:$0xff] }
  0x24   : > { %1534 = vmatprep.subr.bf16.mxu0 %v1682_v3  ;;  %1468 = vmatprep.subr.mxu1 %v1684_v6  ;;  %v1544_v28 = vpack.c.bf16 %v1071_v26, %v1070_v25 }
  0x27   : > { %1536 = vmatpush3.bf16.msra.mxu0 %v1535_v30  ;;  %v1547_v30 = vpack.c.bf16 %v1073_v29, %v1072_v27 }
  0x28   : > { %1537 = vmatprep.subr.bf16.mxu0 %v1682_v3 }
  0x2b   : > { %1539 = vmatpush3.bf16.msra.mxu0 %v1538_v36  ;;  %v1151_v36 = vld [vmem:[%s2068_s10 + $0x18] sm:$0xff] }
  0x2c   : > { %1540 = vmatprep.subr.bf16.mxu0 %v1682_v3  ;;  %v1553_v37 = vpack.c.bf16 %v1151_v36, %v1150_v34 }
  0x2f   : > { %1542 = vmatpush3.bf16.msra.mxu0 %v1541_v42 }
  0x30   : > { %1463 = vmatprep.subr.mxu0 %v1684_v6 }
  0xf5   : > { %v536_v10 = vpop.f32.mrb[0].mxu0 }
  0xf6   : > { %v537_v11 = vadd.f32 %v536_v10, %v465_v9  ;;  %v1424_v12 = vpop.f32.mrb[1].mxu0 }
  0xf8   : > { %v543_v13 = vsel %vm542_vm2, %v537_v11, 0.0 }
  0xf9   : > { %544 = vadd.xlane.f32.xlu0 %v543_v13 }
 0x186   : > { %v545_v14 = vpop.xlane.xlu0 %544 }
 0x187   : > { %v547_v15 = vmul.f32 0.015625, %v545_v14 }
 0x189   : > { %v548_v16 = vsub.f32 %v537_v11, %v547_v15 }
 0x18b   : > { %v549_v17 = vmul.f32 %v548_v16, %v548_v16 }
 0x18d   : > { %v550_v18 = vsel %vm542_vm2, %v549_v17, 0.0 }
 0x18e   : > { %551 = vadd.xlane.f32.xlu0 %v550_v18 }
 0x21b   : > { %v552_v43 = vpop.xlane.xlu0 %551 }
 0x21c   : > { %v553_v44 = vmul.f32 0.015625, %v552_v43 }
 0x21e   : > { %v554_v45 = vadd.f32 1e-05, %v553_v44 }
 0x220   : > { %1608 = vrsqrt.f32 %v554_v45  ;;  %v1154_v45 = vld [vmem:[%s2068_s10 + $0x30] sm:$0xff] }
 0x22a   : > { %v1609_v46 = vpop.eup %1608 }
 0x22b   : > { %v556_v49 = vmul.f32 %v1609_v46, %v548_v16  ;;  %v1155_v46 = vld [vmem:[%s2068_s10 + $0x38] sm:$0xff] }
 0x22d   : > { %v557_v51 = vmul.f32 %v556_v49, %v540_v47  ;;  %v1559_v47 = vpack.c.bf16 %v1155_v46, %v1154_v45 }
 0x22f   : > { %v558_v53 = vadd.f32 %v557_v51, %v541_v50 }
 0x231   : > { %1442 = vmatmul.mubr.msk.f32.vlgmr.msra.gmra.mrb[0].mxu1 %vm572_vm3, %v558_v53  ;;  %v563_v54 = vsel %vm562_vm4, %v558_v53, %v560_v52 }
 0x232   : > { %1461 = vmatmul.mubr.msk.f32.vlgmr.msra.gmra.mrb[2].mxu0 %vm572_vm3, %v563_v54  ;;  %1470 = vmatprep.mubr.msk.f32.mxu1 %vm1683_vm0, %v1684_v6 }
 0x233   : > { %1465 = vmatprep.mubr.msk.f32.mxu0 %vm1683_vm0, %v1684_v6 }
 0x304   : > { %v642_v55 = vpop.f32.mrb[0].mxu1 }
 0x305   : > { %v1443_v56 = vpop.f32.mrb[1].mxu1  ;;  %v724_v57 = vpop.f32.mrb[2].mxu0  ;;  %v646_v59 = vmul.f32 0.25, %v642_v55 }
 0x306   : > { %899 = vrot.lane.b32.xlu1 %v724_v57, %s1685_s3  ;;  %v1462_v58 = vpop.f32.mrb[3].mxu0  ;;  %1464 = vmatpush3.xpose.msk.msra.mxu0 %vm728_vm5, %v724_v57 }
 0x307   : > { %1473 = vmatprep.subr.mxu0 %v1684_v6 }
 0x309   : > { %1466 = vmatmul.mubr.msk.f32.vlgmr.msra.gmra.mrb[4].mxu0 %vm728_vm5, %v646_v59 }
 0x30a   : > { %897 = vrot.lane.b32.xlu1 %v646_v59, %s1685_s3  ;;  %1475 = vmatprep.mubr.msk.f32.mxu0 %vm1683_vm0, %v1684_v6  ;;  %s2007_s3 = scalar_lea.sflag [#allocation3], %s446_s15 }
 0x378   : > { %v900_v60 = vpop.permute.xlu1 %899 }
 0x379   : > { %1474 = vmatpush3.xpose.msk.msra.mxu0 %vm728_vm5, %v900_v60 }
 0x37a   : > { %1543 = vmatprep.subr.bf16.mxu0 %v1682_v3 }
 0x37c   : > { %v898_v61 = vpop.permute.xlu1 %897 }
 0x37d   : > { %1476 = vmatmul.mubr.msk.f32.vlgmr.msra.gmra.mrb[6].mxu0 %vm728_vm5, %v898_v61 }
 0x37e   : > { %1491 = vmatprep.mubr.msk.f32.mxu0 %vm1683_vm0, %v1684_v6  ;;  %1545 = vmatpush3.bf16.msra.mxu0 %v1544_v28 }
 0x37f   : > { %1546 = vmatprep.subr.bf16.mxu0 %v1682_v3 }
 0x382   : > { %1548 = vmatpush3.bf16.msra.mxu0 %v1547_v30 }
 0x3dc   : > { %v801_v62 = vpop.f32.mrb[4].mxu0 }
 0x3dd   : > { %v1467_v63 = vpop.f32.mrb[5].mxu0  ;;  %v806_v0 = vsel %vm805_vm6, %v801_v62, -inf }
 0x3de   : > { %807 = vmax.xlane.f32.xlu0 %v806_v0 }
 0x3f4   : > { %818 = vrot.lane.b32.xlu0 %v724_v57, %s1686_s24  ;;  %s1618_s24 = scalar_lea.vmem %s2003_s22, 32 }
 0x3f5   : > { %p1619_p11 = scmp.ne.s32.totalorder %s2003_s22, %s1618_s24 }
 0x3f7   : > { %p1620_p12 = pnand %p1619_p11, %p1799_p5 }
 0x3f9   : > { %p1621_p13 = pneg %p1620_p12 }
 0x450   : > { %v971_v1 = vpop.f32.mrb[6].mxu0 }
 0x451   : > { %v1477_v2 = vpop.f32.mrb[7].mxu0  ;;  %v975_v4 = vsel %vm805_vm6, %v971_v1, -inf }
 0x452   : > { %976 = vmax.xlane.f32.xlu1 %v975_v4 }
 0x46b   : > { %v808_v5 = vpop.xlane.xlu0 %807 }
 0x46c   : > { %v809_v7 = vsub.f32 %v801_v62, %v808_v5 }
 0x46e   : > { %v810_v9 = vmul.f32 1.442695, %v809_v7 }
 0x46f   : > { %v819_v10 = vpop.permute.xlu0 %818 }
 0x470   : > { %1610 = vpow2.f32 %v810_v9  ;;  %1469 = vmatpush3.msk.msra.mxu1 %vm824_vm7, %v819_v10 }
 0x471   : > { %1478 = vmatprep.subr.mxu1 %v1684_v6 }
 0x47a   : > { %v1611_v11 = vpop.eup %1610 }
 0x47b   : > { %v812_v12 = vsel %vm805_vm6, %v1611_v11, 0.0 }
 0x47c   : > { %813 = vadd.xlane.f32.xlu0 %v812_v12 }
 0x4df   : > { %v977_v13 = vpop.xlane.xlu1 %976 }
 0x4e0   : > { %v978_v14 = vsub.f32 %v971_v1, %v977_v13 }
 0x4e2   : > { %v979_v15 = vmul.f32 1.442695, %v978_v14 }
 0x4e4   : > { %1612 = vpow2.f32 %v979_v15 }
 0x4ee   : > { %v1613_v16 = vpop.eup %1612 }
 0x4ef   : > { %v981_v17 = vsel %vm805_vm6, %v1613_v16, 0.0 }
 0x4f0   : > { %982 = vadd.xlane.f32.xlu0 %v981_v17 }
 0x506   : > { %988 = vrot.lane.b32.xlu0 %v724_v57, %s1687_s30 }
 0x509   : > { %v814_v18 = vpop.xlane.xlu0 %813 }
 0x50a   : > { %1614 = vrcp.f32 %v814_v18 }
 0x514   : > { %v1615_v19 = vpop.eup %1614 }
 0x515   : > { %v816_v20 = vmul.f32 %v1615_v19, %v1611_v11 }
 0x517   : > { %1471 = vmatmul.mubr.msk.f32.vlgmr.msra.gmra.mrb[2].mxu1 %vm820_vm8, %v816_v20  ;;  %817 = vst.msk [vmem:[%s1937_s16] sm:$0x1] %vm805_vm6, %v816_v20 }
 0x518   : > { %1480 = vmatprep.mubr.msk.f32.mxu1 %vm1683_vm0, %v1684_v6 }
 0x57d   : > { %v983_v21 = vpop.xlane.xlu0 %982 }
 0x57e   : > { %1616 = vrcp.f32 %v983_v21 }
 0x581   : > { %v989_v22 = vpop.permute.xlu0 %988 }
 0x582   : > { %1479 = vmatpush3.msk.msra.mxu1 %vm824_vm7, %v989_v22 }
 0x583   : > { %1549 = vmatprep.subr.bf16.mxu1 %v1682_v3 }
 0x588   : > { %v1617_v23 = vpop.eup %1616 }
 0x589   : > { %v985_v24 = vmul.f32 %v1617_v23, %v1613_v16 }
 0x58b   : > { %1481 = vmatmul.mubr.msk.f32.vlgmr.msra.gmra.mrb[4].mxu1 %vm820_vm8, %v985_v24  ;;  %1358 = vst.msk [vmem:[%s1937_s16 + $0x1] sm:$0x1] %vm805_vm6, %v985_v24  ;;  %s1622_s16 = sshll.u32 %s1689_s29, 4  ;;  %s1623_s16 = int_to_ptr.vmem [resolvable:$false] %s1622_s16 }
 0x58c   : > { %1510 = vmatprep.mubr.msk.f32.mxu1 %vm1683_vm0, %v1684_v6  ;;  %1551 = vmatpush3.bf16.msra.mxu1 %v1550_v35  ;;  %s1624_s30 = scalar_lea.vmem %s1623_s16, 64  ;;  %p1625_p0 = scmp.lt.s32.totalorder %s2003_s22, %s1623_s16 }
 0x58d   : > { %1552 = vmatprep.subr.bf16.mxu1 %v1682_v3  ;;  %p1626_p1 = scmp.lt.s32.totalorder %s1624_s30, %s1618_s24 }
 0x58f   : > { %p1627_p2 = por %p1626_p1, %p1625_p0 }
 0x590   : > { %1554 = vmatpush3.bf16.msra.mxu1 %v1553_v37 }
 0x591   : > { %1555 = vmatprep.subr.bf16.mxu1 %v1682_v3  ;;  %p1628_p3 = pnand %p1627_p2, %p1621_p13 }
 0x594   : > { %1557 = vmatpush3.bf16.msra.mxu1 %v1556_v40 }
 0x595   : > { %1558 = vmatprep.subr.bf16.mxu1 %v1682_v3  ;;  %v1074_v3 = vld [vmem:[%s2067_s9] sm:$0x1] }
 0x598   : > { %1560 = vmatpush3.bf16.msra.mxu1 %v1559_v47 }
 0x5ea   : > { %v893_v6 = vpop.f32.mrb[2].mxu1 }
 0x5eb   : > { %v1472_v31 = vpop.f32.mrb[3].mxu1 }
 0x65e   : > { %v1061_v41 = vpop.f32.mrb[4].mxu1 }
 0x65f   : > { %1066 = vrot.lane.b32.xlu1 %v1061_v41, %s2072_s23  ;;  %v1482_v42 = vpop.f32.mrb[5].mxu1  ;;  %s2001_s23 = scalar_lea.hbm %s2071_s13, %s1368_s21 }
 0x6d1   : > { %v1067_v43 = vpop.permute.xlu1 %1066 }
 0x6d2   : > { %v1069_v44 = vsel %vm728_vm5, %v893_v6, %v1067_v43 }
 0x6d3   : > { %1492 = vmatmul.mubr.msk.f32.vlgmr.msra.gmra.mrb[8].mxu0 %vm466_vm1, %v1069_v44 }
 0x7a6   : > { %v1144_v48 = vpop.f32.mrb[8].mxu0 }
 0x7a7   : > { %v1145_v49 = vadd.f32 %v1144_v48, %v1074_v3  ;;  %v1493_v50 = vpop.f32.mrb[9].mxu0 }
 0x7a9   : > { %1511 = vmatmul.mubr.msk.f32.vlgmr.msra.gmra.mrb[6].mxu1 %vm572_vm3, %v1145_v49 }
 0x7aa   : > { %1631 = shalt.err (!%p1628_p3)
}
 0x7ab   : > { %s1632_s15 = scalar_lea.hbm %s2001_s23, 32  ;;  %s1636_s0 = scalar_lea.hbm %s2071_s13, 64 }
 0x7ac   : > { %p1633_p4 = scmp.ne.s32.totalorder %s2001_s23, %s1632_s15  ;;  %p1637_p9 = scmp.lt.u32.totalorder %s2001_s23, %s2071_s13 }
 0x7ad   : > { %p1638_p10 = scmp.lt.u32.totalorder %s1636_s0, %s1632_s15  ;;  %p1640_p12 = scmp.lt.u32.totalorder %s1632_s15, %s2001_s23 }
 0x7ae   : > { %p1634_p7 = pnand %p1633_p4, %p1799_p5 }
 0x7af   : > { %p1639_p11 = por %p1638_p10, %p1637_p9 }
 0x7b0   : > { %p1635_p8 = pneg %p1634_p7 }
 0x7b1   : > { %p1641_p13 = por %p1640_p12, %p1639_p11 }
 0x7b3   : > { %p1642_p0 = pnand %p1641_p13, %p1635_p8 }
 0x7b5   : > { %1645 = shalt.err (!%p1642_p0)
}
 0x7b6   : > { %s1690_s24 = smov 1   ;;  %s2082_s16 = smov 16   ;;  %v1156_v51 = vld [vmem:[%s2069_s11] sm:$0x1]  ;;  %vm1231_vm9 = vcmask 253952  }
 0x7b7   : > { %1561 = dma.vmem_to_hbm [thread:$0]  (%p1799_p5), %s2003_s22, 32, %s2001_s23, %s2007_s3, %s2082_s16, %s2082_s16, %s1690_s24  }
 0x7b8   : > { %s458_s0 = scalar_lea.vmem %s2070_s12, %s1829_s20 }
 0x87c   : > { %v1226_v52 = vpop.f32.mrb[6].mxu1 }
 0x87d   : > { %v1227_v53 = vadd.f32 %v1226_v52, %v1156_v51  ;;  %v1512_v54 = vpop.f32.mrb[7].mxu1 }
 0x87f   : > { %v1230_v55 = vadd.f32 %v1227_v53, %v1836_v8 }
 0x881   : > { %1232 = vst.msk [vmem:[%s458_s0] sm:$0x1] %vm1231_vm9, %v1230_v55 }
 0x882 PF: > { %p1567_p5 = scmp.ge.s32.totalorder %s1680_s28, 2  ;;  %s1274_s18 = sand.u32 1, %s1668_s25  }
 0x883   : > { %s1275_s23 = scalar_lea.sflag [#allocation3], %s1274_s18 }
 0x884   : > { %p1564_p1 = pnand %p1567_p5, %p1803_p6 }
 0x886   : > { %1663 = dma.done.wait (!%p1564_p1), %s1275_s23, 32  }
 0x887   : > { %1665 = vsyncadd (!%p1564_p1), %s1275_s23, 4294967264  ;;  %s2083_s22 = sld [smem:[#allocation5_spill]]  ;;  %p24_p2 = scmp.ge.s32.totalorder %s1786_s14, 4  }
 0x888   : > { %s2084_s25 = smov %s1672_s26  ;;  %s2085_s26 = smov %s1676_s27 }
 0x889   : > { %s2087_s28 = smov %s1786_s14  ;;  %26 = sbr.rel (!%p24_p2) target bundleno = 7 (0x7), region = 119 }
 0x88d   : > { %s2086_s27 = smov %s2083_s22 }
 0x890   :  { %1280 = vsyncpa [#allocation3], 1 }
 0x891   :  { %1282 = vsyncpa [#allocation3 + $0x1], 1 }

// kernel: _lambda_.4
= control target key start
LH: loop header
LB: loop body
LE: loop exit
PB: predicated region body
PF: predicated region fallthrough
CT: control target
= control target key end

     0   :  { %s1940_s29 = smov 0   ;;  %s2141_s0 = inlined_call_operand.vmem [shape: f32[2,9,32], index: 0, kind: input, shape index: {}]   ;;  %s2142_s1 = inlined_call_operand.vmem [shape: f32[1,32], index: 1, kind: input, shape index: {}, may-alias: {1,6,12}]   ;;  %s2143_s2 = inlined_call_operand.vmem [shape: f32[1,32], index: 2, kind: input, shape index: {}, may-alias: {2,5,7,11,13}]   ;;  %s2144_s3 = inlined_call_operand.vmem [shape: f32[32,96], index: 3, kind: input, shape index: {}]   ;;  %s2145_s4 = inlined_call_operand.vmem [shape: f32[32,32], index: 4, kind: input, shape index: {}]   ;;  %s2146_s5 = inlined_call_operand.vmem [shape: f32[1,32], index: 5, kind: input, shape index: {}, may-alias: {2,5,7,11,13}]   ;;  %s2147_s6 = inlined_call_operand.vmem [shape: f32[1,32], index: 6, kind: input, shape index: {}, may-alias: {1,6,12}]   ;;  %s2148_s7 = inlined_call_operand.vmem [shape: f32[1,32], index: 7, kind: input, shape index: {}, may-alias: {2,5,7,11,13}]   ;;  %s2149_s8 = inlined_call_operand.vmem [shape: f32[32,128], index: 8, kind: input, shape index: {}]   ;;  %s2150_s9 = inlined_call_operand.vmem [shape: f32[1,128], index: 9, kind: input, shape index: {}]   ;;  %s2151_s10 = inlined_call_operand.vmem [shape: f32[128,32], index: 10, kind: input, shape index: {}]   ;;  %s2152_s11 = inlined_call_operand.vmem [shape: f32[1,32], index: 11, kind: input, shape index: {}, may-alias: {2,5,7,11,13}]   ;;  %s2153_s12 = inlined_call_operand.vmem [shape: f32[1,32], index: 12, kind: input, shape index: {}, may-alias: {1,6,12}]   ;;  %s2154_s13 = inlined_call_operand.vmem [shape: f32[1,32], index: 13, kind: input, shape index: {}, may-alias: {2,5,7,11,13}]   ;;  %s2155_s14 = inlined_call_operand.vmem [shape: f32[2,9,32], index: 14, kind: output, shape index: {}]  }
   0x1 LB: > { %s1509_s30 = sadd.s32 4294967295, %s1856_s29   ;;  %p1513_p0 = scmp.ge.s32.totalorder %s1856_s29, 1  ;;  %s1856_s29 = sphi %s1940_s29, %s24_s29  }
   0x2   : > { %p412_p1 = scmp.lt.s32.totalorder %s1856_s29, 3 }
   0x4   : > { %p413_p2 = pnand %p1513_p0, %p412_p1 }
   0x5   : > { %p458_p3 = scmp.lt.s32.totalorder (!%p413_p2), %s1509_s30, 1  ;;  %vm472_vm0 = vcmask (!%p413_p2), 261120   ;;  %vm476_vm1 = vcmask (!%p413_p2), 253952   ;;  %v517_v14 = vld [vmem:[%s2144_s3] sm:$0xff] (!%p413_p2)  ;;  %v518_v15 = vld [vmem:[%s2144_s3 + $0x8] sm:$0xff] (!%p413_p2)  ;;  %v519_v16 = vld [vmem:[%s2144_s3 + $0x10] sm:$0xff] (!%p413_p2) }
   0x6   : > { %416 = sbr.rel (%p413_p2) target bundleno = 2877 (0xb3d), region = 76  ;;  %v1699_v17 = vpack.c.bf16 (!%p413_p2), %v518_v15, %v517_v14  ;;  %v520_v18 = vld [vmem:[%s2144_s3 + $0x18] sm:$0xff] (!%p413_p2)  ;;  %v1518_v27 = vld [vmem:[%s2142_s1] ss:$0 sm:$0xff] (!%p413_p2)  ;;  %vm610_vm2 = vcmask (!%p413_p2), 130048   ;;  %s1859_s19 = smov (!%p413_p2), 96  }
   0x7   : > { %v1703_v19 = vpack.c.bf16 (!%p413_p2), %v520_v18, %v519_v16  ;;  %v1519_v29 = vld [vmem:[%s2143_s2] ss:$0 sm:$0xff] (!%p413_p2)  ;;  %s1860_s20 = smov (!%p413_p2), 112   ;;  %vm1708_vm3 = vmpackc.low (!%p413_p2), %vm610_vm2, %vm610_vm2  ;;  %vm700_vm4 = vcmask (!%p413_p2), 65536   ;;  %vm696_vm5 = vcmask (!%p413_p2), 72704   ;;  %s1861_s21 = smov (!%p413_p2), 48  }
   0x8   : > { %1700 = vmatprep.subr.bf16.mxu1 (!%p413_p2), %v1699_v17  ;;  %s1862_s22 = smov (!%p413_p2), 64   ;;  %vm731_vm6 = vcmask (!%p413_p2), 1040384   ;;  %vm1863_vm7 = vmmov (!%p413_p2), 1  }
   0x9   : > { %1702 = vmatpush3.bf16.msra.mxu1 (!%p413_p2), %v1699_v17  ;;  %vm1714_vm8 = vmpackc.low (!%p413_p2), %vm731_vm6, %vm1863_vm7 }
   0xa   : > { %1704 = vmatprep.subr.bf16.mxu1 (!%p413_p2), %v1703_v19 }
   0xd   : > { %s2157_s30 = smov (!%p458_p3, %s1509_s30), 1  ;;  %1706 = vmatpush3.bf16.msra.mxu1 %v1703_v19 }
   0xe   : > { %s1549_s15 = sshll.u32 %s2157_s30, 4 }
   0xf   : > { %s462_s18 = scalar_lea.vmem %s2141_s0, %s1549_s15  ;;  %s467_s23 = scalar_lea.vmem %s2155_s14, %s1549_s15 }
  0x10   : > { %v1956_v0 = vld [vmem:[%s462_s18] sm:$0xff]  ;;  %v1958_v1 = vld [vmem:[%s462_s18 + $0x8] sm:$0x1]  ;;  %s1858_s18 = smov 80  }
  0x11   : > { %v473_v2 = vsel %vm472_vm0, %v1956_v0, 0.0  ;;  %v477_v3 = vsel %vm476_vm1, %v1958_v1, 0.0 }
  0x12   : > { %474 = vadd.xlane.f32.xlu0 %v473_v2 }
  0x16   : > { %478 = vadd.xlane.f32.xlu0 %v477_v3 }
  0x9f   : > { %v475_v4 = vpop.xlane.xlu0 %474 }
  0xa0   : > { %v481_v5 = vmul.f32 0.03125, %v475_v4 }
  0xa2   : > { %v483_v6 = vsub.f32 %v1956_v0, %v481_v5 }
  0xa3   : > { %v479_v7 = vpop.xlane.xlu0 %478 }
  0xa4   : > { %v482_v8 = vmul.f32 0.03125, %v479_v7  ;;  %v485_v9 = vmul.f32 %v483_v6, %v483_v6 }
  0xa6   : > { %v484_v10 = vsub.f32 %v1958_v1, %v482_v8  ;;  %v487_v11 = vsel %vm472_vm0, %v485_v9, 0.0 }
  0xa7   : > { %488 = vadd.xlane.f32.xlu1 %v487_v11 }
  0xa8   : > { %v486_v12 = vmul.f32 %v484_v10, %v484_v10 }
  0xaa   : > { %v490_v13 = vsel %vm476_vm1, %v486_v12, 0.0 }
  0xab   : > { %491 = vadd.xlane.f32.xlu1 %v490_v13 }
 0x134   : > { %v489_v20 = vpop.xlane.xlu1 %488 }
 0x135   : > { %v493_v21 = vmul.f32 0.03125, %v489_v20 }
 0x137   : > { %v495_v22 = vadd.f32 1e-05, %v493_v21 }
 0x138   : > { %v492_v23 = vpop.xlane.xlu1 %491 }
 0x139   : > { %1814 = vrsqrt.f32 %v495_v22  ;;  %v494_v24 = vmul.f32 0.03125, %v492_v23 }
 0x13b   : > { %v496_v25 = vadd.f32 1e-05, %v494_v24 }
 0x13d   : > { %1816 = vrsqrt.f32 %v496_v25 }
 0x143   : > { %v1815_v26 = vpop.eup %1814 }
 0x144   : > { %v499_v28 = vmul.f32 %v1815_v26, %v483_v6 }
 0x146   : > { %v507_v30 = vmul.f32 %v1518_v27, %v499_v28 }
 0x147   : > { %v1817_v31 = vpop.eup %1816 }
 0x148   : > { %v500_v32 = vmul.f32 %v1817_v31, %v484_v10  ;;  %v515_v33 = vadd.f32 %v1519_v29, %v507_v30 }
 0x14a   : > { %v508_v34 = vmul.f32 %v1518_v27, %v500_v32  ;;  %1611 = vmatprep.mubr.msk.f32.mxu1 %vm472_vm0, %v515_v33 }
 0x14c   : > { %v516_v35 = vadd.f32 %v1519_v29, %v508_v34 }
 0x14e   : > { %1612 = vmatmul.mubr.msk.f32.vlgmr.msra.gmra.mrb[0].mxu1 %vm472_vm0, %v516_v35 }
 0x221   : > { %v1613_v36 = vpop.f32.mrb[0].mxu1 }
 0x222   : > { %v593_v37 = vpop.f32.mrb[1].mxu1  ;;  %v603_v40 = vmul.f32 0.25, %v1613_v36 }
 0x223   : > { %v1988_v38 = vpack.i.bf16 %v1613_v36, %v593_v37  ;;  %v602_v39 = vmul.f32 0.25, %v593_v37  ;;  %v1020_v37 = vld [vmem:[%s2145_s4] sm:$0xff] }
 0x225   : > { %1800 = vrot.lane.b32.xlu1 %v1988_v38, %s1858_s18  ;;  %1795 = vrot.lane.b32.xlu0 %v1988_v38, %s1859_s19  ;;  %s1864_s18 = smov 16  }
 0x226   : > { %1618 = vmatprep.mubr.msk.f32.mxu1 %vm610_vm2, %v602_v39 }
 0x229   : > { %809 = vrot.lane.b32.xlu1 %v602_v39, %s1860_s20 }
 0x22d   : > { %811 = vrot.lane.b32.xlu1 %v603_v40, %s1860_s20 }
 0x297   : > { %v1801_v41 = vpop.permute.xlu1 %1800  ;;  %v1796_v42 = vpop.permute.xlu0 %1795 }
 0x298   : > { %v1803_v43 = vunpack.i.h.bf16 %v1801_v41  ;;  %v1802_v44 = vunpack.i.l.bf16 %v1801_v41  ;;  %v1798_v45 = vunpack.i.h.bf16 %v1796_v42  ;;  %v1797_v46 = vunpack.i.l.bf16 %v1796_v42  ;;  %v1023_v41 = vld [vmem:[%s2145_s4 + $0x18] sm:$0xff] }
 0x29a   : > { %v1707_v47 = vpack.c.bf16 %v1798_v45, %v1797_v46  ;;  %v1719_v48 = vpack.c.bf16 %v1803_v43, %v1802_v44 }
 0x29b   : > { %v810_v49 = vpop.permute.xlu1 %809 }
 0x29c   : > { %1709 = vmatprep.subr.msk.bf16.mxu1 %vm1708_vm3, %v1707_v47 }
 0x29d   : > { %1712 = vmatpush3.bf16.xpose.msk.msra.mxu1 %vm1708_vm3, %v1707_v47 }
 0x29e   : > { %1721 = vmatprep.subr.msk.bf16.mxu1 %vm1708_vm3, %v1719_v48 }
 0x29f   : > { %v812_v50 = vpop.permute.xlu1 %811 }
 0x2a4   : > { %1619 = vmatmul.mubr.msk.f32.vlgmr.msra.gmra.mrb[2].mxu1 %vm610_vm2, %v603_v40  ;;  %v1022_v40 = vld [vmem:[%s2145_s4 + $0x10] sm:$0xff] }
 0x2a5   : > { %1724 = vmatpush3.bf16.xpose.msk.msra.mxu1 %vm1708_vm3, %v1719_v48  ;;  %1632 = vmatprep.mubr.msk.f32.mxu1 %vm610_vm2, %v810_v49  ;;  %v1735_v42 = vpack.c.bf16 %v1023_v41, %v1022_v40  ;;  %v1314_v40 = vld [vmem:[%s2151_s10 + $0x40] sm:$0xff]  ;;  %v1315_v41 = vld [vmem:[%s2151_s10 + $0x48] sm:$0xff] }
 0x2ac   : > { %1633 = vmatmul.mubr.msk.f32.vlgmr.msra.gmra.mrb[4].mxu1 %vm610_vm2, %v812_v50 }
 0x377   : > { %v1620_v51 = vpop.f32.mrb[2].mxu1 }
 0x378   : > { %v687_v52 = vpop.f32.mrb[3].mxu1  ;;  %v701_v53 = vsel %vm700_vm4, %v1620_v51, -inf }
 0x379   : > { %702 = vmax.xlane.f32.xlu1 %v701_v53  ;;  %v697_v54 = vsel %vm696_vm5, %v687_v52, -inf }
 0x37a   : > { %698 = vmax.xlane.f32.xlu0 %v697_v54 }
 0x37f   : > { %v1634_v55 = vpop.f32.mrb[4].mxu1 }
 0x380   : > { %v891_v56 = vpop.f32.mrb[5].mxu1  ;;  %v903_v58 = vsel %vm700_vm4, %v1634_v55, -inf }
 0x381   : > { %v900_v57 = vsel %vm696_vm5, %v891_v56, -inf }
 0x382   : > { %901 = vmax.xlane.f32.xlu0 %v900_v57 }
 0x386   : > { %904 = vmax.xlane.f32.xlu0 %v903_v58 }
 0x406   : > { %v703_v59 = vpop.xlane.xlu1 %702 }
 0x407   : > { %v705_v60 = vsub.f32 %v1620_v51, %v703_v59  ;;  %v699_v61 = vpop.xlane.xlu0 %698 }
 0x408   : > { %v704_v62 = vsub.f32 %v687_v52, %v699_v61  ;;  %v1538_v52 = vld [vmem:[%s2146_s5] ss:$0 sm:$0xff] }
 0x409   : > { %v708_v63 = vmul.f32 1.442695, %v705_v60 }
 0x40a   : > { %v706_v2 = vmul.f32 1.442695, %v704_v62 }
 0x40b   : > { %1818 = vpow2.f32 %v708_v63 }
 0x40c   : > { %1820 = vpow2.f32 %v706_v2 }
 0x40f   : > { %v902_v3 = vpop.xlane.xlu0 %901 }
 0x410   : > { %v906_v4 = vsub.f32 %v891_v56, %v902_v3 }
 0x412   : > { %v908_v5 = vmul.f32 1.442695, %v906_v4 }
 0x413   : > { %v905_v6 = vpop.xlane.xlu0 %904 }
 0x414   : > { %1822 = vpow2.f32 %v908_v5  ;;  %v907_v7 = vsub.f32 %v1634_v55, %v905_v6  ;;  %v1160_v6 = vld [vmem:[%s2149_s8] sm:$0xff] }
 0x415   : > { %v1819_v8 = vpop.eup %1818 }
 0x416   : > { %v1821_v9 = vpop.eup %1820  ;;  %v910_v10 = vmul.f32 1.442695, %v907_v7  ;;  %v713_v11 = vsel %vm700_vm4, %v1819_v8, 0.0  ;;  %v1161_v7 = vld [vmem:[%s2149_s8 + $0x8] sm:$0xff] }
 0x417   : > { %714 = vadd.xlane.f32.xlu1 %v713_v11  ;;  %v710_v12 = vsel %vm696_vm5, %v1821_v9, 0.0 }
 0x418   : > { %1824 = vpow2.f32 %v910_v10  ;;  %711 = vadd.xlane.f32.xlu0 %v710_v12  ;;  %v1163_v10 = vld [vmem:[%s2149_s8 + $0x18] sm:$0xff] }
 0x41e   : > { %v1823_v13 = vpop.eup %1822 }
 0x41f   : > { %v912_v14 = vsel %vm696_vm5, %v1823_v13, 0.0 }
 0x420   : > { %913 = vadd.xlane.f32.xlu0 %v912_v14 }
 0x422   : > { %v1825_v15 = vpop.eup %1824 }
 0x423   : > { %v915_v16 = vsel %vm700_vm4, %v1825_v15, 0.0 }
 0x424   : > { %916 = vadd.xlane.f32.xlu1 %v915_v16 }
 0x435   : > { %1810 = vrot.lane.b32.xlu1 %v1988_v38, %s1861_s21 }
 0x436   : > { %1805 = vrot.lane.b32.xlu0 %v1988_v38, %s1862_s22  ;;  %v1021_v38 = vld [vmem:[%s2145_s4 + $0x8] sm:$0xff] }
 0x437   : > { %v1731_v39 = vpack.c.bf16 %v1021_v38, %v1020_v37  ;;  %v1312_v37 = vld [vmem:[%s2151_s10 + $0x30] sm:$0xff]  ;;  %v1313_v38 = vld [vmem:[%s2151_s10 + $0x38] sm:$0xff] }
 0x439   : > { %1732 = vmatprep.subr.bf16.mxu1 %v1731_v39 }
 0x43a   : > { %1734 = vmatpush3.bf16.msra.mxu1 %v1731_v39  ;;  %v1759_v39 = vpack.c.bf16 %v1313_v38, %v1312_v37 }
 0x43b   : > { %1736 = vmatprep.subr.bf16.mxu1 %v1735_v42 }
 0x43e   : > { %1738 = vmatpush3.bf16.msra.mxu1 %v1735_v42  ;;  %v1763_v42 = vpack.c.bf16 %v1315_v41, %v1314_v40 }
 0x4a4   : > { %v715_v18 = vpop.xlane.xlu1 %714 }
 0x4a5   : > { %v712_v17 = vpop.xlane.xlu0 %711 }
 0x4a6   : > { %1826 = vrcp.f32 %v712_v17 }
 0x4a7   : > { %1828 = vrcp.f32 %v715_v18 }
 0x4ad   : > { %v914_v19 = vpop.xlane.xlu0 %913 }
 0x4ae   : > { %1830 = vrcp.f32 %v914_v19  ;;  %v1539_v19 = vld [vmem:[%s2147_s6] ss:$0 sm:$0xff] }
 0x4b0   : > { %v1827_v20 = vpop.eup %1826 }
 0x4b1   : > { %v917_v21 = vpop.xlane.xlu1 %916  ;;  %v1806_v22 = vpop.permute.xlu0 %1805  ;;  %v718_v23 = vmul.f32 %v1827_v20, %v1821_v9  ;;  %v1162_v9 = vld [vmem:[%s2149_s8 + $0x10] sm:$0xff] }
 0x4b2   : > { %1832 = vrcp.f32 %v917_v21  ;;  %v1808_v24 = vunpack.i.h.bf16 %v1806_v22  ;;  %v1807_v25 = vunpack.i.l.bf16 %v1806_v22  ;;  %v1829_v27 = vpop.eup %1828  ;;  %v1743_v11 = vpack.c.bf16 %v1163_v10, %v1162_v9  ;;  %v1540_v21 = vld [vmem:[%s2148_s7] ss:$0 sm:$0xff] }
 0x4b3   : > { %1625 = vmatprep.mubr.msk.f32.mxu0 %vm696_vm5, %v718_v23  ;;  %v719_v33 = vmul.f32 %v1829_v27, %v1819_v8  ;;  %v1739_v8 = vpack.c.bf16 %v1161_v7, %v1160_v6 }
 0x4b4   : > { %v1713_v26 = vpack.c.bf16 %v1808_v24, %v1807_v25 }
 0x4b5   : > { %v1811_v28 = vpop.permute.xlu1 %1810  ;;  %1740 = vmatprep.subr.bf16.mxu1 %v1739_v8 }
 0x4b6   : > { %v1813_v29 = vunpack.i.h.bf16 %v1811_v28  ;;  %v1812_v30 = vunpack.i.l.bf16 %v1811_v28  ;;  %1715 = vmatprep.subr.msk.bf16.mxu0 %vm1714_vm8, %v1713_v26  ;;  %v1306_v28 = vld [vmem:[%s2151_s10] sm:$0xff] }
 0x4b7   : > { %1718 = vmatpush3.bf16.msk.msra.mxu0 %vm1714_vm8, %v1713_v26 }
 0x4b8   : > { %v1831_v31 = vpop.eup %1830  ;;  %v1725_v32 = vpack.c.bf16 %v1813_v29, %v1812_v30  ;;  %v1307_v29 = vld [vmem:[%s2151_s10 + $0x8] sm:$0xff] }
 0x4b9   : > { %v920_v34 = vmul.f32 %v1831_v31, %v1823_v13  ;;  %v1747_v30 = vpack.c.bf16 %v1307_v29, %v1306_v28  ;;  %v1308_v31 = vld [vmem:[%s2151_s10 + $0x10] sm:$0xff] }
 0x4ba   : > { %1626 = vmatmul.mubr.msk.f32.vlgmr.msra.gmra.mrb[0].mxu0 %vm696_vm5, %v719_v33  ;;  %1727 = vmatprep.subr.msk.bf16.mxu0 %vm1714_vm8, %v1725_v32 }
 0x4bb   : > { %1730 = vmatpush3.bf16.msk.msra.mxu0 %vm1714_vm8, %v1725_v32  ;;  %1639 = vmatprep.mubr.msk.f32.mxu0 %vm696_vm5, %v920_v34  ;;  %v1309_v32 = vld [vmem:[%s2151_s10 + $0x18] sm:$0xff]  ;;  %v1310_v34 = vld [vmem:[%s2151_s10 + $0x20] sm:$0xff] }
 0x4bc   : > { %v1833_v35 = vpop.eup %1832  ;;  %1748 = vmatprep.subr.bf16.mxu0 %v1747_v30  ;;  %v1751_v33 = vpack.c.bf16 %v1309_v32, %v1308_v31 }
 0x4bd   : > { %v921_v36 = vmul.f32 %v1833_v35, %v1825_v15  ;;  %v1311_v35 = vld [vmem:[%s2151_s10 + $0x28] sm:$0xff] }
 0x4bf   : > { %1640 = vmatmul.mubr.msk.f32.vlgmr.msra.gmra.mrb[2].mxu0 %vm696_vm5, %v921_v36  ;;  %v1755_v36 = vpack.c.bf16 %v1311_v35, %v1310_v34 }
 0x4c0   : > { %1750 = vmatpush3.bf16.msra.mxu0 %v1747_v30 }
 0x4c1   : > { %1752 = vmatprep.subr.bf16.mxu0 %v1751_v33 }
 0x4c4   : > { %1754 = vmatpush3.bf16.msra.mxu0 %v1751_v33 }
 0x4c5   : > { %1756 = vmatprep.subr.bf16.mxu0 %v1755_v36 }
 0x4c8   : > { %1758 = vmatpush3.bf16.msra.mxu0 %v1755_v36 }
 0x4c9   : > { %1760 = vmatprep.subr.bf16.mxu0 %v1759_v39 }
 0x4cc   : > { %1762 = vmatpush3.bf16.msra.mxu0 %v1759_v39 }
 0x4cd   : > { %1764 = vmatprep.subr.bf16.mxu0 %v1763_v42 }
 0x4d0   : > { %1766 = vmatpush3.bf16.msra.mxu0 %v1763_v42 }
 0x58d   : > { %v1627_v43 = vpop.f32.mrb[0].mxu0 }
 0x58e   : > { %v800_v44 = vpop.f32.mrb[1].mxu0 }
 0x592   : > { %v1641_v45 = vpop.f32.mrb[2].mxu0 }
 0x593   : > { %v1001_v46 = vpop.f32.mrb[3].mxu0 }
 0x594   : > { %1012 = vrot.lane.b32.xlu1 %v1001_v46, %s1864_s18  ;;  %v1318_v46 = vld [vmem:[%s2151_s10 + $0x60] sm:$0xff] }
 0x598   : > { %1014 = vrot.lane.b32.xlu1 %v1641_v45, %s1864_s18 }
 0x606   : > { %v1013_v47 = vpop.permute.xlu1 %1012 }
 0x607   : > { %v1018_v48 = vsel %vm610_vm2, %v800_v44, %v1013_v47  ;;  %v1317_v44 = vld [vmem:[%s2151_s10 + $0x58] sm:$0xff]  ;;  %v1319_v47 = vld [vmem:[%s2151_s10 + $0x68] sm:$0xff] }
 0x608   : > { %1650 = vmatprep.mubr.msk.f32.mxu1 %vm472_vm0, %v1018_v48  ;;  %v1771_v48 = vpack.c.bf16 %v1319_v47, %v1318_v46  ;;  %v1544_v46 = vld [vmem:[%s2152_s11] ss:$0 sm:$0xff] }
 0x60a   : > { %v1015_v49 = vpop.permute.xlu1 %1014 }
 0x60b   : > { %v1019_v50 = vsel %vm610_vm2, %v1627_v43, %v1015_v49  ;;  %v1316_v43 = vld [vmem:[%s2151_s10 + $0x50] sm:$0xff] }
 0x60c   : > { %1651 = vmatmul.mubr.msk.f32.vlgmr.msra.gmra.mrb[6].mxu1 %vm472_vm0, %v1019_v50  ;;  %v1767_v45 = vpack.c.bf16 %v1317_v44, %v1316_v43  ;;  %v1320_v49 = vld [vmem:[%s2151_s10 + $0x70] sm:$0xff]  ;;  %v1321_v50 = vld [vmem:[%s2151_s10 + $0x78] sm:$0xff] }
 0x60d   : > { %1742 = vmatpush3.bf16.msra.mxu1 %v1739_v8 }
 0x60e   : > { %1744 = vmatprep.subr.bf16.mxu1 %v1743_v11  ;;  %1768 = vmatprep.subr.bf16.mxu0 %v1767_v45 }
 0x60f   : > { %1770 = vmatpush3.bf16.msra.mxu0 %v1767_v45 }
 0x610   : > { %1772 = vmatprep.subr.bf16.mxu0 %v1771_v48 }
 0x611   : > { %1746 = vmatpush3.bf16.msra.mxu1 %v1743_v11 }
 0x613   : > { %1774 = vmatpush3.bf16.msra.mxu0 %v1771_v48 }
 0x6df   : > { %v1652_v51 = vpop.f32.mrb[6].mxu1 }
 0x6e0   : > { %v1106_v53 = vadd.f32 %v1652_v51, %v1958_v1  ;;  %v1096_v54 = vpop.f32.mrb[7].mxu1  ;;  %v1775_v51 = vpack.c.bf16 %v1321_v50, %v1320_v49 }
 0x6e1   : > { %v1105_v55 = vadd.f32 %v1096_v54, %v1956_v0 }
 0x6e2   : > { %v2033_v56 = vadd.f32 %v1538_v52, %v1106_v53  ;;  %1776 = vmatprep.subr.bf16.mxu0 %v1775_v51 }
 0x6e3   : > { %v2035_v57 = vadd.f32 %v1538_v52, %v1105_v55  ;;  %1778 = vmatpush3.bf16.msra.mxu0 %v1775_v51  ;;  %v1541_v52 = vld [vmem:[%s2150_s9] ss:$0 sm:$0xff] }
 0x6e4   : > { %v1121_v58 = vsel %vm476_vm1, %v2033_v56, 0.0 }
 0x6e5   : > { %1122 = vadd.xlane.f32.xlu1 %v1121_v58  ;;  %v1118_v59 = vsel %vm472_vm0, %v2035_v57, 0.0 }
 0x6e6   : > { %1119 = vadd.xlane.f32.xlu0 %v1118_v59 }
 0x772   : > { %v1123_v60 = vpop.xlane.xlu1 %1122 }
 0x773   : > { %v1125_v61 = vmul.f32 0.03125, %v1123_v60  ;;  %v1120_v62 = vpop.xlane.xlu0 %1119 }
 0x774   : > { %v1124_v63 = vmul.f32 0.03125, %v1120_v62 }
 0x775   : > { %v1127_v1 = vsub.f32 %v2033_v56, %v1125_v61 }
 0x776   : > { %v1126_v0 = vsub.f32 %v2035_v57, %v1124_v63 }
 0x777   : > { %v1129_v4 = vmul.f32 %v1127_v1, %v1127_v1 }
 0x778   : > { %v1128_v2 = vmul.f32 %v1126_v0, %v1126_v0 }
 0x779   : > { %v1133_v5 = vsel %vm476_vm1, %v1129_v4, 0.0 }
 0x77a   : > { %v1130_v3 = vsel %vm472_vm0, %v1128_v2, 0.0 }
 0x77b   : > { %1131 = vadd.xlane.f32.xlu0 %v1130_v3 }
 0x77f   : > { %1134 = vadd.xlane.f32.xlu0 %v1133_v5 }
 0x808   : > { %v1132_v12 = vpop.xlane.xlu0 %1131 }
 0x809   : > { %v1136_v13 = vmul.f32 0.03125, %v1132_v12 }
 0x80b   : > { %v1138_v14 = vadd.f32 1e-05, %v1136_v13 }
 0x80c   : > { %v1135_v15 = vpop.xlane.xlu0 %1134 }
 0x80d   : > { %1834 = vrsqrt.f32 %v1138_v14  ;;  %v1137_v16 = vmul.f32 0.03125, %v1135_v15 }
 0x80f   : > { %v1139_v17 = vadd.f32 1e-05, %v1137_v16 }
 0x811   : > { %1836 = vrsqrt.f32 %v1139_v17 }
 0x817   : > { %v1835_v18 = vpop.eup %1834 }
 0x818   : > { %v1142_v20 = vmul.f32 %v1835_v18, %v1126_v0 }
 0x81a   : > { %v1150_v22 = vmul.f32 %v1539_v19, %v1142_v20 }
 0x81b   : > { %v1837_v23 = vpop.eup %1836 }
 0x81c   : > { %v1143_v24 = vmul.f32 %v1837_v23, %v1127_v1  ;;  %v1158_v25 = vadd.f32 %v1540_v21, %v1150_v22 }
 0x81e   : > { %v1151_v26 = vmul.f32 %v1539_v19, %v1143_v24  ;;  %1661 = vmatprep.mubr.msk.f32.mxu1 %vm472_vm0, %v1158_v25 }
 0x820   : > { %v1159_v27 = vadd.f32 %v1540_v21, %v1151_v26 }
 0x822   : > { %1662 = vmatmul.mubr.msk.f32.vlgmr.msra.gmra.mrb[8].mxu1 %vm472_vm0, %v1159_v27 }
 0x8f5   : > { %v1663_v53 = vpop.f32.mrb[8].mxu1 }
 0x8f6   : > { %v1249_v54 = vadd.f32 %v1663_v53, %v1541_v52  ;;  %v1243_v55 = vpop.f32.mrb[9].mxu1 }
 0x8f7   : > { %v1244_v58 = vadd.f32 %v1541_v52, %v1243_v55 }
 0x8f8   : > { %v1255_v59 = vmul.f32 0.70710677, %v1249_v54  ;;  %v1253_v42 = vmul.f32 0.5, %v1249_v54 }
 0x8f9   : > { %v1254_v60 = vmul.f32 0.70710677, %v1244_v58  ;;  %v1252_v40 = vmul.f32 0.5, %v1244_v58 }
 0x8fa   : > { %v1257_v61 = vand.u32 2147483647, %v1255_v59  ;;  %vm1297_vm9 = vcmp.ge.f32.partialorder %v1255_v59, 0.0 }
 0x8fb   : > { %v1256_v62 = vand.u32 2147483647, %v1254_v60  ;;  %vm1296_vm10 = vcmp.ge.f32.partialorder %v1254_v60, 0.0 }
 0x8fc   : > { %v1259_v63 = vmul.f32 0.3275911, %v1257_v61  ;;  %v1285_v3 = vsub.f32 0.0, %v1257_v61 }
 0x8fd   : > { %v1258_v1 = vmul.f32 0.3275911, %v1256_v62  ;;  %v1284_v4 = vsub.f32 0.0, %v1256_v62 }
 0x8fe   : > { %v1261_v0 = vadd.f32 1.0, %v1259_v63  ;;  %v1287_v6 = vmul.f32 %v1285_v3, %v1257_v61 }
 0x8ff   : > { %v1260_v2 = vadd.f32 1.0, %v1258_v1  ;;  %v1286_v9 = vmul.f32 %v1284_v4, %v1256_v62 }
 0x900   : > { %1838 = vrcp.f32 %v1261_v0  ;;  %v1290_v12 = vmul.f32 1.442695, %v1287_v6 }
 0x901   : > { %1840 = vrcp.f32 %v1260_v2  ;;  %v1288_v15 = vmul.f32 1.442695, %v1286_v9 }
 0x902   : > { %1842 = vpow2.f32 %v1290_v12 }
 0x903   : > { %1844 = vpow2.f32 %v1288_v15 }
 0x90a   : > { %v1839_v5 = vpop.eup %1838 }
 0x90b   : > { %v1841_v7 = vpop.eup %1840  ;;  %v1267_v8 = vmul.f32 1.0614054, %v1839_v5 }
 0x90c   : > { %v1266_v10 = vmul.f32 1.0614054, %v1841_v7  ;;  %v1843_v28 = vpop.eup %1842 }
 0x90d   : > { %v1269_v11 = vadd.f32 -1.4531521, %v1267_v8  ;;  %v1845_v30 = vpop.eup %1844 }
 0x90e   : > { %v1268_v13 = vadd.f32 -1.4531521, %v1266_v10  ;;  %v1546_v10 = vld [vmem:[%s2154_s13] ss:$0 sm:$0xff] }
 0x90f   : > { %v1271_v14 = vmul.f32 %v1839_v5, %v1269_v11 }
 0x910   : > { %v1270_v16 = vmul.f32 %v1841_v7, %v1268_v13 }
 0x911   : > { %v1273_v17 = vadd.f32 1.4214138, %v1271_v14 }
 0x912   : > { %v1272_v18 = vadd.f32 1.4214138, %v1270_v16 }
 0x913   : > { %v1275_v19 = vmul.f32 %v1839_v5, %v1273_v17 }
 0x914   : > { %v1274_v20 = vmul.f32 %v1841_v7, %v1272_v18 }
 0x915   : > { %v1277_v21 = vadd.f32 -0.28449672, %v1275_v19 }
 0x916   : > { %v1276_v22 = vadd.f32 -0.28449672, %v1274_v20 }
 0x917   : > { %v1279_v23 = vmul.f32 %v1839_v5, %v1277_v21 }
 0x918   : > { %v1278_v24 = vmul.f32 %v1841_v7, %v1276_v22 }
 0x919   : > { %v1281_v25 = vadd.f32 0.2548296, %v1279_v23 }
 0x91a   : > { %v1280_v26 = vadd.f32 0.2548296, %v1278_v24 }
 0x91b   : > { %v1283_v27 = vmul.f32 %v1839_v5, %v1281_v25 }
 0x91c   : > { %v1282_v29 = vmul.f32 %v1841_v7, %v1280_v26  ;;  %v1545_v7 = vld [vmem:[%s2153_s12] ss:$0 sm:$0xff] }
 0x91d   : > { %v1293_v31 = vmul.f32 %v1843_v28, %v1283_v27 }
 0x91e   : > { %v1292_v32 = vmul.f32 %v1845_v30, %v1282_v29 }
 0x91f   : > { %v1295_v33 = vsub.f32 1.0, %v1293_v31 }
 0x920   : > { %v1294_v34 = vsub.f32 1.0, %v1292_v32 }
 0x921   : > { %v1299_v35 = vsub.f32 0.0, %v1295_v33 }
 0x922   : > { %v1298_v36 = vsub.f32 0.0, %v1294_v34 }
 0x923   : > { %v1301_v37 = vsel %vm1297_vm9, %v1295_v33, %v1299_v35 }
 0x924   : > { %v1303_v38 = vadd.f32 1.0, %v1301_v37  ;;  %v1300_v39 = vsel %vm1296_vm10, %v1294_v34, %v1298_v36 }
 0x925   : > { %v1302_v41 = vadd.f32 1.0, %v1300_v39 }
 0x926   : > { %v1305_v44 = vmul.f32 %v1303_v38, %v1253_v42 }
 0x927   : > { %v1304_v43 = vmul.f32 %v1302_v41, %v1252_v40 }
 0x929   : > { %1696 = vmatprep.mubr.f32.mxu0 %v1304_v43 }
 0x92a   : > { %1697 = vmatmul.mubr.f32.vlgmr.msra.gmra.mrb[4].mxu0 %v1305_v44 }
 0x9fd   : > { %v1698_v45 = vpop.f32.mrb[4].mxu0 }
 0x9fe   : > { %v1398_v47 = vadd.f32 %v1698_v45, %v2033_v56  ;;  %v1388_v48 = vpop.f32.mrb[5].mxu0 }
 0x9ff   : > { %v1397_v49 = vadd.f32 %v1388_v48, %v2035_v57 }
 0xa00   : > { %v1407_v50 = vadd.f32 %v1544_v46, %v1398_v47 }
 0xa01   : > { %v1406_v51 = vadd.f32 %v1544_v46, %v1397_v49 }
 0xa02   : > { %v1413_v52 = vsel %vm476_vm1, %v1407_v50, 0.0 }
 0xa03   : > { %1414 = vadd.xlane.f32.xlu1 %v1413_v52  ;;  %v1410_v53 = vsel %vm472_vm0, %v1406_v51, 0.0 }
 0xa04   : > { %1411 = vadd.xlane.f32.xlu0 %v1410_v53 }
 0xa90   : > { %v1415_v54 = vpop.xlane.xlu1 %1414 }
 0xa91   : > { %v1417_v55 = vmul.f32 0.03125, %v1415_v54  ;;  %v1412_v58 = vpop.xlane.xlu0 %1411 }
 0xa92   : > { %v1416_v59 = vmul.f32 0.03125, %v1412_v58 }
 0xa93   : > { %v1419_v60 = vsub.f32 %v1407_v50, %v1417_v55 }
 0xa94   : > { %v1418_v61 = vsub.f32 %v1406_v51, %v1416_v59 }
 0xa95   : > { %v1421_v62 = vmul.f32 %v1419_v60, %v1419_v60 }
 0xa96   : > { %v1420_v63 = vmul.f32 %v1418_v61, %v1418_v61 }
 0xa97   : > { %v1425_v56 = vsel %vm476_vm1, %v1421_v62, 0.0 }
 0xa98   : > { %1426 = vadd.xlane.f32.xlu1 %v1425_v56  ;;  %v1422_v57 = vsel %vm472_vm0, %v1420_v63, 0.0 }
 0xa99   : > { %1423 = vadd.xlane.f32.xlu0 %v1422_v57 }
 0xb25   : > { %v1427_v1 = vpop.xlane.xlu1 %1426 }
 0xb26   : > { %v1429_v0 = vmul.f32 0.03125, %v1427_v1  ;;  %v1424_v2 = vpop.xlane.xlu0 %1423 }
 0xb27   : > { %v1428_v3 = vmul.f32 0.03125, %v1424_v2 }
 0xb28   : > { %v1431_v4 = vadd.f32 1e-05, %v1429_v0 }
 0xb29   : > { %v1430_v5 = vadd.f32 1e-05, %v1428_v3 }
 0xb2a   : > { %1846 = vrsqrt.f32 %v1431_v4 }
 0xb2b   : > { %1848 = vrsqrt.f32 %v1430_v5 }
 0xb34   : > { %v1847_v6 = vpop.eup %1846 }
 0xb35   : > { %v1849_v8 = vpop.eup %1848  ;;  %v1435_v9 = vmul.f32 %v1847_v6, %v1419_v60 }
 0xb36   : > { %v1434_v11 = vmul.f32 %v1849_v8, %v1418_v61 }
 0xb37   : > { %v1443_v12 = vmul.f32 %v1545_v7, %v1435_v9 }
 0xb38   : > { %v1442_v13 = vmul.f32 %v1545_v7, %v1434_v11 }
 0xb39   : > { %v1451_v14 = vadd.f32 %v1546_v10, %v1443_v12 }
 0xb3a   : > { %v1450_v15 = vadd.f32 %v1546_v10, %v1442_v13 }
 0xb3b   : > { %1453 = vst.msk [vmem:[%s467_s23 + $0x8] sm:$0x1] %vm476_vm1, %v1451_v14 }
 0xb3c   : > { %1452 = vst.msk [vmem:[%s467_s23] sm:$0xff] %vm472_vm0, %v1450_v15 }
 0xb3d PF: > { %s24_s29 = sadd.s32 1, %s1856_s29  }
 0xb3e   : > { %p21_p4 = scmp.ge.s32.totalorder %s24_s29, 4  }
 0xb40   :  { %23 = sbr.rel (!%p21_p4) target bundleno = 1 (0x1), region = 106 }

</bundles_post_ra>
